<compile_context>
chip_gen: v7x
topology: tpu7x:2x2x1
jax: 0.10.0
libtpu: 0.0.40
codegen_flags: <defaults>
</compile_context>

<pallas_src>
import functools

import jax
import jax.numpy as jnp
from jax.experimental import pallas as pl
from jax.experimental.pallas import tpu as pltpu

LANE = 128        # lane width: Cout (and K) padded to multiples of this
TILE_M_MAX = 512  # rows per grid step (~85% of HBM roofline at 512-row tiles)


def _round_up(x, m):
    return (x + m - 1) // m * m


# ----------------------------------------------------------------------------
# Pallas kernels: fused (bf16 matmul -> +bias -> [+res] -> [relu]) epilogue
# ----------------------------------------------------------------------------
def _gemm_bias_kernel(p_ref, w_ref, b_ref, o_ref, *, apply_relu):
    acc = jnp.dot(p_ref[...], w_ref[...], preferred_element_type=jnp.float32)
    y = acc + b_ref[...]
    if apply_relu:
        y = jnp.maximum(y, 0.0)
    o_ref[...] = y.astype(o_ref.dtype)


def _gemm_bias_res_kernel(p_ref, w_ref, b_ref, r_ref, o_ref, *, apply_relu):
    acc = jnp.dot(p_ref[...], w_ref[...], preferred_element_type=jnp.float32)
    y = acc + b_ref[...] + r_ref[...]
    if apply_relu:
        y = jnp.maximum(y, 0.0)
    o_ref[...] = y.astype(o_ref.dtype)


def fused_conv_matmul(patches, wmat, bias, residual=None, apply_relu=True):
    """out[M, Cout] = [relu]( patches @ wmat + bias [+ residual] ).

    patches : [M, K] float (cast to bf16 for the MXU)
    wmat    : [K, Cout] float, BN scale already folded in (cast to bf16)
    bias    : [Cout] f32 folded BN bias
    residual: optional [M, Cout] f32 (added in f32 before the ReLU)
    """
    M, K = patches.shape
    Cout = wmat.shape[1]

    # Lane / contraction padding: lane-dense stores + unmasked MXU feeds.
    K_pad = _round_up(K, LANE)
    C_pad = _round_up(Cout, LANE)

    # M tiling: single full-array block for small problems, 512-row pipeline
    # (double-buffered prefetch of patch / residual / output tiles) otherwise.
    tile_m = min(TILE_M_MAX, _round_up(M, 8))
    M_pad = _round_up(M, tile_m)
    grid_m = M_pad // tile_m

    p = jnp.pad(patches, ((0, M_pad - M), (0, K_pad - K))).astype(jnp.bfloat16)
    w = jnp.pad(wmat, ((0, K_pad - K), (0, C_pad - Cout))).astype(jnp.bfloat16)
    b = jnp.pad(bias.reshape(1, Cout).astype(jnp.float32),
                ((0, 0), (0, C_pad - Cout)))

    in_arrays = [p, w, b]
    in_specs = [
        pl.BlockSpec((tile_m, K_pad), lambda i: (i, 0)),
        pl.BlockSpec((K_pad, C_pad), lambda i: (0, 0)),   # resident across grid
        pl.BlockSpec((1, C_pad), lambda i: (0, 0)),       # resident across grid
    ]
    io_aliases = {}
    res_bytes = 0
    if residual is not None:
        r = jnp.pad(residual.astype(jnp.float32),
                    ((0, M_pad - M), (0, C_pad - Cout)))
        in_arrays.append(r)
        in_specs.append(pl.BlockSpec((tile_m, C_pad), lambda i: (i, 0)))
        io_aliases = {3: 0}          # reuse the residual buffer as the output
        res_bytes = r.size * 4
        kernel = functools.partial(_gemm_bias_res_kernel, apply_relu=apply_relu)
    else:
        kernel = functools.partial(_gemm_bias_kernel, apply_relu=apply_relu)

    cost = pl.CostEstimate(
        flops=2 * M_pad * K_pad * C_pad,
        transcendentals=0,
        bytes_accessed=int(p.size * 2 + w.size * 2 + b.size * 4
                           + M_pad * C_pad * 4 + res_bytes),
    )

    out = pl.pallas_call(
        kernel,
        grid=(grid_m,),
        in_specs=in_specs,
        out_specs=pl.BlockSpec((tile_m, C_pad), lambda i: (i, 0)),
        out_shape=jax.ShapeDtypeStruct((M_pad, C_pad), jnp.float32),
        input_output_aliases=io_aliases,
        compiler_params=pltpu.CompilerParams(
            dimension_semantics=("parallel",)),
        cost_estimate=cost,
    )(*in_arrays)
    return out[:M, :Cout]


# ----------------------------------------------------------------------------
# Glue: im2col for Conv3d(kernel=3, pad=1), parameter construction, forward
# ----------------------------------------------------------------------------
def im2col3d(x, stride):
    """x: [N, D, H, W, C] -> ([N*Do*Ho*Wo, 27*C], (N, Do, Ho, Wo))  (k=3, pad=1)."""
    N, D, H, W, C = x.shape
    xp = jnp.pad(x, ((0, 0), (1, 1), (1, 1), (1, 1), (0, 0)))
    Do = (D + 2 - 3) // stride + 1
    Ho = (H + 2 - 3) // stride + 1
    Wo = (W + 2 - 3) // stride + 1
    cols = []
    for kd in range(3):
        for kh in range(3):
            for kw in range(3):
                sl = xp[:,
                        kd:kd + stride * (Do - 1) + 1:stride,
                        kh:kh + stride * (Ho - 1) + 1:stride,
                        kw:kw + stride * (Wo - 1) + 1:stride,
                        :]
                cols.append(sl)
    patches = jnp.stack(cols, axis=4)                 # [N, Do, Ho, Wo, 27, C]
    return patches.reshape(N * Do * Ho * Wo, 27 * C), (N, Do, Ho, Wo)


def conv_bn_act(x, params, stride, apply_relu, residual=None):
    """ConvModule(conv3d bias=False -> BN3d(folded) -> optional ReLU), NDHWC."""
    w = params['w']                                   # [k, k, k, Cin, Cout]
    k = w.shape[0]
    Cout = w.shape[-1]
    if k == 1:                                        # 1x1x1 conv (adjust layer)
        N, D, H, W, _ = x.shape
        patches = x.reshape(N * D * H * W, x.shape[-1])
        shape = (N, D, H, W)
    else:                                             # 3x3x3 conv, pad=1
        patches, shape = im2col3d(x, stride)
    # Fold the BN scale into the weight matrix (per-output-channel column scale).
    wmat = w.reshape(-1, Cout) * params['scale'][None, :]
    res_flat = residual.reshape(-1, Cout) if residual is not None else None
    out_flat = fused_conv_matmul(patches, wmat, params['bias'],
                                 residual=res_flat, apply_relu=apply_relu)
    N, Do, Ho, Wo = shape
    return out_flat.reshape(N, Do, Ho, Wo, Cout)


def init_conv_bn(key, cin, cout, ksize=3):
    """Deterministic synthetic Conv3d(no-bias) + BN3d params; BN folded to scale/bias."""
    kw, kg, kb, km, kv = jax.random.split(key, 5)
    w = 0.05 * jax.random.normal(kw, (ksize, ksize, ksize, cin, cout), jnp.float32)
    gamma = 1.0 + 0.1 * jax.random.normal(kg, (cout,), jnp.float32)
    beta = 0.1 * jax.random.normal(kb, (cout,), jnp.float32)
    mean = 0.1 * jax.random.normal(km, (cout,), jnp.float32)
    var = jnp.abs(1.0 + 0.1 * jax.random.normal(kv, (cout,), jnp.float32))
    eps = 1e-5
    scale = gamma / jnp.sqrt(var + eps)
    bias = beta - mean * scale
    return {'w': w, 'scale': scale, 'bias': bias}


def init_custom_resnet3d(key, numC_input, num_layer=(2, 2, 2), num_channels=None,
                         stride=(2, 2, 2), adjust_number_channel=None):
    assert len(num_layer) == len(stride)
    if num_channels is None:
        num_channels = [numC_input * 2 ** (i + 1) for i in range(len(num_layer))]
    layers = []
    curr = numC_input
    for i in range(len(num_layer)):
        blocks = []
        key, k1, k2, k3 = jax.random.split(key, 4)
        blocks.append({'conv1': init_conv_bn(k1, curr, num_channels[i]),
                       'conv2': init_conv_bn(k2, num_channels[i], num_channels[i]),
                       'downsample': init_conv_bn(k3, curr, num_channels[i]),
                       'stride': stride[i]})
        curr = num_channels[i]
        for _ in range(num_layer[i] - 1):
            key, k1, k2 = jax.random.split(key, 3)
            blocks.append({'conv1': init_conv_bn(k1, curr, curr),
                           'conv2': init_conv_bn(k2, curr, curr),
                           'downsample': None, 'stride': 1})
        layers.append(blocks)

    adjust = None
    if adjust_number_channel is not None:
        if adjust_number_channel == num_channels[0]:
            adjust_number = len(num_channels) - 1
        else:
            adjust_number = len(num_channels)
        adjust = []
        for i in range(adjust_number):
            cin = num_channels[i] if adjust_number == len(num_channels) else num_channels[i + 1]
            key, ka = jax.random.split(key)
            adjust.append(init_conv_bn(ka, cin, adjust_number_channel, ksize=1))
    return {'layers': layers, 'adjust': adjust}


def basic_block_forward(x, bp):
    stride = bp['stride']
    if bp['downsample'] is not None:
        identity = conv_bn_act(x, bp['downsample'], stride, apply_relu=False)
    else:
        identity = x
    y = conv_bn_act(x, bp['conv1'], stride, apply_relu=True)
    # conv2 has NO activation of its own in PyTorch; the ReLU is applied AFTER
    # the residual add.  Both the add and that ReLU are fused into the conv2
    # kernel epilogue here (residual=identity, apply_relu=True).
    y = conv_bn_act(y, bp['conv2'], 1, apply_relu=True, residual=identity)
    return y


def custom_resnet3d_forward(x_ncdhw, params, backbone_output_ids=None):
    """x_ncdhw: [N, C, D, H, W] (PyTorch convention). Returns list of NCDHW feats."""
    x = jnp.transpose(x_ncdhw, (0, 2, 3, 4, 1)).astype(jnp.float32)  # -> NDHWC
    layers = params['layers']
    if backbone_output_ids is None:
        backbone_output_ids = range(len(layers))
    feats = []
    for lid, blocks in enumerate(layers):
        for bp in blocks:
            x = basic_block_forward(x, bp)
        if lid in backbone_output_ids:
            feats.append(x)
    if params['adjust'] is not None:
        n = len(params['adjust'])
        for i in range(n):
            idx = i if n == len(feats) else i + 1
            feats[idx] = conv_bn_act(feats[idx], params['adjust'][i], 1, apply_relu=True)
    # back to NCDHW to match PyTorch output convention
    return [jnp.transpose(f, (0, 4, 1, 2, 3)) for f in feats]


if __name__ == "__main__":
    key = jax.random.PRNGKey(0)
    k_param, k_in = jax.random.split(key)

    numC_input = 4
    N, C, D, H, W = 2, numC_input, 8, 16, 16        # NCDHW, PyTorch convention
    x = jax.random.normal(k_in, (N, C, D, H, W), jnp.float32)

    params = init_custom_resnet3d(k_param, numC_input,
                                  num_layer=(2, 2, 2), stride=(2, 2, 2),
                                  adjust_number_channel=None)

    # params closed over (not traced) so Python ints (strides) stay static.
    fwd = jax.jit(lambda inp: custom_resnet3d_forward(inp, params))
    feats = fwd(x)
    for f in feats:
        jax.block_until_ready(f)

    # Expected shapes: [2,8,4,8,8], [2,16,2,4,4], [2,32,1,2,2]
    assert feats[0].shape == (2, 8, 4, 8, 8)
    assert feats[1].shape == (2, 16, 2, 4, 4)
    assert feats[2].shape == (2, 32, 1, 2, 2)
    print("KERNEL_OK")
</pallas_src>

<mosaic_0001>
module attributes {stable_mosaic.version = 11 : i64} {
  func.func @_gemm_bias_kernel(%arg0: i32, %arg1: memref<512x128xbf16, #tpu.memory_space<vmem>>, %arg2: memref<128x128xbf16, #tpu.memory_space<vmem>>, %arg3: memref<1x128xf32, #tpu.memory_space<vmem>>, %arg4: memref<512x128xf32, #tpu.memory_space<vmem>>) attributes {dimension_semantics = [#tpu.dimension_semantics<parallel>], iteration_bounds = array<i64: 1>, scalar_prefetch = 0 : i64, scratch_operands = 0 : i64, tpu.core_type = #tpu.core_type<tc>, window_params = [{transform_indices = @transform_0, window_bounds = array<i64: 512, 128>}, {pipeline_mode = #tpu.pipeline_mode<synchronous>, transform_indices = @transform_1, window_bounds = array<i64: 128, 128>}, {pipeline_mode = #tpu.pipeline_mode<synchronous>, transform_indices = @transform_2, window_bounds = array<i64: 1, 128>}, {transform_indices = @transform_3, window_bounds = array<i64: 512, 128>}]} {
    %c0 = arith.constant 0 : index
    %c0_0 = arith.constant 0 : index
    %0 = vector.load %arg1[%c0, %c0_0] : memref<512x128xbf16, #tpu.memory_space<vmem>>, vector<512x128xbf16>
    %c0_1 = arith.constant 0 : index
    %c0_2 = arith.constant 0 : index
    %1 = vector.load %arg2[%c0_1, %c0_2] : memref<128x128xbf16, #tpu.memory_space<vmem>>, vector<128x128xbf16>
    %cst = arith.constant dense<0.000000e+00> : vector<512x128xf32>
    %2 = tpu.matmul %0, %1, %cst {dimension_numbers = #tpu.dot_dimension_numbers<[1], [0], [0], [1], [0, 0, 1, 1], [], []>} : vector<512x128xbf16>, vector<128x128xbf16>, vector<512x128xf32> -> vector<512x128xf32>
    %c0_3 = arith.constant 0 : index
    %c0_4 = arith.constant 0 : index
    %3 = vector.load %arg3[%c0_3, %c0_4] : memref<1x128xf32, #tpu.memory_space<vmem>>, vector<1x128xf32>
    %4 = vector.broadcast %3 : vector<1x128xf32> to vector<512x128xf32>
    %5 = arith.addf %2, %4 : vector<512x128xf32>
    %cst_5 = arith.constant 0.000000e+00 : f32
    %6 = vector.broadcast %cst_5 : f32 to vector<512x128xf32>
    %7 = arith.maximumf %5, %6 : vector<512x128xf32>
    %c0_6 = arith.constant 0 : index
    %c0_7 = arith.constant 0 : index
    %8 = vector.load %arg4[%c0_6, %c0_7] : memref<512x128xf32, #tpu.memory_space<vmem>>, vector<512x128xf32>
    tpu.vector_store %arg4[%c0_6, %c0_7], %7 {strides = array<i32>} : memref<512x128xf32, #tpu.memory_space<vmem>>, vector<512x128xf32>,
    return
  }
  func.func @transform_0(%arg0: i32) -> (i32, i32) {
    %c0_i32 = arith.constant 0 : i32
    %c0_i32_0 = arith.constant 0 : i32
    return %arg0, %c0_i32 : i32, i32
  }
  func.func @transform_1(%arg0: i32) -> (i32, i32) {
    %c0_i32 = arith.constant 0 : i32
    %c0_i32_0 = arith.constant 0 : i32
    %c0_i32_1 = arith.constant 0 : i32
    return %c0_i32, %c0_i32_0 : i32, i32
  }
  func.func @transform_2(%arg0: i32) -> (i32, i32) {
    %c0_i32 = arith.constant 0 : i32
    %c0_i32_0 = arith.constant 0 : i32
    %c0_i32_1 = arith.constant 0 : i32
    return %c0_i32, %c0_i32_0 : i32, i32
  }
  func.func @transform_3(%arg0: i32) -> (i32, i32) {
    %c0_i32 = arith.constant 0 : i32
    %c0_i32_0 = arith.constant 0 : i32
    return %arg0, %c0_i32 : i32, i32
  }
}

module attributes {stable_mosaic.version = 11 : i64} {
  func.func @_gemm_bias_kernel(%arg0: i32, %arg1: memref<512x128xbf16, #tpu.memory_space<vmem>>, %arg2: memref<128x128xbf16, #tpu.memory_space<vmem>>, %arg3: memref<1x128xf32, #tpu.memory_space<vmem>>, %arg4: memref<512x128xf32, #tpu.memory_space<vmem>>) attributes {dimension_semantics = [#tpu.dimension_semantics<parallel>], iteration_bounds = array<i64: 1>, scalar_prefetch = 0 : i64, scratch_operands = 0 : i64, tpu.core_type = #tpu.core_type<tc>, window_params = [{transform_indices = @transform_0, window_bounds = array<i64: 512, 128>}, {pipeline_mode = #tpu.pipeline_mode<synchronous>, transform_indices = @transform_1, window_bounds = array<i64: 128, 128>}, {pipeline_mode = #tpu.pipeline_mode<synchronous>, transform_indices = @transform_2, window_bounds = array<i64: 1, 128>}, {transform_indices = @transform_3, window_bounds = array<i64: 512, 128>}]} {
    %c0 = arith.constant 0 : index
    %c0_0 = arith.constant 0 : index
    %0 = vector.load %arg1[%c0, %c0_0] : memref<512x128xbf16, #tpu.memory_space<vmem>>, vector<512x128xbf16>
    %c0_1 = arith.constant 0 : index
    %c0_2 = arith.constant 0 : index
    %1 = vector.load %arg2[%c0_1, %c0_2] : memref<128x128xbf16, #tpu.memory_space<vmem>>, vector<128x128xbf16>
    %cst = arith.constant dense<0.000000e+00> : vector<512x128xf32>
    %2 = tpu.matmul %0, %1, %cst {dimension_numbers = #tpu.dot_dimension_numbers<[1], [0], [0], [1], [0, 0, 1, 1], [], []>} : vector<512x128xbf16>, vector<128x128xbf16>, vector<512x128xf32> -> vector<512x128xf32>
    %c0_3 = arith.constant 0 : index
    %c0_4 = arith.constant 0 : index
    %3 = vector.load %arg3[%c0_3, %c0_4] : memref<1x128xf32, #tpu.memory_space<vmem>>, vector<1x128xf32>
    %4 = vector.broadcast %3 : vector<1x128xf32> to vector<512x128xf32>
    %5 = arith.addf %2, %4 : vector<512x128xf32>
    %c0_5 = arith.constant 0 : index
    %c0_6 = arith.constant 0 : index
    %6 = vector.load %arg4[%c0_5, %c0_6] : memref<512x128xf32, #tpu.memory_space<vmem>>, vector<512x128xf32>
    tpu.vector_store %arg4[%c0_5, %c0_6], %5 {strides = array<i32>} : memref<512x128xf32, #tpu.memory_space<vmem>>, vector<512x128xf32>,
    return
  }
  func.func @transform_0(%arg0: i32) -> (i32, i32) {
    %c0_i32 = arith.constant 0 : i32
    %c0_i32_0 = arith.constant 0 : i32
    return %arg0, %c0_i32 : i32, i32
  }
  func.func @transform_1(%arg0: i32) -> (i32, i32) {
    %c0_i32 = arith.constant 0 : i32
    %c0_i32_0 = arith.constant 0 : i32
    %c0_i32_1 = arith.constant 0 : i32
    return %c0_i32, %c0_i32_0 : i32, i32
  }
  func.func @transform_2(%arg0: i32) -> (i32, i32) {
    %c0_i32 = arith.constant 0 : i32
    %c0_i32_0 = arith.constant 0 : i32
    %c0_i32_1 = arith.constant 0 : i32
    return %c0_i32, %c0_i32_0 : i32, i32
  }
  func.func @transform_3(%arg0: i32) -> (i32, i32) {
    %c0_i32 = arith.constant 0 : i32
    %c0_i32_0 = arith.constant 0 : i32
    return %arg0, %c0_i32 : i32, i32
  }
}

module attributes {stable_mosaic.version = 11 : i64} {
  func.func @_gemm_bias_res_kernel(%arg0: i32, %arg1: memref<512x256xbf16, #tpu.memory_space<vmem>>, %arg2: memref<256x128xbf16, #tpu.memory_space<vmem>>, %arg3: memref<1x128xf32, #tpu.memory_space<vmem>>, %arg4: memref<512x128xf32, #tpu.memory_space<vmem>>, %arg5: memref<512x128xf32, #tpu.memory_space<vmem>>) attributes {dimension_semantics = [#tpu.dimension_semantics<parallel>], iteration_bounds = array<i64: 1>, scalar_prefetch = 0 : i64, scratch_operands = 0 : i64, tpu.core_type = #tpu.core_type<tc>, window_params = [{transform_indices = @transform_0, window_bounds = array<i64: 512, 256>}, {pipeline_mode = #tpu.pipeline_mode<synchronous>, transform_indices = @transform_1, window_bounds = array<i64: 256, 128>}, {pipeline_mode = #tpu.pipeline_mode<synchronous>, transform_indices = @transform_2, window_bounds = array<i64: 1, 128>}, {transform_indices = @transform_3, window_bounds = array<i64: 512, 128>}, {transform_indices = @transform_4, window_bounds = array<i64: 512, 128>}]} {
    %c0 = arith.constant 0 : index
    %c0_0 = arith.constant 0 : index
    %0 = vector.load %arg1[%c0, %c0_0] : memref<512x256xbf16, #tpu.memory_space<vmem>>, vector<512x256xbf16>
    %c0_1 = arith.constant 0 : index
    %c0_2 = arith.constant 0 : index
    %1 = vector.load %arg2[%c0_1, %c0_2] : memref<256x128xbf16, #tpu.memory_space<vmem>>, vector<256x128xbf16>
    %cst = arith.constant dense<0.000000e+00> : vector<512x128xf32>
    %2 = tpu.matmul %0, %1, %cst {dimension_numbers = #tpu.dot_dimension_numbers<[1], [0], [0], [1], [0, 0, 1, 1], [], []>} : vector<512x256xbf16>, vector<256x128xbf16>, vector<512x128xf32> -> vector<512x128xf32>
    %c0_3 = arith.constant 0 : index
    %c0_4 = arith.constant 0 : index
    %3 = vector.load %arg3[%c0_3, %c0_4] : memref<1x128xf32, #tpu.memory_space<vmem>>, vector<1x128xf32>
    %4 = vector.broadcast %3 : vector<1x128xf32> to vector<512x128xf32>
    %5 = arith.addf %2, %4 : vector<512x128xf32>
    %c0_5 = arith.constant 0 : index
    %c0_6 = arith.constant 0 : index
    %6 = vector.load %arg4[%c0_5, %c0_6] : memref<512x128xf32, #tpu.memory_space<vmem>>, vector<512x128xf32>
    %7 = arith.addf %5, %6 : vector<512x128xf32>
    %cst_7 = arith.constant 0.000000e+00 : f32
    %8 = vector.broadcast %cst_7 : f32 to vector<512x128xf32>
    %9 = arith.maximumf %7, %8 : vector<512x128xf32>
    %c0_8 = arith.constant 0 : index
    %c0_9 = arith.constant 0 : index
    %10 = vector.load %arg5[%c0_8, %c0_9] : memref<512x128xf32, #tpu.memory_space<vmem>>, vector<512x128xf32>
    tpu.vector_store %arg5[%c0_8, %c0_9], %9 {strides = array<i32>} : memref<512x128xf32, #tpu.memory_space<vmem>>, vector<512x128xf32>,
    return
  }
  func.func @transform_0(%arg0: i32) -> (i32, i32) {
    %c0_i32 = arith.constant 0 : i32
    %c0_i32_0 = arith.constant 0 : i32
    return %arg0, %c0_i32 : i32, i32
  }
  func.func @transform_1(%arg0: i32) -> (i32, i32) {
    %c0_i32 = arith.constant 0 : i32
    %c0_i32_0 = arith.constant 0 : i32
    %c0_i32_1 = arith.constant 0 : i32
    return %c0_i32, %c0_i32_0 : i32, i32
  }
  func.func @transform_2(%arg0: i32) -> (i32, i32) {
    %c0_i32 = arith.constant 0 : i32
    %c0_i32_0 = arith.constant 0 : i32
    %c0_i32_1 = arith.constant 0 : i32
    return %c0_i32, %c0_i32_0 : i32, i32
  }
  func.func @transform_3(%arg0: i32) -> (i32, i32) {
    %c0_i32 = arith.constant 0 : i32
    %c0_i32_0 = arith.constant 0 : i32
    return %arg0, %c0_i32 : i32, i32
  }
  func.func @transform_4(%arg0: i32) -> (i32, i32) {
    %c0_i32 = arith.constant 0 : i32
    %c0_i32_0 = arith.constant 0 : i32
    return %arg0, %c0_i32 : i32, i32
  }
}

module attributes {stable_mosaic.version = 11 : i64} {
  func.func @_gemm_bias_kernel(%arg0: i32, %arg1: memref<512x256xbf16, #tpu.memory_space<vmem>>, %arg2: memref<256x128xbf16, #tpu.memory_space<vmem>>, %arg3: memref<1x128xf32, #tpu.memory_space<vmem>>, %arg4: memref<512x128xf32, #tpu.memory_space<vmem>>) attributes {dimension_semantics = [#tpu.dimension_semantics<parallel>], iteration_bounds = array<i64: 1>, scalar_prefetch = 0 : i64, scratch_operands = 0 : i64, tpu.core_type = #tpu.core_type<tc>, window_params = [{transform_indices = @transform_0, window_bounds = array<i64: 512, 256>}, {pipeline_mode = #tpu.pipeline_mode<synchronous>, transform_indices = @transform_1, window_bounds = array<i64: 256, 128>}, {pipeline_mode = #tpu.pipeline_mode<synchronous>, transform_indices = @transform_2, window_bounds = array<i64: 1, 128>}, {transform_indices = @transform_3, window_bounds = array<i64: 512, 128>}]} {
    %c0 = arith.constant 0 : index
    %c0_0 = arith.constant 0 : index
    %0 = vector.load %arg1[%c0, %c0_0] : memref<512x256xbf16, #tpu.memory_space<vmem>>, vector<512x256xbf16>
    %c0_1 = arith.constant 0 : index
    %c0_2 = arith.constant 0 : index
    %1 = vector.load %arg2[%c0_1, %c0_2] : memref<256x128xbf16, #tpu.memory_space<vmem>>, vector<256x128xbf16>
    %cst = arith.constant dense<0.000000e+00> : vector<512x128xf32>
    %2 = tpu.matmul %0, %1, %cst {dimension_numbers = #tpu.dot_dimension_numbers<[1], [0], [0], [1], [0, 0, 1, 1], [], []>} : vector<512x256xbf16>, vector<256x128xbf16>, vector<512x128xf32> -> vector<512x128xf32>
    %c0_3 = arith.constant 0 : index
    %c0_4 = arith.constant 0 : index
    %3 = vector.load %arg3[%c0_3, %c0_4] : memref<1x128xf32, #tpu.memory_space<vmem>>, vector<1x128xf32>
    %4 = vector.broadcast %3 : vector<1x128xf32> to vector<512x128xf32>
    %5 = arith.addf %2, %4 : vector<512x128xf32>
    %cst_5 = arith.constant 0.000000e+00 : f32
    %6 = vector.broadcast %cst_5 : f32 to vector<512x128xf32>
    %7 = arith.maximumf %5, %6 : vector<512x128xf32>
    %c0_6 = arith.constant 0 : index
    %c0_7 = arith.constant 0 : index
    %8 = vector.load %arg4[%c0_6, %c0_7] : memref<512x128xf32, #tpu.memory_space<vmem>>, vector<512x128xf32>
    tpu.vector_store %arg4[%c0_6, %c0_7], %7 {strides = array<i32>} : memref<512x128xf32, #tpu.memory_space<vmem>>, vector<512x128xf32>,
    return
  }
  func.func @transform_0(%arg0: i32) -> (i32, i32) {
    %c0_i32 = arith.constant 0 : i32
    %c0_i32_0 = arith.constant 0 : i32
    return %arg0, %c0_i32 : i32, i32
  }
  func.func @transform_1(%arg0: i32) -> (i32, i32) {
    %c0_i32 = arith.constant 0 : i32
    %c0_i32_0 = arith.constant 0 : i32
    %c0_i32_1 = arith.constant 0 : i32
    return %c0_i32, %c0_i32_0 : i32, i32
  }
  func.func @transform_2(%arg0: i32) -> (i32, i32) {
    %c0_i32 = arith.constant 0 : i32
    %c0_i32_0 = arith.constant 0 : i32
    %c0_i32_1 = arith.constant 0 : i32
    return %c0_i32, %c0_i32_0 : i32, i32
  }
  func.func @transform_3(%arg0: i32) -> (i32, i32) {
    %c0_i32 = arith.constant 0 : i32
    %c0_i32_0 = arith.constant 0 : i32
    return %arg0, %c0_i32 : i32, i32
  }
}

module attributes {stable_mosaic.version = 11 : i64} {
  func.func @_gemm_bias_kernel(%arg0: i32, %arg1: memref<64x256xbf16, #tpu.memory_space<vmem>>, %arg2: memref<256x128xbf16, #tpu.memory_space<vmem>>, %arg3: memref<1x128xf32, #tpu.memory_space<vmem>>, %arg4: memref<64x128xf32, #tpu.memory_space<vmem>>) attributes {dimension_semantics = [#tpu.dimension_semantics<parallel>], iteration_bounds = array<i64: 1>, scalar_prefetch = 0 : i64, scratch_operands = 0 : i64, tpu.core_type = #tpu.core_type<tc>, window_params = [{transform_indices = @transform_0, window_bounds = array<i64: 64, 256>}, {pipeline_mode = #tpu.pipeline_mode<synchronous>, transform_indices = @transform_1, window_bounds = array<i64: 256, 128>}, {pipeline_mode = #tpu.pipeline_mode<synchronous>, transform_indices = @transform_2, window_bounds = array<i64: 1, 128>}, {transform_indices = @transform_3, window_bounds = array<i64: 64, 128>}]} {
    %c0 = arith.constant 0 : index
    %c0_0 = arith.constant 0 : index
    %0 = vector.load %arg1[%c0, %c0_0] : memref<64x256xbf16, #tpu.memory_space<vmem>>, vector<64x256xbf16>
    %c0_1 = arith.constant 0 : index
    %c0_2 = arith.constant 0 : index
    %1 = vector.load %arg2[%c0_1, %c0_2] : memref<256x128xbf16, #tpu.memory_space<vmem>>, vector<256x128xbf16>
    %cst = arith.constant dense<0.000000e+00> : vector<64x128xf32>
    %2 = tpu.matmul %0, %1, %cst {dimension_numbers = #tpu.dot_dimension_numbers<[1], [0], [0], [1], [0, 0, 1, 1], [], []>} : vector<64x256xbf16>, vector<256x128xbf16>, vector<64x128xf32> -> vector<64x128xf32>
    %c0_3 = arith.constant 0 : index
    %c0_4 = arith.constant 0 : index
    %3 = vector.load %arg3[%c0_3, %c0_4] : memref<1x128xf32, #tpu.memory_space<vmem>>, vector<1x128xf32>
    %4 = vector.broadcast %3 : vector<1x128xf32> to vector<64x128xf32>
    %5 = arith.addf %2, %4 : vector<64x128xf32>
    %cst_5 = arith.constant 0.000000e+00 : f32
    %6 = vector.broadcast %cst_5 : f32 to vector<64x128xf32>
    %7 = arith.maximumf %5, %6 : vector<64x128xf32>
    %c0_6 = arith.constant 0 : index
    %c0_7 = arith.constant 0 : index
    %8 = vector.load %arg4[%c0_6, %c0_7] : memref<64x128xf32, #tpu.memory_space<vmem>>, vector<64x128xf32>
    tpu.vector_store %arg4[%c0_6, %c0_7], %7 {strides = array<i32>} : memref<64x128xf32, #tpu.memory_space<vmem>>, vector<64x128xf32>,
    return
  }
  func.func @transform_0(%arg0: i32) -> (i32, i32) {
    %c0_i32 = arith.constant 0 : i32
    %c0_i32_0 = arith.constant 0 : i32
    return %arg0, %c0_i32 : i32, i32
  }
  func.func @transform_1(%arg0: i32) -> (i32, i32) {
    %c0_i32 = arith.constant 0 : i32
    %c0_i32_0 = arith.constant 0 : i32
    %c0_i32_1 = arith.constant 0 : i32
    return %c0_i32, %c0_i32_0 : i32, i32
  }
  func.func @transform_2(%arg0: i32) -> (i32, i32) {
    %c0_i32 = arith.constant 0 : i32
    %c0_i32_0 = arith.constant 0 : i32
    %c0_i32_1 = arith.constant 0 : i32
    return %c0_i32, %c0_i32_0 : i32, i32
  }
  func.func @transform_3(%arg0: i32) -> (i32, i32) {
    %c0_i32 = arith.constant 0 : i32
    %c0_i32_0 = arith.constant 0 : i32
    return %arg0, %c0_i32 : i32, i32
  }
}

module attributes {stable_mosaic.version = 11 : i64} {
  func.func @_gemm_bias_kernel(%arg0: i32, %arg1: memref<64x256xbf16, #tpu.memory_space<vmem>>, %arg2: memref<256x128xbf16, #tpu.memory_space<vmem>>, %arg3: memref<1x128xf32, #tpu.memory_space<vmem>>, %arg4: memref<64x128xf32, #tpu.memory_space<vmem>>) attributes {dimension_semantics = [#tpu.dimension_semantics<parallel>], iteration_bounds = array<i64: 1>, scalar_prefetch = 0 : i64, scratch_operands = 0 : i64, tpu.core_type = #tpu.core_type<tc>, window_params = [{transform_indices = @transform_0, window_bounds = array<i64: 64, 256>}, {pipeline_mode = #tpu.pipeline_mode<synchronous>, transform_indices = @transform_1, window_bounds = array<i64: 256, 128>}, {pipeline_mode = #tpu.pipeline_mode<synchronous>, transform_indices = @transform_2, window_bounds = array<i64: 1, 128>}, {transform_indices = @transform_3, window_bounds = array<i64: 64, 128>}]} {
    %c0 = arith.constant 0 : index
    %c0_0 = arith.constant 0 : index
    %0 = vector.load %arg1[%c0, %c0_0] : memref<64x256xbf16, #tpu.memory_space<vmem>>, vector<64x256xbf16>
    %c0_1 = arith.constant 0 : index
    %c0_2 = arith.constant 0 : index
    %1 = vector.load %arg2[%c0_1, %c0_2] : memref<256x128xbf16, #tpu.memory_space<vmem>>, vector<256x128xbf16>
    %cst = arith.constant dense<0.000000e+00> : vector<64x128xf32>
    %2 = tpu.matmul %0, %1, %cst {dimension_numbers = #tpu.dot_dimension_numbers<[1], [0], [0], [1], [0, 0, 1, 1], [], []>} : vector<64x256xbf16>, vector<256x128xbf16>, vector<64x128xf32> -> vector<64x128xf32>
    %c0_3 = arith.constant 0 : index
    %c0_4 = arith.constant 0 : index
    %3 = vector.load %arg3[%c0_3, %c0_4] : memref<1x128xf32, #tpu.memory_space<vmem>>, vector<1x128xf32>
    %4 = vector.broadcast %3 : vector<1x128xf32> to vector<64x128xf32>
    %5 = arith.addf %2, %4 : vector<64x128xf32>
    %c0_5 = arith.constant 0 : index
    %c0_6 = arith.constant 0 : index
    %6 = vector.load %arg4[%c0_5, %c0_6] : memref<64x128xf32, #tpu.memory_space<vmem>>, vector<64x128xf32>
    tpu.vector_store %arg4[%c0_5, %c0_6], %5 {strides = array<i32>} : memref<64x128xf32, #tpu.memory_space<vmem>>, vector<64x128xf32>,
    return
  }
  func.func @transform_0(%arg0: i32) -> (i32, i32) {
    %c0_i32 = arith.constant 0 : i32
    %c0_i32_0 = arith.constant 0 : i32
    return %arg0, %c0_i32 : i32, i32
  }
  func.func @transform_1(%arg0: i32) -> (i32, i32) {
    %c0_i32 = arith.constant 0 : i32
    %c0_i32_0 = arith.constant 0 : i32
    %c0_i32_1 = arith.constant 0 : i32
    return %c0_i32, %c0_i32_0 : i32, i32
  }
  func.func @transform_2(%arg0: i32) -> (i32, i32) {
    %c0_i32 = arith.constant 0 : i32
    %c0_i32_0 = arith.constant 0 : i32
    %c0_i32_1 = arith.constant 0 : i32
    return %c0_i32, %c0_i32_0 : i32, i32
  }
  func.func @transform_3(%arg0: i32) -> (i32, i32) {
    %c0_i32 = arith.constant 0 : i32
    %c0_i32_0 = arith.constant 0 : i32
    return %arg0, %c0_i32 : i32, i32
  }
}

module attributes {stable_mosaic.version = 11 : i64} {
  func.func @_gemm_bias_res_kernel(%arg0: i32, %arg1: memref<64x512xbf16, #tpu.memory_space<vmem>>, %arg2: memref<512x128xbf16, #tpu.memory_space<vmem>>, %arg3: memref<1x128xf32, #tpu.memory_space<vmem>>, %arg4: memref<64x128xf32, #tpu.memory_space<vmem>>, %arg5: memref<64x128xf32, #tpu.memory_space<vmem>>) attributes {dimension_semantics = [#tpu.dimension_semantics<parallel>], iteration_bounds = array<i64: 1>, scalar_prefetch = 0 : i64, scratch_operands = 0 : i64, tpu.core_type = #tpu.core_type<tc>, window_params = [{transform_indices = @transform_0, window_bounds = array<i64: 64, 512>}, {pipeline_mode = #tpu.pipeline_mode<synchronous>, transform_indices = @transform_1, window_bounds = array<i64: 512, 128>}, {pipeline_mode = #tpu.pipeline_mode<synchronous>, transform_indices = @transform_2, window_bounds = array<i64: 1, 128>}, {transform_indices = @transform_3, window_bounds = array<i64: 64, 128>}, {transform_indices = @transform_4, window_bounds = array<i64: 64, 128>}]} {
    %c0 = arith.constant 0 : index
    %c0_0 = arith.constant 0 : index
    %0 = vector.load %arg1[%c0, %c0_0] : memref<64x512xbf16, #tpu.memory_space<vmem>>, vector<64x512xbf16>
    %c0_1 = arith.constant 0 : index
    %c0_2 = arith.constant 0 : index
    %1 = vector.load %arg2[%c0_1, %c0_2] : memref<512x128xbf16, #tpu.memory_space<vmem>>, vector<512x128xbf16>
    %cst = arith.constant dense<0.000000e+00> : vector<64x128xf32>
    %2 = tpu.matmul %0, %1, %cst {dimension_numbers = #tpu.dot_dimension_numbers<[1], [0], [0], [1], [0, 0, 1, 1], [], []>} : vector<64x512xbf16>, vector<512x128xbf16>, vector<64x128xf32> -> vector<64x128xf32>
    %c0_3 = arith.constant 0 : index
    %c0_4 = arith.constant 0 : index
    %3 = vector.load %arg3[%c0_3, %c0_4] : memref<1x128xf32, #tpu.memory_space<vmem>>, vector<1x128xf32>
    %4 = vector.broadcast %3 : vector<1x128xf32> to vector<64x128xf32>
    %5 = arith.addf %2, %4 : vector<64x128xf32>
    %c0_5 = arith.constant 0 : index
    %c0_6 = arith.constant 0 : index
    %6 = vector.load %arg4[%c0_5, %c0_6] : memref<64x128xf32, #tpu.memory_space<vmem>>, vector<64x128xf32>
    %7 = arith.addf %5, %6 : vector<64x128xf32>
    %cst_7 = arith.constant 0.000000e+00 : f32
    %8 = vector.broadcast %cst_7 : f32 to vector<64x128xf32>
    %9 = arith.maximumf %7, %8 : vector<64x128xf32>
    %c0_8 = arith.constant 0 : index
    %c0_9 = arith.constant 0 : index
    %10 = vector.load %arg5[%c0_8, %c0_9] : memref<64x128xf32, #tpu.memory_space<vmem>>, vector<64x128xf32>
    tpu.vector_store %arg5[%c0_8, %c0_9], %9 {strides = array<i32>} : memref<64x128xf32, #tpu.memory_space<vmem>>, vector<64x128xf32>,
    return
  }
  func.func @transform_0(%arg0: i32) -> (i32, i32) {
    %c0_i32 = arith.constant 0 : i32
    %c0_i32_0 = arith.constant 0 : i32
    return %arg0, %c0_i32 : i32, i32
  }
  func.func @transform_1(%arg0: i32) -> (i32, i32) {
    %c0_i32 = arith.constant 0 : i32
    %c0_i32_0 = arith.constant 0 : i32
    %c0_i32_1 = arith.constant 0 : i32
    return %c0_i32, %c0_i32_0 : i32, i32
  }
  func.func @transform_2(%arg0: i32) -> (i32, i32) {
    %c0_i32 = arith.constant 0 : i32
    %c0_i32_0 = arith.constant 0 : i32
    %c0_i32_1 = arith.constant 0 : i32
    return %c0_i32, %c0_i32_0 : i32, i32
  }
  func.func @transform_3(%arg0: i32) -> (i32, i32) {
    %c0_i32 = arith.constant 0 : i32
    %c0_i32_0 = arith.constant 0 : i32
    return %arg0, %c0_i32 : i32, i32
  }
  func.func @transform_4(%arg0: i32) -> (i32, i32) {
    %c0_i32 = arith.constant 0 : i32
    %c0_i32_0 = arith.constant 0 : i32
    return %arg0, %c0_i32 : i32, i32
  }
}

module attributes {stable_mosaic.version = 11 : i64} {
  func.func @_gemm_bias_kernel(%arg0: i32, %arg1: memref<64x512xbf16, #tpu.memory_space<vmem>>, %arg2: memref<512x128xbf16, #tpu.memory_space<vmem>>, %arg3: memref<1x128xf32, #tpu.memory_space<vmem>>, %arg4: memref<64x128xf32, #tpu.memory_space<vmem>>) attributes {dimension_semantics = [#tpu.dimension_semantics<parallel>], iteration_bounds = array<i64: 1>, scalar_prefetch = 0 : i64, scratch_operands = 0 : i64, tpu.core_type = #tpu.core_type<tc>, window_params = [{transform_indices = @transform_0, window_bounds = array<i64: 64, 512>}, {pipeline_mode = #tpu.pipeline_mode<synchronous>, transform_indices = @transform_1, window_bounds = array<i64: 512, 128>}, {pipeline_mode = #tpu.pipeline_mode<synchronous>, transform_indices = @transform_2, window_bounds = array<i64: 1, 128>}, {transform_indices = @transform_3, window_bounds = array<i64: 64, 128>}]} {
    %c0 = arith.constant 0 : index
    %c0_0 = arith.constant 0 : index
    %0 = vector.load %arg1[%c0, %c0_0] : memref<64x512xbf16, #tpu.memory_space<vmem>>, vector<64x512xbf16>
    %c0_1 = arith.constant 0 : index
    %c0_2 = arith.constant 0 : index
    %1 = vector.load %arg2[%c0_1, %c0_2] : memref<512x128xbf16, #tpu.memory_space<vmem>>, vector<512x128xbf16>
    %cst = arith.constant dense<0.000000e+00> : vector<64x128xf32>
    %2 = tpu.matmul %0, %1, %cst {dimension_numbers = #tpu.dot_dimension_numbers<[1], [0], [0], [1], [0, 0, 1, 1], [], []>} : vector<64x512xbf16>, vector<512x128xbf16>, vector<64x128xf32> -> vector<64x128xf32>
    %c0_3 = arith.constant 0 : index
    %c0_4 = arith.constant 0 : index
    %3 = vector.load %arg3[%c0_3, %c0_4] : memref<1x128xf32, #tpu.memory_space<vmem>>, vector<1x128xf32>
    %4 = vector.broadcast %3 : vector<1x128xf32> to vector<64x128xf32>
    %5 = arith.addf %2, %4 : vector<64x128xf32>
    %cst_5 = arith.constant 0.000000e+00 : f32
    %6 = vector.broadcast %cst_5 : f32 to vector<64x128xf32>
    %7 = arith.maximumf %5, %6 : vector<64x128xf32>
    %c0_6 = arith.constant 0 : index
    %c0_7 = arith.constant 0 : index
    %8 = vector.load %arg4[%c0_6, %c0_7] : memref<64x128xf32, #tpu.memory_space<vmem>>, vector<64x128xf32>
    tpu.vector_store %arg4[%c0_6, %c0_7], %7 {strides = array<i32>} : memref<64x128xf32, #tpu.memory_space<vmem>>, vector<64x128xf32>,
    return
  }
  func.func @transform_0(%arg0: i32) -> (i32, i32) {
    %c0_i32 = arith.constant 0 : i32
    %c0_i32_0 = arith.constant 0 : i32
    return %arg0, %c0_i32 : i32, i32
  }
  func.func @transform_1(%arg0: i32) -> (i32, i32) {
    %c0_i32 = arith.constant 0 : i32
    %c0_i32_0 = arith.constant 0 : i32
    %c0_i32_1 = arith.constant 0 : i32
    return %c0_i32, %c0_i32_0 : i32, i32
  }
  func.func @transform_2(%arg0: i32) -> (i32, i32) {
    %c0_i32 = arith.constant 0 : i32
    %c0_i32_0 = arith.constant 0 : i32
    %c0_i32_1 = arith.constant 0 : i32
    return %c0_i32, %c0_i32_0 : i32, i32
  }
  func.func @transform_3(%arg0: i32) -> (i32, i32) {
    %c0_i32 = arith.constant 0 : i32
    %c0_i32_0 = arith.constant 0 : i32
    return %arg0, %c0_i32 : i32, i32
  }
}

module attributes {stable_mosaic.version = 11 : i64} {
  func.func @_gemm_bias_kernel(%arg0: i32, %arg1: memref<8x512xbf16, #tpu.memory_space<vmem>>, %arg2: memref<512x128xbf16, #tpu.memory_space<vmem>>, %arg3: memref<1x128xf32, #tpu.memory_space<vmem>>, %arg4: memref<8x128xf32, #tpu.memory_space<vmem>>) attributes {dimension_semantics = [#tpu.dimension_semantics<parallel>], iteration_bounds = array<i64: 1>, scalar_prefetch = 0 : i64, scratch_operands = 0 : i64, tpu.core_type = #tpu.core_type<tc>, window_params = [{transform_indices = @transform_0, window_bounds = array<i64: 8, 512>}, {pipeline_mode = #tpu.pipeline_mode<synchronous>, transform_indices = @transform_1, window_bounds = array<i64: 512, 128>}, {pipeline_mode = #tpu.pipeline_mode<synchronous>, transform_indices = @transform_2, window_bounds = array<i64: 1, 128>}, {transform_indices = @transform_3, window_bounds = array<i64: 8, 128>}]} {
    %c0 = arith.constant 0 : index
    %c0_0 = arith.constant 0 : index
    %0 = vector.load %arg1[%c0, %c0_0] : memref<8x512xbf16, #tpu.memory_space<vmem>>, vector<8x512xbf16>
    %c0_1 = arith.constant 0 : index
    %c0_2 = arith.constant 0 : index
    %1 = vector.load %arg2[%c0_1, %c0_2] : memref<512x128xbf16, #tpu.memory_space<vmem>>, vector<512x128xbf16>
    %cst = arith.constant dense<0.000000e+00> : vector<8x128xf32>
    %2 = tpu.matmul %0, %1, %cst {dimension_numbers = #tpu.dot_dimension_numbers<[1], [0], [0], [1], [0, 0, 1, 1], [], []>} : vector<8x512xbf16>, vector<512x128xbf16>, vector<8x128xf32> -> vector<8x128xf32>
    %c0_3 = arith.constant 0 : index
    %c0_4 = arith.constant 0 : index
    %3 = vector.load %arg3[%c0_3, %c0_4] : memref<1x128xf32, #tpu.memory_space<vmem>>, vector<1x128xf32>
    %4 = vector.broadcast %3 : vector<1x128xf32> to vector<8x128xf32>
    %5 = arith.addf %2, %4 : vector<8x128xf32>
    %cst_5 = arith.constant 0.000000e+00 : f32
    %6 = vector.broadcast %cst_5 : f32 to vector<8x128xf32>
    %7 = arith.maximumf %5, %6 : vector<8x128xf32>
    %c0_6 = arith.constant 0 : index
    %c0_7 = arith.constant 0 : index
    %8 = vector.load %arg4[%c0_6, %c0_7] : memref<8x128xf32, #tpu.memory_space<vmem>>, vector<8x128xf32>
    tpu.vector_store %arg4[%c0_6, %c0_7], %7 {strides = array<i32>} : memref<8x128xf32, #tpu.memory_space<vmem>>, vector<8x128xf32>,
    return
  }
  func.func @transform_0(%arg0: i32) -> (i32, i32) {
    %c0_i32 = arith.constant 0 : i32
    %c0_i32_0 = arith.constant 0 : i32
    return %arg0, %c0_i32 : i32, i32
  }
  func.func @transform_1(%arg0: i32) -> (i32, i32) {
    %c0_i32 = arith.constant 0 : i32
    %c0_i32_0 = arith.constant 0 : i32
    %c0_i32_1 = arith.constant 0 : i32
    return %c0_i32, %c0_i32_0 : i32, i32
  }
  func.func @transform_2(%arg0: i32) -> (i32, i32) {
    %c0_i32 = arith.constant 0 : i32
    %c0_i32_0 = arith.constant 0 : i32
    %c0_i32_1 = arith.constant 0 : i32
    return %c0_i32, %c0_i32_0 : i32, i32
  }
  func.func @transform_3(%arg0: i32) -> (i32, i32) {
    %c0_i32 = arith.constant 0 : i32
    %c0_i32_0 = arith.constant 0 : i32
    return %arg0, %c0_i32 : i32, i32
  }
}

module attributes {stable_mosaic.version = 11 : i64} {
  func.func @_gemm_bias_kernel(%arg0: i32, %arg1: memref<8x512xbf16, #tpu.memory_space<vmem>>, %arg2: memref<512x128xbf16, #tpu.memory_space<vmem>>, %arg3: memref<1x128xf32, #tpu.memory_space<vmem>>, %arg4: memref<8x128xf32, #tpu.memory_space<vmem>>) attributes {dimension_semantics = [#tpu.dimension_semantics<parallel>], iteration_bounds = array<i64: 1>, scalar_prefetch = 0 : i64, scratch_operands = 0 : i64, tpu.core_type = #tpu.core_type<tc>, window_params = [{transform_indices = @transform_0, window_bounds = array<i64: 8, 512>}, {pipeline_mode = #tpu.pipeline_mode<synchronous>, transform_indices = @transform_1, window_bounds = array<i64: 512, 128>}, {pipeline_mode = #tpu.pipeline_mode<synchronous>, transform_indices = @transform_2, window_bounds = array<i64: 1, 128>}, {transform_indices = @transform_3, window_bounds = array<i64: 8, 128>}]} {
    %c0 = arith.constant 0 : index
    %c0_0 = arith.constant 0 : index
    %0 = vector.load %arg1[%c0, %c0_0] : memref<8x512xbf16, #tpu.memory_space<vmem>>, vector<8x512xbf16>
    %c0_1 = arith.constant 0 : index
    %c0_2 = arith.constant 0 : index
    %1 = vector.load %arg2[%c0_1, %c0_2] : memref<512x128xbf16, #tpu.memory_space<vmem>>, vector<512x128xbf16>
    %cst = arith.constant dense<0.000000e+00> : vector<8x128xf32>
    %2 = tpu.matmul %0, %1, %cst {dimension_numbers = #tpu.dot_dimension_numbers<[1], [0], [0], [1], [0, 0, 1, 1], [], []>} : vector<8x512xbf16>, vector<512x128xbf16>, vector<8x128xf32> -> vector<8x128xf32>
    %c0_3 = arith.constant 0 : index
    %c0_4 = arith.constant 0 : index
    %3 = vector.load %arg3[%c0_3, %c0_4] : memref<1x128xf32, #tpu.memory_space<vmem>>, vector<1x128xf32>
    %4 = vector.broadcast %3 : vector<1x128xf32> to vector<8x128xf32>
    %5 = arith.addf %2, %4 : vector<8x128xf32>
    %c0_5 = arith.constant 0 : index
    %c0_6 = arith.constant 0 : index
    %6 = vector.load %arg4[%c0_5, %c0_6] : memref<8x128xf32, #tpu.memory_space<vmem>>, vector<8x128xf32>
    tpu.vector_store %arg4[%c0_5, %c0_6], %5 {strides = array<i32>} : memref<8x128xf32, #tpu.memory_space<vmem>>, vector<8x128xf32>,
    return
  }
  func.func @transform_0(%arg0: i32) -> (i32, i32) {
    %c0_i32 = arith.constant 0 : i32
    %c0_i32_0 = arith.constant 0 : i32
    return %arg0, %c0_i32 : i32, i32
  }
  func.func @transform_1(%arg0: i32) -> (i32, i32) {
    %c0_i32 = arith.constant 0 : i32
    %c0_i32_0 = arith.constant 0 : i32
    %c0_i32_1 = arith.constant 0 : i32
    return %c0_i32, %c0_i32_0 : i32, i32
  }
  func.func @transform_2(%arg0: i32) -> (i32, i32) {
    %c0_i32 = arith.constant 0 : i32
    %c0_i32_0 = arith.constant 0 : i32
    %c0_i32_1 = arith.constant 0 : i32
    return %c0_i32, %c0_i32_0 : i32, i32
  }
  func.func @transform_3(%arg0: i32) -> (i32, i32) {
    %c0_i32 = arith.constant 0 : i32
    %c0_i32_0 = arith.constant 0 : i32
    return %arg0, %c0_i32 : i32, i32
  }
}

module attributes {stable_mosaic.version = 11 : i64} {
  func.func @_gemm_bias_res_kernel(%arg0: i32, %arg1: memref<8x896xbf16, #tpu.memory_space<vmem>>, %arg2: memref<896x128xbf16, #tpu.memory_space<vmem>>, %arg3: memref<1x128xf32, #tpu.memory_space<vmem>>, %arg4: memref<8x128xf32, #tpu.memory_space<vmem>>, %arg5: memref<8x128xf32, #tpu.memory_space<vmem>>) attributes {dimension_semantics = [#tpu.dimension_semantics<parallel>], iteration_bounds = array<i64: 1>, scalar_prefetch = 0 : i64, scratch_operands = 0 : i64, tpu.core_type = #tpu.core_type<tc>, window_params = [{transform_indices = @transform_0, window_bounds = array<i64: 8, 896>}, {pipeline_mode = #tpu.pipeline_mode<synchronous>, transform_indices = @transform_1, window_bounds = array<i64: 896, 128>}, {pipeline_mode = #tpu.pipeline_mode<synchronous>, transform_indices = @transform_2, window_bounds = array<i64: 1, 128>}, {transform_indices = @transform_3, window_bounds = array<i64: 8, 128>}, {transform_indices = @transform_4, window_bounds = array<i64: 8, 128>}]} {
    %c0 = arith.constant 0 : index
    %c0_0 = arith.constant 0 : index
    %0 = vector.load %arg1[%c0, %c0_0] : memref<8x896xbf16, #tpu.memory_space<vmem>>, vector<8x896xbf16>
    %c0_1 = arith.constant 0 : index
    %c0_2 = arith.constant 0 : index
    %1 = vector.load %arg2[%c0_1, %c0_2] : memref<896x128xbf16, #tpu.memory_space<vmem>>, vector<896x128xbf16>
    %cst = arith.constant dense<0.000000e+00> : vector<8x128xf32>
    %2 = tpu.matmul %0, %1, %cst {dimension_numbers = #tpu.dot_dimension_numbers<[1], [0], [0], [1], [0, 0, 1, 1], [], []>} : vector<8x896xbf16>, vector<896x128xbf16>, vector<8x128xf32> -> vector<8x128xf32>
    %c0_3 = arith.constant 0 : index
    %c0_4 = arith.constant 0 : index
    %3 = vector.load %arg3[%c0_3, %c0_4] : memref<1x128xf32, #tpu.memory_space<vmem>>, vector<1x128xf32>
    %4 = vector.broadcast %3 : vector<1x128xf32> to vector<8x128xf32>
    %5 = arith.addf %2, %4 : vector<8x128xf32>
    %c0_5 = arith.constant 0 : index
    %c0_6 = arith.constant 0 : index
    %6 = vector.load %arg4[%c0_5, %c0_6] : memref<8x128xf32, #tpu.memory_space<vmem>>, vector<8x128xf32>
    %7 = arith.addf %5, %6 : vector<8x128xf32>
    %cst_7 = arith.constant 0.000000e+00 : f32
    %8 = vector.broadcast %cst_7 : f32 to vector<8x128xf32>
    %9 = arith.maximumf %7, %8 : vector<8x128xf32>
    %c0_8 = arith.constant 0 : index
    %c0_9 = arith.constant 0 : index
    %10 = vector.load %arg5[%c0_8, %c0_9] : memref<8x128xf32, #tpu.memory_space<vmem>>, vector<8x128xf32>
    tpu.vector_store %arg5[%c0_8, %c0_9], %9 {strides = array<i32>} : memref<8x128xf32, #tpu.memory_space<vmem>>, vector<8x128xf32>,
    return
  }
  func.func @transform_0(%arg0: i32) -> (i32, i32) {
    %c0_i32 = arith.constant 0 : i32
    %c0_i32_0 = arith.constant 0 : i32
    return %arg0, %c0_i32 : i32, i32
  }
  func.func @transform_1(%arg0: i32) -> (i32, i32) {
    %c0_i32 = arith.constant 0 : i32
    %c0_i32_0 = arith.constant 0 : i32
    %c0_i32_1 = arith.constant 0 : i32
    return %c0_i32, %c0_i32_0 : i32, i32
  }
  func.func @transform_2(%arg0: i32) -> (i32, i32) {
    %c0_i32 = arith.constant 0 : i32
    %c0_i32_0 = arith.constant 0 : i32
    %c0_i32_1 = arith.constant 0 : i32
    return %c0_i32, %c0_i32_0 : i32, i32
  }
  func.func @transform_3(%arg0: i32) -> (i32, i32) {
    %c0_i32 = arith.constant 0 : i32
    %c0_i32_0 = arith.constant 0 : i32
    return %arg0, %c0_i32 : i32, i32
  }
  func.func @transform_4(%arg0: i32) -> (i32, i32) {
    %c0_i32 = arith.constant 0 : i32
    %c0_i32_0 = arith.constant 0 : i32
    return %arg0, %c0_i32 : i32, i32
  }
}

module attributes {stable_mosaic.version = 11 : i64} {
  func.func @_gemm_bias_kernel(%arg0: i32, %arg1: memref<8x896xbf16, #tpu.memory_space<vmem>>, %arg2: memref<896x128xbf16, #tpu.memory_space<vmem>>, %arg3: memref<1x128xf32, #tpu.memory_space<vmem>>, %arg4: memref<8x128xf32, #tpu.memory_space<vmem>>) attributes {dimension_semantics = [#tpu.dimension_semantics<parallel>], iteration_bounds = array<i64: 1>, scalar_prefetch = 0 : i64, scratch_operands = 0 : i64, tpu.core_type = #tpu.core_type<tc>, window_params = [{transform_indices = @transform_0, window_bounds = array<i64: 8, 896>}, {pipeline_mode = #tpu.pipeline_mode<synchronous>, transform_indices = @transform_1, window_bounds = array<i64: 896, 128>}, {pipeline_mode = #tpu.pipeline_mode<synchronous>, transform_indices = @transform_2, window_bounds = array<i64: 1, 128>}, {transform_indices = @transform_3, window_bounds = array<i64: 8, 128>}]} {
    %c0 = arith.constant 0 : index
    %c0_0 = arith.constant 0 : index
    %0 = vector.load %arg1[%c0, %c0_0] : memref<8x896xbf16, #tpu.memory_space<vmem>>, vector<8x896xbf16>
    %c0_1 = arith.constant 0 : index
    %c0_2 = arith.constant 0 : index
    %1 = vector.load %arg2[%c0_1, %c0_2] : memref<896x128xbf16, #tpu.memory_space<vmem>>, vector<896x128xbf16>
    %cst = arith.constant dense<0.000000e+00> : vector<8x128xf32>
    %2 = tpu.matmul %0, %1, %cst {dimension_numbers = #tpu.dot_dimension_numbers<[1], [0], [0], [1], [0, 0, 1, 1], [], []>} : vector<8x896xbf16>, vector<896x128xbf16>, vector<8x128xf32> -> vector<8x128xf32>
    %c0_3 = arith.constant 0 : index
    %c0_4 = arith.constant 0 : index
    %3 = vector.load %arg3[%c0_3, %c0_4] : memref<1x128xf32, #tpu.memory_space<vmem>>, vector<1x128xf32>
    %4 = vector.broadcast %3 : vector<1x128xf32> to vector<8x128xf32>
    %5 = arith.addf %2, %4 : vector<8x128xf32>
    %cst_5 = arith.constant 0.000000e+00 : f32
    %6 = vector.broadcast %cst_5 : f32 to vector<8x128xf32>
    %7 = arith.maximumf %5, %6 : vector<8x128xf32>
    %c0_6 = arith.constant 0 : index
    %c0_7 = arith.constant 0 : index
    %8 = vector.load %arg4[%c0_6, %c0_7] : memref<8x128xf32, #tpu.memory_space<vmem>>, vector<8x128xf32>
    tpu.vector_store %arg4[%c0_6, %c0_7], %7 {strides = array<i32>} : memref<8x128xf32, #tpu.memory_space<vmem>>, vector<8x128xf32>,
    return
  }
  func.func @transform_0(%arg0: i32) -> (i32, i32) {
    %c0_i32 = arith.constant 0 : i32
    %c0_i32_0 = arith.constant 0 : i32
    return %arg0, %c0_i32 : i32, i32
  }
  func.func @transform_1(%arg0: i32) -> (i32, i32) {
    %c0_i32 = arith.constant 0 : i32
    %c0_i32_0 = arith.constant 0 : i32
    %c0_i32_1 = arith.constant 0 : i32
    return %c0_i32, %c0_i32_0 : i32, i32
  }
  func.func @transform_2(%arg0: i32) -> (i32, i32) {
    %c0_i32 = arith.constant 0 : i32
    %c0_i32_0 = arith.constant 0 : i32
    %c0_i32_1 = arith.constant 0 : i32
    return %c0_i32, %c0_i32_0 : i32, i32
  }
  func.func @transform_3(%arg0: i32) -> (i32, i32) {
    %c0_i32 = arith.constant 0 : i32
    %c0_i32_0 = arith.constant 0 : i32
    return %arg0, %c0_i32 : i32, i32
  }
}

</mosaic_0001>

<bundles_post_ra>
// kernel: _lambda_.16
= control target key start
LH: loop header
LB: loop body
LE: loop exit
PB: predicated region body
PF: predicated region fallthrough
CT: control target
= control target key end

     0   :  { %s1381_s1 = inlined_call_operand.vmem [shape: bf16[128,128], index: 1, kind: input, shape index: {}]   ;;  %s1382_s0 = inlined_call_operand.vmem [shape: bf16[512,128], index: 0, kind: input, shape index: {}]   ;;  %s1383_s2 = inlined_call_operand.vmem [shape: f32[1,128], index: 2, kind: input, shape index: {}]   ;;  %s1384_s3 = inlined_call_operand.vmem [shape: f32[512,128], index: 3, kind: output, shape index: {}]  }
   0x1   :  { %v940_v0 = vld [vmem:[%s1381_s1] sm:$0xff]   ;;  %v941_v1 = vld [vmem:[%s1381_s1 + $0x8] sm:$0xff]   ;;  %v942_v2 = vld [vmem:[%s1381_s1 + $0x10] sm:$0xff]  }
   0x2   :  { %844 = vmatprep.subr.bf16.mxu0 %v940_v0  ;;  %924 = vmatprep.subr.bf16.mxu1 %v940_v0  ;;  %v943_v3 = vld [vmem:[%s1381_s1 + $0x18] sm:$0xff]   ;;  %v948_v4 = vld [vmem:[%s1382_s0] sm:$0xff]   ;;  %v945_v7 = vld [vmem:[%s1381_s1 + $0x28] sm:$0xff]  }
   0x3   :  { %845 = vmatpush3.bf16.msra.mxu0 %v940_v0  ;;  %932 = vmatpush3.bf16.msra.mxu1 %v940_v0  ;;  %v949_v5 = vld [vmem:[%s1382_s0 + $0x80] sm:$0xff]   ;;  %v946_v8 = vld [vmem:[%s1381_s1 + $0x30] sm:$0xff]   ;;  %v947_v9 = vld [vmem:[%s1381_s1 + $0x38] sm:$0xff]  }
   0x4   :  { %846 = vmatprep.subr.bf16.mxu0 %v941_v1  ;;  %925 = vmatprep.subr.bf16.mxu1 %v941_v1  ;;  %v944_v6 = vld [vmem:[%s1381_s1 + $0x20] sm:$0xff]   ;;  %v950_v10 = vld [vmem:[%s1382_s0 + $0x8] sm:$0xff]   ;;  %v952_v12 = vld [vmem:[%s1382_s0 + $0x10] sm:$0xff]  }
   0x5   :  { %860 = vmatprep.mubr.bf16.mxu0 %v948_v4  ;;  %892 = vmatprep.mubr.bf16.mxu1 %v949_v5  ;;  %v951_v11 = vld [vmem:[%s1382_s0 + $0x88] sm:$0xff]   ;;  %v953_v13 = vld [vmem:[%s1382_s0 + $0x90] sm:$0xff]   ;;  %v954_v14 = vld [vmem:[%s1382_s0 + $0x18] sm:$0xff]  }
   0x6   :  { %v955_v15 = vld [vmem:[%s1382_s0 + $0x98] sm:$0xff]   ;;  %v956_v16 = vld [vmem:[%s1382_s0 + $0x20] sm:$0xff]   ;;  %v958_v18 = vld [vmem:[%s1382_s0 + $0x28] sm:$0xff]  }
   0x7   :  { %847 = vmatpush3.bf16.msra.mxu0 %v941_v1  ;;  %933 = vmatpush3.bf16.msra.mxu1 %v941_v1  ;;  %v957_v17 = vld [vmem:[%s1382_s0 + $0xa0] sm:$0xff]   ;;  %v959_v19 = vld [vmem:[%s1382_s0 + $0xa8] sm:$0xff]   ;;  %v960_v20 = vld [vmem:[%s1382_s0 + $0x30] sm:$0xff]  }
   0x8   :  { %848 = vmatprep.subr.bf16.mxu0 %v942_v2  ;;  %926 = vmatprep.subr.bf16.mxu1 %v942_v2  ;;  %v961_v21 = vld [vmem:[%s1382_s0 + $0xb0] sm:$0xff]   ;;  %v962_v22 = vld [vmem:[%s1382_s0 + $0x38] sm:$0xff]   ;;  %v964_v24 = vld [vmem:[%s1382_s0 + $0x40] sm:$0xff]  }
   0x9   :  { %v963_v23 = vld [vmem:[%s1382_s0 + $0xb8] sm:$0xff]   ;;  %v965_v25 = vld [vmem:[%s1382_s0 + $0xc0] sm:$0xff]   ;;  %v966_v26 = vld [vmem:[%s1382_s0 + $0x48] sm:$0xff]  }
   0xa   :  { %v967_v27 = vld [vmem:[%s1382_s0 + $0xc8] sm:$0xff]   ;;  %v968_v28 = vld [vmem:[%s1382_s0 + $0x50] sm:$0xff]   ;;  %v970_v30 = vld [vmem:[%s1382_s0 + $0x58] sm:$0xff]  }
   0xb   :  { %849 = vmatpush3.bf16.msra.mxu0 %v942_v2  ;;  %934 = vmatpush3.bf16.msra.mxu1 %v942_v2  ;;  %v969_v29 = vld [vmem:[%s1382_s0 + $0xd0] sm:$0xff]   ;;  %v971_v31 = vld [vmem:[%s1382_s0 + $0xd8] sm:$0xff]   ;;  %v972_v32 = vld [vmem:[%s1382_s0 + $0x60] sm:$0xff]  }
   0xc   :  { %850 = vmatprep.subr.bf16.mxu0 %v943_v3  ;;  %927 = vmatprep.subr.bf16.mxu1 %v943_v3  ;;  %v973_v33 = vld [vmem:[%s1382_s0 + $0xe0] sm:$0xff]   ;;  %v974_v34 = vld [vmem:[%s1382_s0 + $0x68] sm:$0xff]   ;;  %v976_v36 = vld [vmem:[%s1382_s0 + $0x70] sm:$0xff]  }
   0xd   :  { %v975_v35 = vld [vmem:[%s1382_s0 + $0xe8] sm:$0xff]   ;;  %v977_v37 = vld [vmem:[%s1382_s0 + $0xf0] sm:$0xff]   ;;  %v978_v38 = vld [vmem:[%s1382_s0 + $0x78] sm:$0xff]  }
   0xe   :  { %v979_v39 = vld [vmem:[%s1382_s0 + $0xf8] sm:$0xff]   ;;  %v1123_v40 = vld [vmem:[%s1383_s2] ss:$0 sm:$0xff] }
   0xf   :  { %851 = vmatpush3.bf16.msra.mxu0 %v943_v3  ;;  %935 = vmatpush3.bf16.msra.mxu1 %v943_v3 }
  0x10   :  { %852 = vmatprep.subr.bf16.mxu0 %v944_v6  ;;  %928 = vmatprep.subr.bf16.mxu1 %v944_v6 }
  0x13   :  { %853 = vmatpush3.bf16.msra.mxu0 %v944_v6  ;;  %936 = vmatpush3.bf16.msra.mxu1 %v944_v6 }
  0x14   :  { %854 = vmatprep.subr.bf16.mxu0 %v945_v7  ;;  %929 = vmatprep.subr.bf16.mxu1 %v945_v7 }
  0x17   :  { %855 = vmatpush3.bf16.msra.mxu0 %v945_v7  ;;  %937 = vmatpush3.bf16.msra.mxu1 %v945_v7 }
  0x18   :  { %856 = vmatprep.subr.bf16.mxu0 %v946_v8  ;;  %930 = vmatprep.subr.bf16.mxu1 %v946_v8 }
  0x1b   :  { %857 = vmatpush3.bf16.msra.mxu0 %v946_v8  ;;  %938 = vmatpush3.bf16.msra.mxu1 %v946_v8 }
  0x1c   :  { %858 = vmatprep.subr.bf16.mxu0 %v947_v9  ;;  %931 = vmatprep.subr.bf16.mxu1 %v947_v9 }
  0x1f   :  { %859 = vmatpush3.bf16.msra.mxu0 %v947_v9  ;;  %939 = vmatpush3.bf16.msra.mxu1 %v947_v9 }
  0x22   :  { %861 = vmatmul.mubr.bf16.vlgmr.msra.gmra.mrb[0].mxu0 %v950_v10  ;;  %893 = vmatmul.mubr.bf16.vlgmr.msra.gmra.mrb[0].mxu1 %v951_v11 }
  0x23   :  { %864 = vmatprep.mubr.bf16.mxu0 %v952_v12  ;;  %896 = vmatprep.mubr.bf16.mxu1 %v953_v13 }
  0x2a   :  { %865 = vmatmul.mubr.bf16.gmra.mrb[4].mxu0 %v954_v14  ;;  %897 = vmatmul.mubr.bf16.gmra.mrb[4].mxu1 %v955_v15 }
  0x2b   :  { %868 = vmatprep.mubr.bf16.mxu0 %v956_v16  ;;  %900 = vmatprep.mubr.bf16.mxu1 %v957_v17 }
  0x32   :  { %869 = vmatmul.mubr.bf16.gmra.mrb[8].mxu0 %v958_v18  ;;  %901 = vmatmul.mubr.bf16.gmra.mrb[8].mxu1 %v959_v19 }
  0x33   :  { %872 = vmatprep.mubr.bf16.mxu0 %v960_v20  ;;  %904 = vmatprep.mubr.bf16.mxu1 %v961_v21 }
  0x3a   :  { %873 = vmatmul.mubr.bf16.gmra.mrb[12].mxu0 %v962_v22  ;;  %905 = vmatmul.mubr.bf16.gmra.mrb[12].mxu1 %v963_v23 }
  0x3b   :  { %876 = vmatprep.mubr.bf16.mxu0 %v964_v24  ;;  %908 = vmatprep.mubr.bf16.mxu1 %v965_v25 }
  0x42   :  { %877 = vmatmul.mubr.bf16.gmra.mrb[16].mxu0 %v966_v26  ;;  %909 = vmatmul.mubr.bf16.gmra.mrb[16].mxu1 %v967_v27 }
  0x43   :  { %880 = vmatprep.mubr.bf16.mxu0 %v968_v28  ;;  %912 = vmatprep.mubr.bf16.mxu1 %v969_v29 }
  0x4a   :  { %881 = vmatmul.mubr.bf16.gmra.mrb[20].mxu0 %v970_v30  ;;  %913 = vmatmul.mubr.bf16.gmra.mrb[20].mxu1 %v971_v31 }
  0x4b   :  { %884 = vmatprep.mubr.bf16.mxu0 %v972_v32  ;;  %916 = vmatprep.mubr.bf16.mxu1 %v973_v33 }
  0x52   :  { %885 = vmatmul.mubr.bf16.gmra.mrb[24].mxu0 %v974_v34  ;;  %917 = vmatmul.mubr.bf16.gmra.mrb[24].mxu1 %v975_v35 }
  0x53   :  { %888 = vmatprep.mubr.bf16.mxu0 %v976_v36  ;;  %920 = vmatprep.mubr.bf16.mxu1 %v977_v37 }
  0x5a   :  { %889 = vmatmul.mubr.bf16.gmra.mrb[28].mxu0 %v978_v38  ;;  %921 = vmatmul.mubr.bf16.gmra.mrb[28].mxu1 %v979_v39 }
  0xf5   :  { %v862_v41 = vpop.f32.mrb[0].mxu0  ;;  %v894_v42 = vpop.f32.mrb[0].mxu1 }
  0xf6   :  { %v385_v43 = vadd.f32 %v862_v41, %v1123_v40  ;;  %v513_v44 = vadd.f32 %v894_v42, %v1123_v40  ;;  %v376_v45 = vpop.f32.mrb[1].mxu0  ;;  %v504_v46 = vpop.f32.mrb[1].mxu1 }
  0xf7   :  { %v377_v47 = vadd.f32 %v1123_v40, %v376_v45  ;;  %v505_v48 = vadd.f32 %v1123_v40, %v504_v46  ;;  %v863_v49 = vpop.f32.mrb[2].mxu0  ;;  %v895_v50 = vpop.f32.mrb[2].mxu1 }
  0xf8   :  { %v633_v51 = vmax.f32 %v385_v43, 0.0  ;;  %v665_v52 = vmax.f32 %v513_v44, 0.0  ;;  %v388_v53 = vadd.f32 %v863_v49, %v1123_v40  ;;  %v516_v54 = vadd.f32 %v895_v50, %v1123_v40  ;;  %v379_v55 = vpop.f32.mrb[3].mxu0  ;;  %v507_v56 = vpop.f32.mrb[3].mxu1 }
  0xf9   :  { %v631_v57 = vmax.f32 %v377_v47, 0.0  ;;  %v663_v58 = vmax.f32 %v505_v48, 0.0  ;;  %v380_v59 = vadd.f32 %v1123_v40, %v379_v55  ;;  %v508_v60 = vadd.f32 %v1123_v40, %v507_v56 }
  0xfa   :  { %697 = vst [vmem:[%s1384_s3 + $0x10] sm:$0xff] %v633_v51  ;;  %729 = vst [vmem:[%s1384_s3 + $0x110] sm:$0xff] %v665_v52  ;;  %v634_v61 = vmax.f32 %v388_v53, 0.0  ;;  %v666_v62 = vmax.f32 %v516_v54, 0.0 }
  0xfb   :  { %695 = vst [vmem:[%s1384_s3] sm:$0xff] %v631_v57  ;;  %727 = vst [vmem:[%s1384_s3 + $0x100] sm:$0xff] %v663_v58  ;;  %v632_v63 = vmax.f32 %v380_v59, 0.0  ;;  %v664_v0 = vmax.f32 %v508_v60, 0.0 }
  0xfc   :  { %698 = vst [vmem:[%s1384_s3 + $0x18] sm:$0xff] %v634_v61  ;;  %730 = vst [vmem:[%s1384_s3 + $0x118] sm:$0xff] %v666_v62 }
  0xfd   :  { %696 = vst [vmem:[%s1384_s3 + $0x8] sm:$0xff] %v632_v63  ;;  %728 = vst [vmem:[%s1384_s3 + $0x108] sm:$0xff] %v664_v0  ;;  %v866_v1 = vpop.f32.mrb[4].mxu0  ;;  %v898_v2 = vpop.f32.mrb[4].mxu1 }
  0xfe   :  { %v401_v3 = vadd.f32 %v866_v1, %v1123_v40  ;;  %v529_v4 = vadd.f32 %v898_v2, %v1123_v40  ;;  %v392_v5 = vpop.f32.mrb[5].mxu0  ;;  %v520_v6 = vpop.f32.mrb[5].mxu1 }
  0xff   :  { %v393_v7 = vadd.f32 %v1123_v40, %v392_v5  ;;  %v521_v8 = vadd.f32 %v1123_v40, %v520_v6  ;;  %v867_v9 = vpop.f32.mrb[6].mxu0  ;;  %v899_v10 = vpop.f32.mrb[6].mxu1 }
 0x100   :  { %v637_v11 = vmax.f32 %v401_v3, 0.0  ;;  %v669_v12 = vmax.f32 %v529_v4, 0.0  ;;  %v404_v13 = vadd.f32 %v867_v9, %v1123_v40  ;;  %v532_v14 = vadd.f32 %v899_v10, %v1123_v40  ;;  %v395_v15 = vpop.f32.mrb[7].mxu0  ;;  %v523_v16 = vpop.f32.mrb[7].mxu1 }
 0x101   :  { %v635_v17 = vmax.f32 %v393_v7, 0.0  ;;  %v667_v18 = vmax.f32 %v521_v8, 0.0  ;;  %v396_v19 = vadd.f32 %v1123_v40, %v395_v15  ;;  %v524_v20 = vadd.f32 %v1123_v40, %v523_v16 }
 0x102   :  { %701 = vst [vmem:[%s1384_s3 + $0x30] sm:$0xff] %v637_v11  ;;  %733 = vst [vmem:[%s1384_s3 + $0x130] sm:$0xff] %v669_v12  ;;  %v638_v21 = vmax.f32 %v404_v13, 0.0  ;;  %v670_v22 = vmax.f32 %v532_v14, 0.0 }
 0x103   :  { %699 = vst [vmem:[%s1384_s3 + $0x20] sm:$0xff] %v635_v17  ;;  %731 = vst [vmem:[%s1384_s3 + $0x120] sm:$0xff] %v667_v18  ;;  %v636_v23 = vmax.f32 %v396_v19, 0.0  ;;  %v668_v24 = vmax.f32 %v524_v20, 0.0 }
 0x104   :  { %702 = vst [vmem:[%s1384_s3 + $0x38] sm:$0xff] %v638_v21  ;;  %734 = vst [vmem:[%s1384_s3 + $0x138] sm:$0xff] %v670_v22 }
 0x105   :  { %700 = vst [vmem:[%s1384_s3 + $0x28] sm:$0xff] %v636_v23  ;;  %732 = vst [vmem:[%s1384_s3 + $0x128] sm:$0xff] %v668_v24  ;;  %v870_v25 = vpop.f32.mrb[8].mxu0  ;;  %v902_v26 = vpop.f32.mrb[8].mxu1 }
 0x106   :  { %v417_v27 = vadd.f32 %v870_v25, %v1123_v40  ;;  %v545_v28 = vadd.f32 %v902_v26, %v1123_v40  ;;  %v408_v29 = vpop.f32.mrb[9].mxu0  ;;  %v536_v30 = vpop.f32.mrb[9].mxu1 }
 0x107   :  { %v409_v31 = vadd.f32 %v1123_v40, %v408_v29  ;;  %v537_v32 = vadd.f32 %v1123_v40, %v536_v30  ;;  %v871_v33 = vpop.f32.mrb[10].mxu0  ;;  %v903_v34 = vpop.f32.mrb[10].mxu1 }
 0x108   :  { %v641_v35 = vmax.f32 %v417_v27, 0.0  ;;  %v673_v36 = vmax.f32 %v545_v28, 0.0  ;;  %v420_v37 = vadd.f32 %v871_v33, %v1123_v40  ;;  %v548_v38 = vadd.f32 %v903_v34, %v1123_v40  ;;  %v411_v39 = vpop.f32.mrb[11].mxu0  ;;  %v539_v41 = vpop.f32.mrb[11].mxu1 }
 0x109   :  { %v639_v42 = vmax.f32 %v409_v31, 0.0  ;;  %v671_v43 = vmax.f32 %v537_v32, 0.0  ;;  %v412_v44 = vadd.f32 %v1123_v40, %v411_v39  ;;  %v540_v45 = vadd.f32 %v1123_v40, %v539_v41 }
 0x10a   :  { %705 = vst [vmem:[%s1384_s3 + $0x50] sm:$0xff] %v641_v35  ;;  %737 = vst [vmem:[%s1384_s3 + $0x150] sm:$0xff] %v673_v36  ;;  %v642_v46 = vmax.f32 %v420_v37, 0.0  ;;  %v674_v47 = vmax.f32 %v548_v38, 0.0 }
 0x10b   :  { %703 = vst [vmem:[%s1384_s3 + $0x40] sm:$0xff] %v639_v42  ;;  %735 = vst [vmem:[%s1384_s3 + $0x140] sm:$0xff] %v671_v43  ;;  %v640_v48 = vmax.f32 %v412_v44, 0.0  ;;  %v672_v49 = vmax.f32 %v540_v45, 0.0 }
 0x10c   :  { %706 = vst [vmem:[%s1384_s3 + $0x58] sm:$0xff] %v642_v46  ;;  %738 = vst [vmem:[%s1384_s3 + $0x158] sm:$0xff] %v674_v47 }
 0x10d   :  { %704 = vst [vmem:[%s1384_s3 + $0x48] sm:$0xff] %v640_v48  ;;  %736 = vst [vmem:[%s1384_s3 + $0x148] sm:$0xff] %v672_v49  ;;  %v874_v50 = vpop.f32.mrb[12].mxu0  ;;  %v906_v51 = vpop.f32.mrb[12].mxu1 }
 0x10e   :  { %v433_v52 = vadd.f32 %v874_v50, %v1123_v40  ;;  %v561_v53 = vadd.f32 %v906_v51, %v1123_v40  ;;  %v424_v54 = vpop.f32.mrb[13].mxu0  ;;  %v552_v55 = vpop.f32.mrb[13].mxu1 }
 0x10f   :  { %v425_v56 = vadd.f32 %v1123_v40, %v424_v54  ;;  %v553_v57 = vadd.f32 %v1123_v40, %v552_v55  ;;  %v875_v58 = vpop.f32.mrb[14].mxu0  ;;  %v907_v59 = vpop.f32.mrb[14].mxu1 }
 0x110   :  { %v645_v60 = vmax.f32 %v433_v52, 0.0  ;;  %v677_v61 = vmax.f32 %v561_v53, 0.0  ;;  %v436_v62 = vadd.f32 %v875_v58, %v1123_v40  ;;  %v564_v63 = vadd.f32 %v907_v59, %v1123_v40  ;;  %v427_v0 = vpop.f32.mrb[15].mxu0  ;;  %v555_v1 = vpop.f32.mrb[15].mxu1 }
 0x111   :  { %v643_v2 = vmax.f32 %v425_v56, 0.0  ;;  %v675_v3 = vmax.f32 %v553_v57, 0.0  ;;  %v428_v4 = vadd.f32 %v1123_v40, %v427_v0  ;;  %v556_v5 = vadd.f32 %v1123_v40, %v555_v1 }
 0x112   :  { %709 = vst [vmem:[%s1384_s3 + $0x70] sm:$0xff] %v645_v60  ;;  %741 = vst [vmem:[%s1384_s3 + $0x170] sm:$0xff] %v677_v61  ;;  %v646_v6 = vmax.f32 %v436_v62, 0.0  ;;  %v678_v7 = vmax.f32 %v564_v63, 0.0 }
 0x113   :  { %707 = vst [vmem:[%s1384_s3 + $0x60] sm:$0xff] %v643_v2  ;;  %739 = vst [vmem:[%s1384_s3 + $0x160] sm:$0xff] %v675_v3  ;;  %v644_v8 = vmax.f32 %v428_v4, 0.0  ;;  %v676_v9 = vmax.f32 %v556_v5, 0.0 }
 0x114   :  { %710 = vst [vmem:[%s1384_s3 + $0x78] sm:$0xff] %v646_v6  ;;  %742 = vst [vmem:[%s1384_s3 + $0x178] sm:$0xff] %v678_v7 }
 0x115   :  { %708 = vst [vmem:[%s1384_s3 + $0x68] sm:$0xff] %v644_v8  ;;  %740 = vst [vmem:[%s1384_s3 + $0x168] sm:$0xff] %v676_v9  ;;  %v878_v10 = vpop.f32.mrb[16].mxu0  ;;  %v910_v11 = vpop.f32.mrb[16].mxu1 }
 0x116   :  { %v449_v12 = vadd.f32 %v878_v10, %v1123_v40  ;;  %v577_v13 = vadd.f32 %v910_v11, %v1123_v40  ;;  %v440_v14 = vpop.f32.mrb[17].mxu0  ;;  %v568_v15 = vpop.f32.mrb[17].mxu1 }
 0x117   :  { %v441_v16 = vadd.f32 %v1123_v40, %v440_v14  ;;  %v569_v17 = vadd.f32 %v1123_v40, %v568_v15  ;;  %v879_v18 = vpop.f32.mrb[18].mxu0  ;;  %v911_v19 = vpop.f32.mrb[18].mxu1 }
 0x118   :  { %v649_v20 = vmax.f32 %v449_v12, 0.0  ;;  %v681_v21 = vmax.f32 %v577_v13, 0.0  ;;  %v452_v22 = vadd.f32 %v879_v18, %v1123_v40  ;;  %v580_v23 = vadd.f32 %v911_v19, %v1123_v40  ;;  %v443_v24 = vpop.f32.mrb[19].mxu0  ;;  %v571_v25 = vpop.f32.mrb[19].mxu1 }
 0x119   :  { %v647_v26 = vmax.f32 %v441_v16, 0.0  ;;  %v679_v27 = vmax.f32 %v569_v17, 0.0  ;;  %v444_v28 = vadd.f32 %v1123_v40, %v443_v24  ;;  %v572_v29 = vadd.f32 %v1123_v40, %v571_v25 }
 0x11a   :  { %713 = vst [vmem:[%s1384_s3 + $0x90] sm:$0xff] %v649_v20  ;;  %745 = vst [vmem:[%s1384_s3 + $0x190] sm:$0xff] %v681_v21  ;;  %v650_v30 = vmax.f32 %v452_v22, 0.0  ;;  %v682_v31 = vmax.f32 %v580_v23, 0.0 }
 0x11b   :  { %711 = vst [vmem:[%s1384_s3 + $0x80] sm:$0xff] %v647_v26  ;;  %743 = vst [vmem:[%s1384_s3 + $0x180] sm:$0xff] %v679_v27  ;;  %v648_v32 = vmax.f32 %v444_v28, 0.0  ;;  %v680_v33 = vmax.f32 %v572_v29, 0.0 }
 0x11c   :  { %714 = vst [vmem:[%s1384_s3 + $0x98] sm:$0xff] %v650_v30  ;;  %746 = vst [vmem:[%s1384_s3 + $0x198] sm:$0xff] %v682_v31 }
 0x11d   :  { %712 = vst [vmem:[%s1384_s3 + $0x88] sm:$0xff] %v648_v32  ;;  %744 = vst [vmem:[%s1384_s3 + $0x188] sm:$0xff] %v680_v33  ;;  %v882_v34 = vpop.f32.mrb[20].mxu0  ;;  %v914_v35 = vpop.f32.mrb[20].mxu1 }
 0x11e   :  { %v465_v36 = vadd.f32 %v882_v34, %v1123_v40  ;;  %v593_v37 = vadd.f32 %v914_v35, %v1123_v40  ;;  %v456_v38 = vpop.f32.mrb[21].mxu0  ;;  %v584_v39 = vpop.f32.mrb[21].mxu1 }
 0x11f   :  { %v457_v41 = vadd.f32 %v1123_v40, %v456_v38  ;;  %v585_v42 = vadd.f32 %v1123_v40, %v584_v39  ;;  %v883_v43 = vpop.f32.mrb[22].mxu0  ;;  %v915_v44 = vpop.f32.mrb[22].mxu1 }
 0x120   :  { %v653_v45 = vmax.f32 %v465_v36, 0.0  ;;  %v685_v46 = vmax.f32 %v593_v37, 0.0  ;;  %v468_v47 = vadd.f32 %v883_v43, %v1123_v40  ;;  %v596_v48 = vadd.f32 %v915_v44, %v1123_v40  ;;  %v459_v49 = vpop.f32.mrb[23].mxu0  ;;  %v587_v50 = vpop.f32.mrb[23].mxu1 }
 0x121   :  { %v651_v51 = vmax.f32 %v457_v41, 0.0  ;;  %v683_v52 = vmax.f32 %v585_v42, 0.0  ;;  %v460_v53 = vadd.f32 %v1123_v40, %v459_v49  ;;  %v588_v54 = vadd.f32 %v1123_v40, %v587_v50 }
 0x122   :  { %717 = vst [vmem:[%s1384_s3 + $0xb0] sm:$0xff] %v653_v45  ;;  %749 = vst [vmem:[%s1384_s3 + $0x1b0] sm:$0xff] %v685_v46  ;;  %v654_v55 = vmax.f32 %v468_v47, 0.0  ;;  %v686_v56 = vmax.f32 %v596_v48, 0.0 }
 0x123   :  { %715 = vst [vmem:[%s1384_s3 + $0xa0] sm:$0xff] %v651_v51  ;;  %747 = vst [vmem:[%s1384_s3 + $0x1a0] sm:$0xff] %v683_v52  ;;  %v652_v57 = vmax.f32 %v460_v53, 0.0  ;;  %v684_v58 = vmax.f32 %v588_v54, 0.0 }
 0x124   :  { %718 = vst [vmem:[%s1384_s3 + $0xb8] sm:$0xff] %v654_v55  ;;  %750 = vst [vmem:[%s1384_s3 + $0x1b8] sm:$0xff] %v686_v56 }
 0x125   :  { %716 = vst [vmem:[%s1384_s3 + $0xa8] sm:$0xff] %v652_v57  ;;  %748 = vst [vmem:[%s1384_s3 + $0x1a8] sm:$0xff] %v684_v58  ;;  %v886_v59 = vpop.f32.mrb[24].mxu0  ;;  %v918_v60 = vpop.f32.mrb[24].mxu1 }
 0x126   :  { %v481_v61 = vadd.f32 %v886_v59, %v1123_v40  ;;  %v609_v62 = vadd.f32 %v918_v60, %v1123_v40  ;;  %v472_v63 = vpop.f32.mrb[25].mxu0  ;;  %v600_v0 = vpop.f32.mrb[25].mxu1 }
 0x127   :  { %v473_v1 = vadd.f32 %v1123_v40, %v472_v63  ;;  %v601_v2 = vadd.f32 %v1123_v40, %v600_v0  ;;  %v887_v3 = vpop.f32.mrb[26].mxu0  ;;  %v919_v4 = vpop.f32.mrb[26].mxu1 }
 0x128   :  { %v657_v5 = vmax.f32 %v481_v61, 0.0  ;;  %v689_v6 = vmax.f32 %v609_v62, 0.0  ;;  %v484_v7 = vadd.f32 %v887_v3, %v1123_v40  ;;  %v612_v8 = vadd.f32 %v919_v4, %v1123_v40  ;;  %v475_v9 = vpop.f32.mrb[27].mxu0  ;;  %v603_v10 = vpop.f32.mrb[27].mxu1 }
 0x129   :  { %v655_v11 = vmax.f32 %v473_v1, 0.0  ;;  %v687_v12 = vmax.f32 %v601_v2, 0.0  ;;  %v476_v13 = vadd.f32 %v1123_v40, %v475_v9  ;;  %v604_v14 = vadd.f32 %v1123_v40, %v603_v10 }
 0x12a   :  { %721 = vst [vmem:[%s1384_s3 + $0xd0] sm:$0xff] %v657_v5  ;;  %753 = vst [vmem:[%s1384_s3 + $0x1d0] sm:$0xff] %v689_v6  ;;  %v658_v15 = vmax.f32 %v484_v7, 0.0  ;;  %v690_v16 = vmax.f32 %v612_v8, 0.0 }
 0x12b   :  { %719 = vst [vmem:[%s1384_s3 + $0xc0] sm:$0xff] %v655_v11  ;;  %751 = vst [vmem:[%s1384_s3 + $0x1c0] sm:$0xff] %v687_v12  ;;  %v656_v17 = vmax.f32 %v476_v13, 0.0  ;;  %v688_v18 = vmax.f32 %v604_v14, 0.0 }
 0x12c   :  { %722 = vst [vmem:[%s1384_s3 + $0xd8] sm:$0xff] %v658_v15  ;;  %754 = vst [vmem:[%s1384_s3 + $0x1d8] sm:$0xff] %v690_v16 }
 0x12d   :  { %720 = vst [vmem:[%s1384_s3 + $0xc8] sm:$0xff] %v656_v17  ;;  %752 = vst [vmem:[%s1384_s3 + $0x1c8] sm:$0xff] %v688_v18  ;;  %v890_v19 = vpop.f32.mrb[28].mxu0  ;;  %v922_v20 = vpop.f32.mrb[28].mxu1 }
 0x12e   :  { %v497_v21 = vadd.f32 %v890_v19, %v1123_v40  ;;  %v625_v22 = vadd.f32 %v922_v20, %v1123_v40  ;;  %v488_v23 = vpop.f32.mrb[29].mxu0  ;;  %v616_v24 = vpop.f32.mrb[29].mxu1 }
 0x12f   :  { %v489_v25 = vadd.f32 %v1123_v40, %v488_v23  ;;  %v617_v26 = vadd.f32 %v1123_v40, %v616_v24  ;;  %v891_v27 = vpop.f32.mrb[30].mxu0  ;;  %v923_v28 = vpop.f32.mrb[30].mxu1 }
 0x130   :  { %v661_v29 = vmax.f32 %v497_v21, 0.0  ;;  %v693_v30 = vmax.f32 %v625_v22, 0.0  ;;  %v500_v31 = vadd.f32 %v891_v27, %v1123_v40  ;;  %v628_v32 = vadd.f32 %v923_v28, %v1123_v40  ;;  %v491_v33 = vpop.f32.mrb[31].mxu0  ;;  %v619_v34 = vpop.f32.mrb[31].mxu1 }
 0x131   :  { %v659_v35 = vmax.f32 %v489_v25, 0.0  ;;  %v691_v36 = vmax.f32 %v617_v26, 0.0  ;;  %v492_v37 = vadd.f32 %v1123_v40, %v491_v33  ;;  %v620_v38 = vadd.f32 %v1123_v40, %v619_v34 }
 0x132   :  { %725 = vst [vmem:[%s1384_s3 + $0xf0] sm:$0xff] %v661_v29  ;;  %757 = vst [vmem:[%s1384_s3 + $0x1f0] sm:$0xff] %v693_v30  ;;  %v662_v39 = vmax.f32 %v500_v31, 0.0  ;;  %v694_v41 = vmax.f32 %v628_v32, 0.0 }
 0x133   :  { %723 = vst [vmem:[%s1384_s3 + $0xe0] sm:$0xff] %v659_v35  ;;  %755 = vst [vmem:[%s1384_s3 + $0x1e0] sm:$0xff] %v691_v36  ;;  %v660_v42 = vmax.f32 %v492_v37, 0.0  ;;  %v692_v40 = vmax.f32 %v620_v38, 0.0 }
 0x134   :  { %726 = vst [vmem:[%s1384_s3 + $0xf8] sm:$0xff] %v662_v39  ;;  %758 = vst [vmem:[%s1384_s3 + $0x1f8] sm:$0xff] %v694_v41 }
 0x135   :  { %724 = vst [vmem:[%s1384_s3 + $0xe8] sm:$0xff] %v660_v42  ;;  %756 = vst [vmem:[%s1384_s3 + $0x1e8] sm:$0xff] %v692_v40 }

// kernel: _lambda_.15
= control target key start
LH: loop header
LB: loop body
LE: loop exit
PB: predicated region body
PF: predicated region fallthrough
CT: control target
= control target key end

     0   :  { %s1317_s1 = inlined_call_operand.vmem [shape: bf16[128,128], index: 1, kind: input, shape index: {}]   ;;  %s1318_s0 = inlined_call_operand.vmem [shape: bf16[512,128], index: 0, kind: input, shape index: {}]   ;;  %s1319_s2 = inlined_call_operand.vmem [shape: f32[1,128], index: 2, kind: input, shape index: {}]   ;;  %s1320_s3 = inlined_call_operand.vmem [shape: f32[512,128], index: 3, kind: output, shape index: {}]  }
   0x1   :  { %v876_v0 = vld [vmem:[%s1317_s1] sm:$0xff]   ;;  %v877_v1 = vld [vmem:[%s1317_s1 + $0x8] sm:$0xff]   ;;  %v878_v2 = vld [vmem:[%s1317_s1 + $0x10] sm:$0xff]  }
   0x2   :  { %780 = vmatprep.subr.bf16.mxu0 %v876_v0  ;;  %860 = vmatprep.subr.bf16.mxu1 %v876_v0  ;;  %v879_v3 = vld [vmem:[%s1317_s1 + $0x18] sm:$0xff]   ;;  %v884_v4 = vld [vmem:[%s1318_s0] sm:$0xff]   ;;  %v881_v7 = vld [vmem:[%s1317_s1 + $0x28] sm:$0xff]  }
   0x3   :  { %781 = vmatpush3.bf16.msra.mxu0 %v876_v0  ;;  %868 = vmatpush3.bf16.msra.mxu1 %v876_v0  ;;  %v885_v5 = vld [vmem:[%s1318_s0 + $0x80] sm:$0xff]   ;;  %v882_v8 = vld [vmem:[%s1317_s1 + $0x30] sm:$0xff]   ;;  %v883_v9 = vld [vmem:[%s1317_s1 + $0x38] sm:$0xff]  }
   0x4   :  { %782 = vmatprep.subr.bf16.mxu0 %v877_v1  ;;  %861 = vmatprep.subr.bf16.mxu1 %v877_v1  ;;  %v880_v6 = vld [vmem:[%s1317_s1 + $0x20] sm:$0xff]   ;;  %v886_v10 = vld [vmem:[%s1318_s0 + $0x8] sm:$0xff]   ;;  %v888_v12 = vld [vmem:[%s1318_s0 + $0x10] sm:$0xff]  }
   0x5   :  { %796 = vmatprep.mubr.bf16.mxu0 %v884_v4  ;;  %828 = vmatprep.mubr.bf16.mxu1 %v885_v5  ;;  %v887_v11 = vld [vmem:[%s1318_s0 + $0x88] sm:$0xff]   ;;  %v889_v13 = vld [vmem:[%s1318_s0 + $0x90] sm:$0xff]   ;;  %v890_v14 = vld [vmem:[%s1318_s0 + $0x18] sm:$0xff]  }
   0x6   :  { %v891_v15 = vld [vmem:[%s1318_s0 + $0x98] sm:$0xff]   ;;  %v892_v16 = vld [vmem:[%s1318_s0 + $0x20] sm:$0xff]   ;;  %v894_v18 = vld [vmem:[%s1318_s0 + $0x28] sm:$0xff]  }
   0x7   :  { %783 = vmatpush3.bf16.msra.mxu0 %v877_v1  ;;  %869 = vmatpush3.bf16.msra.mxu1 %v877_v1  ;;  %v893_v17 = vld [vmem:[%s1318_s0 + $0xa0] sm:$0xff]   ;;  %v895_v19 = vld [vmem:[%s1318_s0 + $0xa8] sm:$0xff]   ;;  %v896_v20 = vld [vmem:[%s1318_s0 + $0x30] sm:$0xff]  }
   0x8   :  { %784 = vmatprep.subr.bf16.mxu0 %v878_v2  ;;  %862 = vmatprep.subr.bf16.mxu1 %v878_v2  ;;  %v897_v21 = vld [vmem:[%s1318_s0 + $0xb0] sm:$0xff]   ;;  %v898_v22 = vld [vmem:[%s1318_s0 + $0x38] sm:$0xff]   ;;  %v900_v24 = vld [vmem:[%s1318_s0 + $0x40] sm:$0xff]  }
   0x9   :  { %v899_v23 = vld [vmem:[%s1318_s0 + $0xb8] sm:$0xff]   ;;  %v901_v25 = vld [vmem:[%s1318_s0 + $0xc0] sm:$0xff]   ;;  %v902_v26 = vld [vmem:[%s1318_s0 + $0x48] sm:$0xff]  }
   0xa   :  { %v903_v27 = vld [vmem:[%s1318_s0 + $0xc8] sm:$0xff]   ;;  %v904_v28 = vld [vmem:[%s1318_s0 + $0x50] sm:$0xff]   ;;  %v906_v30 = vld [vmem:[%s1318_s0 + $0x58] sm:$0xff]  }
   0xb   :  { %785 = vmatpush3.bf16.msra.mxu0 %v878_v2  ;;  %870 = vmatpush3.bf16.msra.mxu1 %v878_v2  ;;  %v905_v29 = vld [vmem:[%s1318_s0 + $0xd0] sm:$0xff]   ;;  %v907_v31 = vld [vmem:[%s1318_s0 + $0xd8] sm:$0xff]   ;;  %v908_v32 = vld [vmem:[%s1318_s0 + $0x60] sm:$0xff]  }
   0xc   :  { %786 = vmatprep.subr.bf16.mxu0 %v879_v3  ;;  %863 = vmatprep.subr.bf16.mxu1 %v879_v3  ;;  %v909_v33 = vld [vmem:[%s1318_s0 + $0xe0] sm:$0xff]   ;;  %v910_v34 = vld [vmem:[%s1318_s0 + $0x68] sm:$0xff]   ;;  %v912_v36 = vld [vmem:[%s1318_s0 + $0x70] sm:$0xff]  }
   0xd   :  { %v911_v35 = vld [vmem:[%s1318_s0 + $0xe8] sm:$0xff]   ;;  %v913_v37 = vld [vmem:[%s1318_s0 + $0xf0] sm:$0xff]   ;;  %v914_v38 = vld [vmem:[%s1318_s0 + $0x78] sm:$0xff]  }
   0xe   :  { %v915_v39 = vld [vmem:[%s1318_s0 + $0xf8] sm:$0xff]   ;;  %v1059_v40 = vld [vmem:[%s1319_s2] ss:$0 sm:$0xff] }
   0xf   :  { %787 = vmatpush3.bf16.msra.mxu0 %v879_v3  ;;  %871 = vmatpush3.bf16.msra.mxu1 %v879_v3 }
  0x10   :  { %788 = vmatprep.subr.bf16.mxu0 %v880_v6  ;;  %864 = vmatprep.subr.bf16.mxu1 %v880_v6 }
  0x13   :  { %789 = vmatpush3.bf16.msra.mxu0 %v880_v6  ;;  %872 = vmatpush3.bf16.msra.mxu1 %v880_v6 }
  0x14   :  { %790 = vmatprep.subr.bf16.mxu0 %v881_v7  ;;  %865 = vmatprep.subr.bf16.mxu1 %v881_v7 }
  0x17   :  { %791 = vmatpush3.bf16.msra.mxu0 %v881_v7  ;;  %873 = vmatpush3.bf16.msra.mxu1 %v881_v7 }
  0x18   :  { %792 = vmatprep.subr.bf16.mxu0 %v882_v8  ;;  %866 = vmatprep.subr.bf16.mxu1 %v882_v8 }
  0x1b   :  { %793 = vmatpush3.bf16.msra.mxu0 %v882_v8  ;;  %874 = vmatpush3.bf16.msra.mxu1 %v882_v8 }
  0x1c   :  { %794 = vmatprep.subr.bf16.mxu0 %v883_v9  ;;  %867 = vmatprep.subr.bf16.mxu1 %v883_v9 }
  0x1f   :  { %795 = vmatpush3.bf16.msra.mxu0 %v883_v9  ;;  %875 = vmatpush3.bf16.msra.mxu1 %v883_v9 }
  0x22   :  { %797 = vmatmul.mubr.bf16.vlgmr.msra.gmra.mrb[0].mxu0 %v886_v10  ;;  %829 = vmatmul.mubr.bf16.vlgmr.msra.gmra.mrb[0].mxu1 %v887_v11 }
  0x23   :  { %800 = vmatprep.mubr.bf16.mxu0 %v888_v12  ;;  %832 = vmatprep.mubr.bf16.mxu1 %v889_v13 }
  0x2a   :  { %801 = vmatmul.mubr.bf16.gmra.mrb[4].mxu0 %v890_v14  ;;  %833 = vmatmul.mubr.bf16.gmra.mrb[4].mxu1 %v891_v15 }
  0x2b   :  { %804 = vmatprep.mubr.bf16.mxu0 %v892_v16  ;;  %836 = vmatprep.mubr.bf16.mxu1 %v893_v17 }
  0x32   :  { %805 = vmatmul.mubr.bf16.gmra.mrb[8].mxu0 %v894_v18  ;;  %837 = vmatmul.mubr.bf16.gmra.mrb[8].mxu1 %v895_v19 }
  0x33   :  { %808 = vmatprep.mubr.bf16.mxu0 %v896_v20  ;;  %840 = vmatprep.mubr.bf16.mxu1 %v897_v21 }
  0x3a   :  { %809 = vmatmul.mubr.bf16.gmra.mrb[12].mxu0 %v898_v22  ;;  %841 = vmatmul.mubr.bf16.gmra.mrb[12].mxu1 %v899_v23 }
  0x3b   :  { %812 = vmatprep.mubr.bf16.mxu0 %v900_v24  ;;  %844 = vmatprep.mubr.bf16.mxu1 %v901_v25 }
  0x42   :  { %813 = vmatmul.mubr.bf16.gmra.mrb[16].mxu0 %v902_v26  ;;  %845 = vmatmul.mubr.bf16.gmra.mrb[16].mxu1 %v903_v27 }
  0x43   :  { %816 = vmatprep.mubr.bf16.mxu0 %v904_v28  ;;  %848 = vmatprep.mubr.bf16.mxu1 %v905_v29 }
  0x4a   :  { %817 = vmatmul.mubr.bf16.gmra.mrb[20].mxu0 %v906_v30  ;;  %849 = vmatmul.mubr.bf16.gmra.mrb[20].mxu1 %v907_v31 }
  0x4b   :  { %820 = vmatprep.mubr.bf16.mxu0 %v908_v32  ;;  %852 = vmatprep.mubr.bf16.mxu1 %v909_v33 }
  0x52   :  { %821 = vmatmul.mubr.bf16.gmra.mrb[24].mxu0 %v910_v34  ;;  %853 = vmatmul.mubr.bf16.gmra.mrb[24].mxu1 %v911_v35 }
  0x53   :  { %824 = vmatprep.mubr.bf16.mxu0 %v912_v36  ;;  %856 = vmatprep.mubr.bf16.mxu1 %v913_v37 }
  0x5a   :  { %825 = vmatmul.mubr.bf16.gmra.mrb[28].mxu0 %v914_v38  ;;  %857 = vmatmul.mubr.bf16.gmra.mrb[28].mxu1 %v915_v39 }
  0xf5   :  { %v798_v41 = vpop.f32.mrb[0].mxu0  ;;  %v830_v42 = vpop.f32.mrb[0].mxu1 }
  0xf6   :  { %v385_v43 = vadd.f32 %v798_v41, %v1059_v40  ;;  %v513_v44 = vadd.f32 %v830_v42, %v1059_v40  ;;  %v376_v45 = vpop.f32.mrb[1].mxu0  ;;  %v504_v46 = vpop.f32.mrb[1].mxu1 }
  0xf7   :  { %v377_v47 = vadd.f32 %v1059_v40, %v376_v45  ;;  %v505_v48 = vadd.f32 %v1059_v40, %v504_v46  ;;  %v799_v49 = vpop.f32.mrb[2].mxu0  ;;  %v831_v50 = vpop.f32.mrb[2].mxu1 }
  0xf8   :  { %633 = vst [vmem:[%s1320_s3 + $0x10] sm:$0xff] %v385_v43  ;;  %665 = vst [vmem:[%s1320_s3 + $0x110] sm:$0xff] %v513_v44  ;;  %v388_v51 = vadd.f32 %v799_v49, %v1059_v40  ;;  %v516_v52 = vadd.f32 %v831_v50, %v1059_v40  ;;  %v379_v53 = vpop.f32.mrb[3].mxu0  ;;  %v507_v54 = vpop.f32.mrb[3].mxu1 }
  0xf9   :  { %631 = vst [vmem:[%s1320_s3] sm:$0xff] %v377_v47  ;;  %663 = vst [vmem:[%s1320_s3 + $0x100] sm:$0xff] %v505_v48  ;;  %v380_v55 = vadd.f32 %v1059_v40, %v379_v53  ;;  %v508_v56 = vadd.f32 %v1059_v40, %v507_v54 }
  0xfa   :  { %634 = vst [vmem:[%s1320_s3 + $0x18] sm:$0xff] %v388_v51  ;;  %666 = vst [vmem:[%s1320_s3 + $0x118] sm:$0xff] %v516_v52 }
  0xfb   :  { %632 = vst [vmem:[%s1320_s3 + $0x8] sm:$0xff] %v380_v55  ;;  %664 = vst [vmem:[%s1320_s3 + $0x108] sm:$0xff] %v508_v56 }
  0xfd   :  { %v802_v57 = vpop.f32.mrb[4].mxu0  ;;  %v834_v58 = vpop.f32.mrb[4].mxu1 }
  0xfe   :  { %v401_v59 = vadd.f32 %v802_v57, %v1059_v40  ;;  %v529_v60 = vadd.f32 %v834_v58, %v1059_v40  ;;  %v392_v61 = vpop.f32.mrb[5].mxu0  ;;  %v520_v62 = vpop.f32.mrb[5].mxu1 }
  0xff   :  { %v393_v63 = vadd.f32 %v1059_v40, %v392_v61  ;;  %v521_v0 = vadd.f32 %v1059_v40, %v520_v62  ;;  %v803_v1 = vpop.f32.mrb[6].mxu0  ;;  %v835_v2 = vpop.f32.mrb[6].mxu1 }
 0x100   :  { %637 = vst [vmem:[%s1320_s3 + $0x30] sm:$0xff] %v401_v59  ;;  %669 = vst [vmem:[%s1320_s3 + $0x130] sm:$0xff] %v529_v60  ;;  %v404_v3 = vadd.f32 %v803_v1, %v1059_v40  ;;  %v532_v4 = vadd.f32 %v835_v2, %v1059_v40  ;;  %v395_v5 = vpop.f32.mrb[7].mxu0  ;;  %v523_v6 = vpop.f32.mrb[7].mxu1 }
 0x101   :  { %635 = vst [vmem:[%s1320_s3 + $0x20] sm:$0xff] %v393_v63  ;;  %667 = vst [vmem:[%s1320_s3 + $0x120] sm:$0xff] %v521_v0  ;;  %v396_v7 = vadd.f32 %v1059_v40, %v395_v5  ;;  %v524_v8 = vadd.f32 %v1059_v40, %v523_v6 }
 0x102   :  { %638 = vst [vmem:[%s1320_s3 + $0x38] sm:$0xff] %v404_v3  ;;  %670 = vst [vmem:[%s1320_s3 + $0x138] sm:$0xff] %v532_v4 }
 0x103   :  { %636 = vst [vmem:[%s1320_s3 + $0x28] sm:$0xff] %v396_v7  ;;  %668 = vst [vmem:[%s1320_s3 + $0x128] sm:$0xff] %v524_v8 }
 0x105   :  { %v806_v9 = vpop.f32.mrb[8].mxu0  ;;  %v838_v10 = vpop.f32.mrb[8].mxu1 }
 0x106   :  { %v417_v11 = vadd.f32 %v806_v9, %v1059_v40  ;;  %v545_v12 = vadd.f32 %v838_v10, %v1059_v40  ;;  %v408_v13 = vpop.f32.mrb[9].mxu0  ;;  %v536_v14 = vpop.f32.mrb[9].mxu1 }
 0x107   :  { %v409_v15 = vadd.f32 %v1059_v40, %v408_v13  ;;  %v537_v16 = vadd.f32 %v1059_v40, %v536_v14  ;;  %v807_v17 = vpop.f32.mrb[10].mxu0  ;;  %v839_v18 = vpop.f32.mrb[10].mxu1 }
 0x108   :  { %641 = vst [vmem:[%s1320_s3 + $0x50] sm:$0xff] %v417_v11  ;;  %673 = vst [vmem:[%s1320_s3 + $0x150] sm:$0xff] %v545_v12  ;;  %v420_v19 = vadd.f32 %v807_v17, %v1059_v40  ;;  %v548_v20 = vadd.f32 %v839_v18, %v1059_v40  ;;  %v411_v21 = vpop.f32.mrb[11].mxu0  ;;  %v539_v22 = vpop.f32.mrb[11].mxu1 }
 0x109   :  { %639 = vst [vmem:[%s1320_s3 + $0x40] sm:$0xff] %v409_v15  ;;  %671 = vst [vmem:[%s1320_s3 + $0x140] sm:$0xff] %v537_v16  ;;  %v412_v23 = vadd.f32 %v1059_v40, %v411_v21  ;;  %v540_v24 = vadd.f32 %v1059_v40, %v539_v22 }
 0x10a   :  { %642 = vst [vmem:[%s1320_s3 + $0x58] sm:$0xff] %v420_v19  ;;  %674 = vst [vmem:[%s1320_s3 + $0x158] sm:$0xff] %v548_v20 }
 0x10b   :  { %640 = vst [vmem:[%s1320_s3 + $0x48] sm:$0xff] %v412_v23  ;;  %672 = vst [vmem:[%s1320_s3 + $0x148] sm:$0xff] %v540_v24 }
 0x10d   :  { %v810_v25 = vpop.f32.mrb[12].mxu0  ;;  %v842_v26 = vpop.f32.mrb[12].mxu1 }
 0x10e   :  { %v433_v27 = vadd.f32 %v810_v25, %v1059_v40  ;;  %v561_v28 = vadd.f32 %v842_v26, %v1059_v40  ;;  %v424_v29 = vpop.f32.mrb[13].mxu0  ;;  %v552_v30 = vpop.f32.mrb[13].mxu1 }
 0x10f   :  { %v425_v31 = vadd.f32 %v1059_v40, %v424_v29  ;;  %v553_v32 = vadd.f32 %v1059_v40, %v552_v30  ;;  %v811_v33 = vpop.f32.mrb[14].mxu0  ;;  %v843_v34 = vpop.f32.mrb[14].mxu1 }
 0x110   :  { %645 = vst [vmem:[%s1320_s3 + $0x70] sm:$0xff] %v433_v27  ;;  %677 = vst [vmem:[%s1320_s3 + $0x170] sm:$0xff] %v561_v28  ;;  %v436_v35 = vadd.f32 %v811_v33, %v1059_v40  ;;  %v564_v36 = vadd.f32 %v843_v34, %v1059_v40  ;;  %v427_v37 = vpop.f32.mrb[15].mxu0  ;;  %v555_v38 = vpop.f32.mrb[15].mxu1 }
 0x111   :  { %643 = vst [vmem:[%s1320_s3 + $0x60] sm:$0xff] %v425_v31  ;;  %675 = vst [vmem:[%s1320_s3 + $0x160] sm:$0xff] %v553_v32  ;;  %v428_v39 = vadd.f32 %v1059_v40, %v427_v37  ;;  %v556_v41 = vadd.f32 %v1059_v40, %v555_v38 }
 0x112   :  { %646 = vst [vmem:[%s1320_s3 + $0x78] sm:$0xff] %v436_v35  ;;  %678 = vst [vmem:[%s1320_s3 + $0x178] sm:$0xff] %v564_v36 }
 0x113   :  { %644 = vst [vmem:[%s1320_s3 + $0x68] sm:$0xff] %v428_v39  ;;  %676 = vst [vmem:[%s1320_s3 + $0x168] sm:$0xff] %v556_v41 }
 0x115   :  { %v814_v42 = vpop.f32.mrb[16].mxu0  ;;  %v846_v43 = vpop.f32.mrb[16].mxu1 }
 0x116   :  { %v449_v44 = vadd.f32 %v814_v42, %v1059_v40  ;;  %v577_v45 = vadd.f32 %v846_v43, %v1059_v40  ;;  %v440_v46 = vpop.f32.mrb[17].mxu0  ;;  %v568_v47 = vpop.f32.mrb[17].mxu1 }
 0x117   :  { %v441_v48 = vadd.f32 %v1059_v40, %v440_v46  ;;  %v569_v49 = vadd.f32 %v1059_v40, %v568_v47  ;;  %v815_v50 = vpop.f32.mrb[18].mxu0  ;;  %v847_v51 = vpop.f32.mrb[18].mxu1 }
 0x118   :  { %649 = vst [vmem:[%s1320_s3 + $0x90] sm:$0xff] %v449_v44  ;;  %681 = vst [vmem:[%s1320_s3 + $0x190] sm:$0xff] %v577_v45  ;;  %v452_v52 = vadd.f32 %v815_v50, %v1059_v40  ;;  %v580_v53 = vadd.f32 %v847_v51, %v1059_v40  ;;  %v443_v54 = vpop.f32.mrb[19].mxu0  ;;  %v571_v55 = vpop.f32.mrb[19].mxu1 }
 0x119   :  { %647 = vst [vmem:[%s1320_s3 + $0x80] sm:$0xff] %v441_v48  ;;  %679 = vst [vmem:[%s1320_s3 + $0x180] sm:$0xff] %v569_v49  ;;  %v444_v56 = vadd.f32 %v1059_v40, %v443_v54  ;;  %v572_v57 = vadd.f32 %v1059_v40, %v571_v55 }
 0x11a   :  { %650 = vst [vmem:[%s1320_s3 + $0x98] sm:$0xff] %v452_v52  ;;  %682 = vst [vmem:[%s1320_s3 + $0x198] sm:$0xff] %v580_v53 }
 0x11b   :  { %648 = vst [vmem:[%s1320_s3 + $0x88] sm:$0xff] %v444_v56  ;;  %680 = vst [vmem:[%s1320_s3 + $0x188] sm:$0xff] %v572_v57 }
 0x11d   :  { %v818_v58 = vpop.f32.mrb[20].mxu0  ;;  %v850_v59 = vpop.f32.mrb[20].mxu1 }
 0x11e   :  { %v465_v60 = vadd.f32 %v818_v58, %v1059_v40  ;;  %v593_v61 = vadd.f32 %v850_v59, %v1059_v40  ;;  %v456_v62 = vpop.f32.mrb[21].mxu0  ;;  %v584_v63 = vpop.f32.mrb[21].mxu1 }
 0x11f   :  { %v457_v0 = vadd.f32 %v1059_v40, %v456_v62  ;;  %v585_v1 = vadd.f32 %v1059_v40, %v584_v63  ;;  %v819_v2 = vpop.f32.mrb[22].mxu0  ;;  %v851_v3 = vpop.f32.mrb[22].mxu1 }
 0x120   :  { %653 = vst [vmem:[%s1320_s3 + $0xb0] sm:$0xff] %v465_v60  ;;  %685 = vst [vmem:[%s1320_s3 + $0x1b0] sm:$0xff] %v593_v61  ;;  %v468_v4 = vadd.f32 %v819_v2, %v1059_v40  ;;  %v596_v5 = vadd.f32 %v851_v3, %v1059_v40  ;;  %v459_v6 = vpop.f32.mrb[23].mxu0  ;;  %v587_v7 = vpop.f32.mrb[23].mxu1 }
 0x121   :  { %651 = vst [vmem:[%s1320_s3 + $0xa0] sm:$0xff] %v457_v0  ;;  %683 = vst [vmem:[%s1320_s3 + $0x1a0] sm:$0xff] %v585_v1  ;;  %v460_v8 = vadd.f32 %v1059_v40, %v459_v6  ;;  %v588_v9 = vadd.f32 %v1059_v40, %v587_v7 }
 0x122   :  { %654 = vst [vmem:[%s1320_s3 + $0xb8] sm:$0xff] %v468_v4  ;;  %686 = vst [vmem:[%s1320_s3 + $0x1b8] sm:$0xff] %v596_v5 }
 0x123   :  { %652 = vst [vmem:[%s1320_s3 + $0xa8] sm:$0xff] %v460_v8  ;;  %684 = vst [vmem:[%s1320_s3 + $0x1a8] sm:$0xff] %v588_v9 }
 0x125   :  { %v822_v10 = vpop.f32.mrb[24].mxu0  ;;  %v854_v11 = vpop.f32.mrb[24].mxu1 }
 0x126   :  { %v481_v12 = vadd.f32 %v822_v10, %v1059_v40  ;;  %v609_v13 = vadd.f32 %v854_v11, %v1059_v40  ;;  %v472_v14 = vpop.f32.mrb[25].mxu0  ;;  %v600_v15 = vpop.f32.mrb[25].mxu1 }
 0x127   :  { %v473_v16 = vadd.f32 %v1059_v40, %v472_v14  ;;  %v601_v17 = vadd.f32 %v1059_v40, %v600_v15  ;;  %v823_v18 = vpop.f32.mrb[26].mxu0  ;;  %v855_v19 = vpop.f32.mrb[26].mxu1 }
 0x128   :  { %657 = vst [vmem:[%s1320_s3 + $0xd0] sm:$0xff] %v481_v12  ;;  %689 = vst [vmem:[%s1320_s3 + $0x1d0] sm:$0xff] %v609_v13  ;;  %v484_v20 = vadd.f32 %v823_v18, %v1059_v40  ;;  %v612_v21 = vadd.f32 %v855_v19, %v1059_v40  ;;  %v475_v22 = vpop.f32.mrb[27].mxu0  ;;  %v603_v23 = vpop.f32.mrb[27].mxu1 }
 0x129   :  { %655 = vst [vmem:[%s1320_s3 + $0xc0] sm:$0xff] %v473_v16  ;;  %687 = vst [vmem:[%s1320_s3 + $0x1c0] sm:$0xff] %v601_v17  ;;  %v476_v24 = vadd.f32 %v1059_v40, %v475_v22  ;;  %v604_v25 = vadd.f32 %v1059_v40, %v603_v23 }
 0x12a   :  { %658 = vst [vmem:[%s1320_s3 + $0xd8] sm:$0xff] %v484_v20  ;;  %690 = vst [vmem:[%s1320_s3 + $0x1d8] sm:$0xff] %v612_v21 }
 0x12b   :  { %656 = vst [vmem:[%s1320_s3 + $0xc8] sm:$0xff] %v476_v24  ;;  %688 = vst [vmem:[%s1320_s3 + $0x1c8] sm:$0xff] %v604_v25 }
 0x12d   :  { %v826_v26 = vpop.f32.mrb[28].mxu0  ;;  %v858_v27 = vpop.f32.mrb[28].mxu1 }
 0x12e   :  { %v497_v28 = vadd.f32 %v826_v26, %v1059_v40  ;;  %v625_v29 = vadd.f32 %v858_v27, %v1059_v40  ;;  %v488_v30 = vpop.f32.mrb[29].mxu0  ;;  %v616_v31 = vpop.f32.mrb[29].mxu1 }
 0x12f   :  { %v489_v32 = vadd.f32 %v1059_v40, %v488_v30  ;;  %v617_v33 = vadd.f32 %v1059_v40, %v616_v31  ;;  %v827_v34 = vpop.f32.mrb[30].mxu0  ;;  %v859_v35 = vpop.f32.mrb[30].mxu1 }
 0x130   :  { %661 = vst [vmem:[%s1320_s3 + $0xf0] sm:$0xff] %v497_v28  ;;  %693 = vst [vmem:[%s1320_s3 + $0x1f0] sm:$0xff] %v625_v29  ;;  %v500_v36 = vadd.f32 %v827_v34, %v1059_v40  ;;  %v628_v37 = vadd.f32 %v859_v35, %v1059_v40  ;;  %v491_v38 = vpop.f32.mrb[31].mxu0  ;;  %v619_v39 = vpop.f32.mrb[31].mxu1 }
 0x131   :  { %659 = vst [vmem:[%s1320_s3 + $0xe0] sm:$0xff] %v489_v32  ;;  %691 = vst [vmem:[%s1320_s3 + $0x1e0] sm:$0xff] %v617_v33  ;;  %v492_v41 = vadd.f32 %v1059_v40, %v491_v38  ;;  %v620_v42 = vadd.f32 %v1059_v40, %v619_v39 }
 0x132   :  { %662 = vst [vmem:[%s1320_s3 + $0xf8] sm:$0xff] %v500_v36  ;;  %694 = vst [vmem:[%s1320_s3 + $0x1f8] sm:$0xff] %v628_v37 }
 0x133   :  { %660 = vst [vmem:[%s1320_s3 + $0xe8] sm:$0xff] %v492_v41  ;;  %692 = vst [vmem:[%s1320_s3 + $0x1e8] sm:$0xff] %v620_v42 }

// kernel: _lambda_.17
= control target key start
LH: loop header
LB: loop body
LE: loop exit
PB: predicated region body
PF: predicated region fallthrough
CT: control target
= control target key end

     0   :  { %v1312_v0 = vmov 0   ;;  %s2063_s1 = inlined_call_operand.vmem [shape: bf16[256,128], index: 1, kind: input, shape index: {}]   ;;  %s2064_s0 = inlined_call_operand.vmem [shape: bf16[512,256], index: 0, kind: input, shape index: {}]   ;;  %s2065_s2 = inlined_call_operand.vmem [shape: f32[1,128], index: 2, kind: input, shape index: {}]   ;;  %s2066_s3 = inlined_call_operand.vmem [shape: f32[512,128], index: 3, kind: input, shape index: {}, may-alias: {3,4}]   ;;  %s2067_s4 = inlined_call_operand.vmem [shape: f32[512,128], index: 4, kind: output, shape index: {}, may-alias: {3,4}]  }
   0x1   :  { %537 = vmatprep.subr.bf16.mxu0 %v1312_v0  ;;  %1167 = vmatprep.subr.bf16.mxu1 %v1312_v0  ;;  %v1200_v1 = vld [vmem:[%s2063_s1] sm:$0xff]   ;;  %v1201_v2 = vld [vmem:[%s2063_s1 + $0x8] sm:$0xff]   ;;  %v1202_v3 = vld [vmem:[%s2063_s1 + $0x10] sm:$0xff]  }
   0x2   :  { %538 = vmatpush1.bf16.msra.mxu0 %v1200_v1  ;;  %1183 = vmatpush1.bf16.msra.mxu1 %v1200_v1  ;;  %v1203_v4 = vld [vmem:[%s2063_s1 + $0x18] sm:$0xff]   ;;  %v1204_v5 = vld [vmem:[%s2063_s1 + $0x20] sm:$0xff]   ;;  %v1205_v7 = vld [vmem:[%s2063_s1 + $0x28] sm:$0xff]  }
   0x3   :  { %539 = vmatprep.subr.bf16.mxu0 %v1312_v0  ;;  %1168 = vmatprep.subr.bf16.mxu1 %v1312_v0  ;;  %v1218_v6 = vld [vmem:[%s2064_s0 + $0x4] ss:$8 sps:$4 sm:$0xff]   ;;  %v1206_v9 = vld [vmem:[%s2063_s1 + $0x30] sm:$0xff]   ;;  %v1207_v10 = vld [vmem:[%s2063_s1 + $0x38] sm:$0xff]  }
   0x4   :  { %v1221_v8 = vld [vmem:[%s2064_s0 + $0x104] ss:$8 sps:$4 sm:$0xff]   ;;  %569 = vmatprep.mubr.bf16.mxu0 %v1218_v6  ;;  %v1210_v13 = vld [vmem:[%s2063_s1 + $0x50] sm:$0xff]   ;;  %v1211_v14 = vld [vmem:[%s2063_s1 + $0x58] sm:$0xff]  }
   0x5   :  { %697 = vmatprep.mubr.bf16.mxu1 %v1221_v8  ;;  %v1208_v11 = vld [vmem:[%s2063_s1 + $0x40] sm:$0xff]   ;;  %v1209_v12 = vld [vmem:[%s2063_s1 + $0x48] sm:$0xff]   ;;  %v1214_v17 = vld [vmem:[%s2063_s1 + $0x70] sm:$0xff]  }
   0x6   :  { %540 = vmatpush1.bf16.msra.mxu0 %v1201_v2  ;;  %1184 = vmatpush1.bf16.msra.mxu1 %v1201_v2  ;;  %v1212_v15 = vld [vmem:[%s2063_s1 + $0x60] sm:$0xff]   ;;  %v1213_v16 = vld [vmem:[%s2063_s1 + $0x68] sm:$0xff]   ;;  %v1215_v18 = vld [vmem:[%s2063_s1 + $0x78] sm:$0xff]  }
   0x7   :  { %541 = vmatprep.subr.bf16.mxu0 %v1312_v0  ;;  %1169 = vmatprep.subr.bf16.mxu1 %v1312_v0  ;;  %v1216_v19 = vld [vmem:[%s2064_s0] ss:$8 sps:$4 sm:$0xff]   ;;  %v1222_v21 = vld [vmem:[%s2064_s0 + $0x14] ss:$8 sps:$4 sm:$0xff]   ;;  %v1226_v23 = vld [vmem:[%s2064_s0 + $0x10] ss:$8 sps:$4 sm:$0xff]  }
   0x8   :  { %v1219_v20 = vld [vmem:[%s2064_s0 + $0x100] ss:$8 sps:$4 sm:$0xff]   ;;  %v1224_v22 = vld [vmem:[%s2064_s0 + $0x114] ss:$8 sps:$4 sm:$0xff]   ;;  %v1227_v24 = vld [vmem:[%s2064_s0 + $0x110] ss:$8 sps:$4 sm:$0xff]  }
   0x9   :  { %v1228_v25 = vld [vmem:[%s2064_s0 + $0x24] ss:$8 sps:$4 sm:$0xff]   ;;  %v1232_v27 = vld [vmem:[%s2064_s0 + $0x20] ss:$8 sps:$4 sm:$0xff]   ;;  %v1234_v29 = vld [vmem:[%s2064_s0 + $0x34] ss:$8 sps:$4 sm:$0xff]  }
   0xa   :  { %542 = vmatpush1.bf16.msra.mxu0 %v1202_v3  ;;  %1185 = vmatpush1.bf16.msra.mxu1 %v1202_v3  ;;  %v1230_v26 = vld [vmem:[%s2064_s0 + $0x124] ss:$8 sps:$4 sm:$0xff]   ;;  %v1233_v28 = vld [vmem:[%s2064_s0 + $0x120] ss:$8 sps:$4 sm:$0xff]   ;;  %v1236_v30 = vld [vmem:[%s2064_s0 + $0x134] ss:$8 sps:$4 sm:$0xff]  }
   0xb   :  { %543 = vmatprep.subr.bf16.mxu0 %v1312_v0  ;;  %1170 = vmatprep.subr.bf16.mxu1 %v1312_v0  ;;  %v1238_v31 = vld [vmem:[%s2064_s0 + $0x30] ss:$8 sps:$4 sm:$0xff]   ;;  %v1240_v33 = vld [vmem:[%s2064_s0 + $0x44] ss:$8 sps:$4 sm:$0xff]   ;;  %v1244_v35 = vld [vmem:[%s2064_s0 + $0x40] ss:$8 sps:$4 sm:$0xff]  }
   0xc   :  { %v1239_v32 = vld [vmem:[%s2064_s0 + $0x130] ss:$8 sps:$4 sm:$0xff]   ;;  %v1242_v34 = vld [vmem:[%s2064_s0 + $0x144] ss:$8 sps:$4 sm:$0xff]   ;;  %v1245_v36 = vld [vmem:[%s2064_s0 + $0x140] ss:$8 sps:$4 sm:$0xff]  }
   0xd   :  { %v1246_v37 = vld [vmem:[%s2064_s0 + $0x54] ss:$8 sps:$4 sm:$0xff]   ;;  %v1250_v39 = vld [vmem:[%s2064_s0 + $0x50] ss:$8 sps:$4 sm:$0xff]   ;;  %v1252_v41 = vld [vmem:[%s2064_s0 + $0x64] ss:$8 sps:$4 sm:$0xff]  }
   0xe   :  { %544 = vmatpush1.bf16.msra.mxu0 %v1203_v4  ;;  %1186 = vmatpush1.bf16.msra.mxu1 %v1203_v4  ;;  %v1248_v38 = vld [vmem:[%s2064_s0 + $0x154] ss:$8 sps:$4 sm:$0xff]   ;;  %v1251_v40 = vld [vmem:[%s2064_s0 + $0x150] ss:$8 sps:$4 sm:$0xff]   ;;  %v1254_v42 = vld [vmem:[%s2064_s0 + $0x164] ss:$8 sps:$4 sm:$0xff]  }
   0xf   :  { %545 = vmatprep.subr.bf16.mxu0 %v1312_v0  ;;  %1171 = vmatprep.subr.bf16.mxu1 %v1312_v0  ;;  %v1256_v43 = vld [vmem:[%s2064_s0 + $0x60] ss:$8 sps:$4 sm:$0xff]   ;;  %v1258_v45 = vld [vmem:[%s2064_s0 + $0x74] ss:$8 sps:$4 sm:$0xff]   ;;  %v1262_v47 = vld [vmem:[%s2064_s0 + $0x70] ss:$8 sps:$4 sm:$0xff]  }
  0x10   :  { %v1257_v44 = vld [vmem:[%s2064_s0 + $0x160] ss:$8 sps:$4 sm:$0xff]   ;;  %v1260_v46 = vld [vmem:[%s2064_s0 + $0x174] ss:$8 sps:$4 sm:$0xff]   ;;  %v1263_v48 = vld [vmem:[%s2064_s0 + $0x170] ss:$8 sps:$4 sm:$0xff]  }
  0x11   :  { %v1264_v49 = vld [vmem:[%s2064_s0 + $0x84] ss:$8 sps:$4 sm:$0xff]   ;;  %v1268_v51 = vld [vmem:[%s2064_s0 + $0x80] ss:$8 sps:$4 sm:$0xff]   ;;  %v1270_v53 = vld [vmem:[%s2064_s0 + $0x94] ss:$8 sps:$4 sm:$0xff]  }
  0x12   :  { %546 = vmatpush1.bf16.msra.mxu0 %v1204_v5  ;;  %1187 = vmatpush1.bf16.msra.mxu1 %v1204_v5  ;;  %v1266_v50 = vld [vmem:[%s2064_s0 + $0x184] ss:$8 sps:$4 sm:$0xff]   ;;  %v1269_v52 = vld [vmem:[%s2064_s0 + $0x180] ss:$8 sps:$4 sm:$0xff]   ;;  %v1272_v54 = vld [vmem:[%s2064_s0 + $0x194] ss:$8 sps:$4 sm:$0xff]  }
  0x13   :  { %547 = vmatprep.subr.bf16.mxu0 %v1312_v0  ;;  %1172 = vmatprep.subr.bf16.mxu1 %v1312_v0  ;;  %v1274_v55 = vld [vmem:[%s2064_s0 + $0x90] ss:$8 sps:$4 sm:$0xff]   ;;  %v1276_v57 = vld [vmem:[%s2064_s0 + $0xa4] ss:$8 sps:$4 sm:$0xff]   ;;  %v1280_v59 = vld [vmem:[%s2064_s0 + $0xa0] ss:$8 sps:$4 sm:$0xff]  }
  0x14   :  { %v1275_v56 = vld [vmem:[%s2064_s0 + $0x190] ss:$8 sps:$4 sm:$0xff]   ;;  %v1278_v58 = vld [vmem:[%s2064_s0 + $0x1a4] ss:$8 sps:$4 sm:$0xff]   ;;  %v1281_v60 = vld [vmem:[%s2064_s0 + $0x1a0] ss:$8 sps:$4 sm:$0xff]  }
  0x15   :  { %v1282_v61 = vld [vmem:[%s2064_s0 + $0xb4] ss:$8 sps:$4 sm:$0xff]   ;;  %v1286_v63 = vld [vmem:[%s2064_s0 + $0xb0] ss:$8 sps:$4 sm:$0xff]   ;;  %v1288_v1 = vld [vmem:[%s2064_s0 + $0xc4] ss:$8 sps:$4 sm:$0xff]  }
  0x16   :  { %548 = vmatpush1.bf16.msra.mxu0 %v1205_v7  ;;  %1188 = vmatpush1.bf16.msra.mxu1 %v1205_v7  ;;  %v1284_v62 = vld [vmem:[%s2064_s0 + $0x1b4] ss:$8 sps:$4 sm:$0xff]   ;;  %v1290_v2 = vld [vmem:[%s2064_s0 + $0x1c4] ss:$8 sps:$4 sm:$0xff]   ;;  %v1292_v3 = vld [vmem:[%s2064_s0 + $0xc0] ss:$8 sps:$4 sm:$0xff]  }
  0x17   :  { %549 = vmatprep.subr.bf16.mxu0 %v1312_v0  ;;  %1173 = vmatprep.subr.bf16.mxu1 %v1312_v0  ;;  %v1293_v4 = vld [vmem:[%s2064_s0 + $0x1c0] ss:$8 sps:$4 sm:$0xff]   ;;  %v1294_v5 = vld [vmem:[%s2064_s0 + $0xd4] ss:$8 sps:$4 sm:$0xff]   ;;  %v1298_v7 = vld [vmem:[%s2064_s0 + $0xd0] ss:$8 sps:$4 sm:$0xff]  }
  0x18   :  { %v1296_v6 = vld [vmem:[%s2064_s0 + $0x1d4] ss:$8 sps:$4 sm:$0xff]   ;;  %v1299_v8 = vld [vmem:[%s2064_s0 + $0x1d0] ss:$8 sps:$4 sm:$0xff]  }
  0x1a   :  { %550 = vmatpush1.bf16.msra.mxu0 %v1206_v9  ;;  %1189 = vmatpush1.bf16.msra.mxu1 %v1206_v9  ;;  %v1300_v9 = vld [vmem:[%s2064_s0 + $0xe4] ss:$8 sps:$4 sm:$0xff]  }
  0x1b   :  { %551 = vmatprep.subr.bf16.mxu0 %v1312_v0  ;;  %1174 = vmatprep.subr.bf16.mxu1 %v1312_v0 }
  0x1e   :  { %552 = vmatpush1.bf16.msra.mxu0 %v1207_v10  ;;  %1190 = vmatpush1.bf16.msra.mxu1 %v1207_v10  ;;  %v1302_v10 = vld [vmem:[%s2064_s0 + $0x1e4] ss:$8 sps:$4 sm:$0xff]  }
  0x1f   :  { %553 = vmatprep.subr.bf16.mxu0 %v1312_v0  ;;  %1175 = vmatprep.subr.bf16.mxu1 %v1312_v0 }
  0x22   :  { %554 = vmatpush1.bf16.msra.mxu0 %v1208_v11  ;;  %1191 = vmatpush1.bf16.msra.mxu1 %v1208_v11  ;;  %v1304_v11 = vld [vmem:[%s2064_s0 + $0xe0] ss:$8 sps:$4 sm:$0xff]  }
  0x23   :  { %555 = vmatprep.subr.bf16.mxu0 %v1312_v0  ;;  %1176 = vmatprep.subr.bf16.mxu1 %v1312_v0 }
  0x26   :  { %556 = vmatpush1.bf16.msra.mxu0 %v1209_v12  ;;  %1192 = vmatpush1.bf16.msra.mxu1 %v1209_v12  ;;  %v1305_v12 = vld [vmem:[%s2064_s0 + $0x1e0] ss:$8 sps:$4 sm:$0xff]  }
  0x27   :  { %557 = vmatprep.subr.bf16.mxu0 %v1312_v0  ;;  %1177 = vmatprep.subr.bf16.mxu1 %v1312_v0 }
  0x2a   :  { %558 = vmatpush1.bf16.msra.mxu0 %v1210_v13  ;;  %1193 = vmatpush1.bf16.msra.mxu1 %v1210_v13  ;;  %v1306_v13 = vld [vmem:[%s2064_s0 + $0xf4] ss:$8 sps:$4 sm:$0xff]  }
  0x2b   :  { %559 = vmatprep.subr.bf16.mxu0 %v1312_v0  ;;  %1178 = vmatprep.subr.bf16.mxu1 %v1312_v0 }
  0x2e   :  { %560 = vmatpush1.bf16.msra.mxu0 %v1211_v14  ;;  %1194 = vmatpush1.bf16.msra.mxu1 %v1211_v14  ;;  %v1308_v14 = vld [vmem:[%s2064_s0 + $0x1f4] ss:$8 sps:$4 sm:$0xff]  }
  0x2f   :  { %561 = vmatprep.subr.bf16.mxu0 %v1312_v0  ;;  %1179 = vmatprep.subr.bf16.mxu1 %v1312_v0 }
  0x32   :  { %562 = vmatpush1.bf16.msra.mxu0 %v1212_v15  ;;  %1195 = vmatpush1.bf16.msra.mxu1 %v1212_v15  ;;  %v1310_v15 = vld [vmem:[%s2064_s0 + $0xf0] ss:$8 sps:$4 sm:$0xff]  }
  0x33   :  { %563 = vmatprep.subr.bf16.mxu0 %v1312_v0  ;;  %1180 = vmatprep.subr.bf16.mxu1 %v1312_v0 }
  0x36   :  { %564 = vmatpush1.bf16.msra.mxu0 %v1213_v16  ;;  %1196 = vmatpush1.bf16.msra.mxu1 %v1213_v16  ;;  %v1311_v16 = vld [vmem:[%s2064_s0 + $0x1f0] ss:$8 sps:$4 sm:$0xff]  }
  0x37   :  { %565 = vmatprep.subr.bf16.mxu0 %v1312_v0  ;;  %1181 = vmatprep.subr.bf16.mxu1 %v1312_v0 }
  0x3a   :  { %566 = vmatpush1.bf16.msra.mxu0 %v1214_v17  ;;  %1197 = vmatpush1.bf16.msra.mxu1 %v1214_v17  ;;  %v1613_v17 = vld [vmem:[%s2065_s2] ss:$0 sm:$0xff] }
  0x3b   :  { %567 = vmatprep.subr.bf16.mxu0 %v1312_v0  ;;  %1182 = vmatprep.subr.bf16.mxu1 %v1312_v0  ;;  %v1287_v0 = vld [vmem:[%s2064_s0 + $0x1b0] ss:$8 sps:$4 sm:$0xff]  }
  0x3e   :  { %568 = vmatpush1.bf16.msra.mxu0 %v1215_v18  ;;  %1198 = vmatpush1.bf16.msra.mxu1 %v1215_v18 }
  0x41   :  { %570 = vmatmul.mubr.bf16.vlgmr.msra.gmra.mrb[0].mxu0 %v1216_v19  ;;  %698 = vmatmul.mubr.bf16.vlgmr.msra.gmra.mrb[0].mxu1 %v1219_v20  ;;  %v826_v19 = vld [vmem:[%s2066_s3] sm:$0xff] }
  0x42   :  { %577 = vmatprep.mubr.bf16.mxu0 %v1222_v21  ;;  %705 = vmatprep.mubr.bf16.mxu1 %v1224_v22  ;;  %v858_v21 = vld [vmem:[%s2066_s3 + $0x100] sm:$0xff] }
  0x49   :  { %578 = vmatmul.mubr.bf16.gmra.mrb[4].mxu0 %v1226_v23  ;;  %706 = vmatmul.mubr.bf16.gmra.mrb[4].mxu1 %v1227_v24 }
  0x4a   :  { %585 = vmatprep.mubr.bf16.mxu0 %v1228_v25  ;;  %713 = vmatprep.mubr.bf16.mxu1 %v1230_v26 }
  0x51   :  { %586 = vmatmul.mubr.bf16.gmra.mrb[8].mxu0 %v1232_v27  ;;  %714 = vmatmul.mubr.bf16.gmra.mrb[8].mxu1 %v1233_v28  ;;  %v827_v27 = vld [vmem:[%s2066_s3 + $0x8] sm:$0xff] }
  0x52   :  { %593 = vmatprep.mubr.bf16.mxu0 %v1234_v29  ;;  %721 = vmatprep.mubr.bf16.mxu1 %v1236_v30  ;;  %v859_v29 = vld [vmem:[%s2066_s3 + $0x108] sm:$0xff] }
  0x59   :  { %594 = vmatmul.mubr.bf16.gmra.mrb[12].mxu0 %v1238_v31  ;;  %722 = vmatmul.mubr.bf16.gmra.mrb[12].mxu1 %v1239_v32 }
  0x5a   :  { %601 = vmatprep.mubr.bf16.mxu0 %v1240_v33  ;;  %729 = vmatprep.mubr.bf16.mxu1 %v1242_v34 }
  0x61   :  { %602 = vmatmul.mubr.bf16.gmra.mrb[16].mxu0 %v1244_v35  ;;  %730 = vmatmul.mubr.bf16.gmra.mrb[16].mxu1 %v1245_v36 }
  0x62   :  { %609 = vmatprep.mubr.bf16.mxu0 %v1246_v37  ;;  %737 = vmatprep.mubr.bf16.mxu1 %v1248_v38 }
  0x69   :  { %610 = vmatmul.mubr.bf16.gmra.mrb[20].mxu0 %v1250_v39  ;;  %738 = vmatmul.mubr.bf16.gmra.mrb[20].mxu1 %v1251_v40 }
  0x6a   :  { %617 = vmatprep.mubr.bf16.mxu0 %v1252_v41  ;;  %745 = vmatprep.mubr.bf16.mxu1 %v1254_v42 }
  0x71   :  { %618 = vmatmul.mubr.bf16.gmra.mrb[24].mxu0 %v1256_v43  ;;  %746 = vmatmul.mubr.bf16.gmra.mrb[24].mxu1 %v1257_v44 }
  0x72   :  { %625 = vmatprep.mubr.bf16.mxu0 %v1258_v45  ;;  %753 = vmatprep.mubr.bf16.mxu1 %v1260_v46 }
  0x79   :  { %626 = vmatmul.mubr.bf16.gmra.mrb[28].mxu0 %v1262_v47  ;;  %754 = vmatmul.mubr.bf16.gmra.mrb[28].mxu1 %v1263_v48 }
  0x7a   :  { %633 = vmatprep.mubr.bf16.mxu0 %v1264_v49  ;;  %761 = vmatprep.mubr.bf16.mxu1 %v1266_v50 }
  0x81   :  { %634 = vmatmul.mubr.bf16.gmra.mrb[32].mxu0 %v1268_v51  ;;  %762 = vmatmul.mubr.bf16.gmra.mrb[32].mxu1 %v1269_v52 }
  0x82   :  { %641 = vmatprep.mubr.bf16.mxu0 %v1270_v53  ;;  %769 = vmatprep.mubr.bf16.mxu1 %v1272_v54 }
  0x89   :  { %642 = vmatmul.mubr.bf16.gmra.mrb[36].mxu0 %v1274_v55  ;;  %770 = vmatmul.mubr.bf16.gmra.mrb[36].mxu1 %v1275_v56 }
  0x8a   :  { %649 = vmatprep.mubr.bf16.mxu0 %v1276_v57  ;;  %777 = vmatprep.mubr.bf16.mxu1 %v1278_v58 }
  0x91   :  { %650 = vmatmul.mubr.bf16.gmra.mrb[40].mxu0 %v1280_v59  ;;  %778 = vmatmul.mubr.bf16.gmra.mrb[40].mxu1 %v1281_v60 }
  0x92   :  { %657 = vmatprep.mubr.bf16.mxu0 %v1282_v61  ;;  %785 = vmatprep.mubr.bf16.mxu1 %v1284_v62 }
  0x99   :  { %658 = vmatmul.mubr.bf16.gmra.mrb[44].mxu0 %v1286_v63  ;;  %786 = vmatmul.mubr.bf16.gmra.mrb[44].mxu1 %v1287_v0 }
  0x9a   :  { %665 = vmatprep.mubr.bf16.mxu0 %v1288_v1  ;;  %793 = vmatprep.mubr.bf16.mxu1 %v1290_v2 }
  0xa1   :  { %666 = vmatmul.mubr.bf16.gmra.mrb[48].mxu0 %v1292_v3  ;;  %794 = vmatmul.mubr.bf16.gmra.mrb[48].mxu1 %v1293_v4 }
  0xa2   :  { %673 = vmatprep.mubr.bf16.mxu0 %v1294_v5  ;;  %801 = vmatprep.mubr.bf16.mxu1 %v1296_v6 }
  0xa9   :  { %674 = vmatmul.mubr.bf16.gmra.mrb[52].mxu0 %v1298_v7  ;;  %802 = vmatmul.mubr.bf16.gmra.mrb[52].mxu1 %v1299_v8 }
  0xaa   :  { %681 = vmatprep.mubr.bf16.mxu0 %v1300_v9  ;;  %809 = vmatprep.mubr.bf16.mxu1 %v1302_v10 }
  0xb1   :  { %682 = vmatmul.mubr.bf16.gmra.mrb[56].mxu0 %v1304_v11  ;;  %810 = vmatmul.mubr.bf16.gmra.mrb[56].mxu1 %v1305_v12 }
  0xb2   :  { %689 = vmatprep.mubr.bf16.mxu0 %v1306_v13  ;;  %817 = vmatprep.mubr.bf16.mxu1 %v1308_v14 }
  0xb9   :  { %690 = vmatmul.mubr.bf16.gmra.mrb[60].mxu0 %v1310_v15  ;;  %818 = vmatmul.mubr.bf16.gmra.mrb[60].mxu1 %v1311_v16 }
 0x114   :  { %v571_v18 = vpop.f32.mrb[0].mxu0  ;;  %v699_v20 = vpop.f32.mrb[0].mxu1 }
 0x115   :  { %v572_v22 = vadd.f32 %v1613_v17, %v571_v18  ;;  %v700_v23 = vadd.f32 %v1613_v17, %v699_v20  ;;  %v573_v24 = vpop.f32.mrb[1].mxu0  ;;  %v701_v25 = vpop.f32.mrb[1].mxu1 }
 0x116   :  { %v574_v26 = vpop.f32.mrb[2].mxu0  ;;  %v702_v28 = vpop.f32.mrb[2].mxu1 }
 0x117   :  { %v890_v30 = vadd.f32 %v826_v19, %v572_v22  ;;  %v922_v31 = vadd.f32 %v858_v21, %v700_v23  ;;  %v575_v32 = vadd.f32 %v1613_v17, %v574_v26  ;;  %v703_v33 = vadd.f32 %v1613_v17, %v702_v28  ;;  %v576_v34 = vpop.f32.mrb[3].mxu0  ;;  %v704_v35 = vpop.f32.mrb[3].mxu1 }
 0x119   :  { %v954_v36 = vmax.f32 %v890_v30, 0.0  ;;  %v986_v37 = vmax.f32 %v922_v31, 0.0  ;;  %v891_v38 = vadd.f32 %v827_v27, %v575_v32  ;;  %v923_v39 = vadd.f32 %v859_v29, %v703_v33 }
 0x11b   :  { %1018 = vst [vmem:[%s2067_s4] sm:$0xff] %v954_v36  ;;  %1050 = vst [vmem:[%s2067_s4 + $0x100] sm:$0xff] %v986_v37  ;;  %v955_v40 = vmax.f32 %v891_v38, 0.0  ;;  %v987_v41 = vmax.f32 %v923_v39, 0.0 }
 0x11c   :  { %v579_v42 = vpop.f32.mrb[4].mxu0  ;;  %v707_v44 = vpop.f32.mrb[4].mxu1 }
 0x11d   :  { %v580_v46 = vadd.f32 %v1613_v17, %v579_v42  ;;  %v708_v47 = vadd.f32 %v1613_v17, %v707_v44  ;;  %v581_v48 = vpop.f32.mrb[5].mxu0  ;;  %v709_v49 = vpop.f32.mrb[5].mxu1 }
 0x11e   :  { %v582_v50 = vpop.f32.mrb[6].mxu0  ;;  %v710_v52 = vpop.f32.mrb[6].mxu1 }
 0x11f   :  { %v583_v56 = vadd.f32 %v1613_v17, %v582_v50  ;;  %v711_v57 = vadd.f32 %v1613_v17, %v710_v52  ;;  %v584_v58 = vpop.f32.mrb[7].mxu0  ;;  %v712_v59 = vpop.f32.mrb[7].mxu1 }
 0x122   :  { %v828_v43 = vld [vmem:[%s2066_s3 + $0x10] sm:$0xff] }
 0x123   :  { %v860_v45 = vld [vmem:[%s2066_s3 + $0x110] sm:$0xff]  ;;  %v892_v54 = vadd.f32 %v828_v43, %v580_v46 }
 0x124   :  { %1019 = vst [vmem:[%s2067_s4 + $0x8] sm:$0xff] %v955_v40  ;;  %1051 = vst [vmem:[%s2067_s4 + $0x108] sm:$0xff] %v987_v41  ;;  %v924_v55 = vadd.f32 %v860_v45, %v708_v47  ;;  %v587_v2 = vpop.f32.mrb[8].mxu0  ;;  %v715_v4 = vpop.f32.mrb[8].mxu1 }
 0x125   :  { %v956_v60 = vmax.f32 %v892_v54, 0.0  ;;  %v588_v6 = vadd.f32 %v1613_v17, %v587_v2  ;;  %v716_v7 = vadd.f32 %v1613_v17, %v715_v4  ;;  %v589_v8 = vpop.f32.mrb[9].mxu0  ;;  %v717_v9 = vpop.f32.mrb[9].mxu1 }
 0x126   :  { %v988_v61 = vmax.f32 %v924_v55, 0.0  ;;  %v590_v10 = vpop.f32.mrb[10].mxu0  ;;  %v718_v12 = vpop.f32.mrb[10].mxu1 }
 0x127   :  { %v591_v16 = vadd.f32 %v1613_v17, %v590_v10  ;;  %v719_v18 = vadd.f32 %v1613_v17, %v718_v12  ;;  %v592_v19 = vpop.f32.mrb[11].mxu0  ;;  %v720_v20 = vpop.f32.mrb[11].mxu1 }
 0x12b   :  { %v829_v51 = vld [vmem:[%s2066_s3 + $0x18] sm:$0xff] }
 0x12c   :  { %v861_v53 = vld [vmem:[%s2066_s3 + $0x118] sm:$0xff]  ;;  %v893_v62 = vadd.f32 %v829_v51, %v583_v56  ;;  %v595_v27 = vpop.f32.mrb[12].mxu0  ;;  %v723_v29 = vpop.f32.mrb[12].mxu1 }
 0x12d   :  { %v925_v63 = vadd.f32 %v861_v53, %v711_v57  ;;  %1020 = vst [vmem:[%s2067_s4 + $0x10] sm:$0xff] %v956_v60  ;;  %1052 = vst [vmem:[%s2067_s4 + $0x110] sm:$0xff] %v988_v61  ;;  %v596_v31 = vadd.f32 %v1613_v17, %v595_v27  ;;  %v724_v32 = vadd.f32 %v1613_v17, %v723_v29  ;;  %v597_v33 = vpop.f32.mrb[13].mxu0  ;;  %v725_v34 = vpop.f32.mrb[13].mxu1 }
 0x12e   :  { %v957_v0 = vmax.f32 %v893_v62, 0.0  ;;  %v598_v35 = vpop.f32.mrb[14].mxu0  ;;  %v726_v37 = vpop.f32.mrb[14].mxu1 }
 0x12f   :  { %v989_v1 = vmax.f32 %v925_v63, 0.0  ;;  %v599_v41 = vadd.f32 %v1613_v17, %v598_v35  ;;  %v727_v42 = vadd.f32 %v1613_v17, %v726_v37  ;;  %v600_v43 = vpop.f32.mrb[15].mxu0  ;;  %v728_v44 = vpop.f32.mrb[15].mxu1 }
 0x134   :  { %v830_v3 = vld [vmem:[%s2066_s3 + $0x20] sm:$0xff]  ;;  %v603_v51 = vpop.f32.mrb[16].mxu0  ;;  %v731_v53 = vpop.f32.mrb[16].mxu1 }
 0x135   :  { %v862_v5 = vld [vmem:[%s2066_s3 + $0x120] sm:$0xff]  ;;  %v894_v14 = vadd.f32 %v830_v3, %v588_v6  ;;  %v604_v55 = vadd.f32 %v1613_v17, %v603_v51  ;;  %v732_v56 = vadd.f32 %v1613_v17, %v731_v53  ;;  %v605_v57 = vpop.f32.mrb[17].mxu0  ;;  %v733_v58 = vpop.f32.mrb[17].mxu1 }
 0x136   :  { %1021 = vst [vmem:[%s2067_s4 + $0x18] sm:$0xff] %v957_v0  ;;  %1053 = vst [vmem:[%s2067_s4 + $0x118] sm:$0xff] %v989_v1  ;;  %v926_v15 = vadd.f32 %v862_v5, %v716_v7  ;;  %v606_v59 = vpop.f32.mrb[18].mxu0  ;;  %v734_v61 = vpop.f32.mrb[18].mxu1 }
 0x137   :  { %v958_v21 = vmax.f32 %v894_v14, 0.0  ;;  %v607_v1 = vadd.f32 %v1613_v17, %v606_v59  ;;  %v735_v2 = vadd.f32 %v1613_v17, %v734_v61  ;;  %v608_v3 = vpop.f32.mrb[19].mxu0  ;;  %v736_v4 = vpop.f32.mrb[19].mxu1 }
 0x138   :  { %v990_v22 = vmax.f32 %v926_v15, 0.0 }
 0x13d   :  { %v831_v11 = vld [vmem:[%s2066_s3 + $0x28] sm:$0xff] }
 0x13e   :  { %v863_v13 = vld [vmem:[%s2066_s3 + $0x128] sm:$0xff]  ;;  %v895_v23 = vadd.f32 %v831_v11, %v591_v16  ;;  %v611_v11 = vpop.f32.mrb[20].mxu0 }
 0x13f   :  { %v927_v24 = vadd.f32 %v863_v13, %v719_v18  ;;  %1022 = vst [vmem:[%s2067_s4 + $0x20] sm:$0xff] %v958_v21  ;;  %1054 = vst [vmem:[%s2067_s4 + $0x120] sm:$0xff] %v990_v22  ;;  %v739_v13 = vpop.f32.mrb[20].mxu1  ;;  %v612_v15 = vadd.f32 %v1613_v17, %v611_v11  ;;  %v613_v18 = vpop.f32.mrb[21].mxu0 }
 0x140   :  { %v959_v25 = vmax.f32 %v895_v23, 0.0  ;;  %v740_v16 = vadd.f32 %v1613_v17, %v739_v13  ;;  %v741_v19 = vpop.f32.mrb[21].mxu1  ;;  %v614_v20 = vpop.f32.mrb[22].mxu0 }
 0x141   :  { %v991_v26 = vmax.f32 %v927_v24, 0.0  ;;  %v742_v22 = vpop.f32.mrb[22].mxu1 }
 0x142   :  { %v743_v27 = vadd.f32 %v1613_v17, %v742_v22  ;;  %v744_v29 = vpop.f32.mrb[23].mxu1 }
 0x146   :  { %v832_v28 = vld [vmem:[%s2066_s3 + $0x30] sm:$0xff] }
 0x147   :  { %v864_v30 = vld [vmem:[%s2066_s3 + $0x130] sm:$0xff]  ;;  %v896_v39 = vadd.f32 %v832_v28, %v596_v31  ;;  %v616_v28 = vpop.f32.mrb[23].mxu0 }
 0x148   :  { %1023 = vst [vmem:[%s2067_s4 + $0x28] sm:$0xff] %v959_v25  ;;  %1055 = vst [vmem:[%s2067_s4 + $0x128] sm:$0xff] %v991_v26  ;;  %v928_v40 = vadd.f32 %v864_v30, %v724_v32  ;;  %v615_v26 = vadd.f32 %v1613_v17, %v614_v20 }
 0x149   :  { %v960_v45 = vmax.f32 %v896_v39, 0.0 }
 0x14a   :  { %v992_v46 = vmax.f32 %v928_v40, 0.0 }
 0x14f   :  { %v833_v36 = vld [vmem:[%s2066_s3 + $0x38] sm:$0xff] }
 0x150   :  { %v865_v38 = vld [vmem:[%s2066_s3 + $0x138] sm:$0xff]  ;;  %v897_v47 = vadd.f32 %v833_v36, %v599_v41  ;;  %v619_v36 = vpop.f32.mrb[24].mxu0 }
 0x151   :  { %v929_v48 = vadd.f32 %v865_v38, %v727_v42  ;;  %1024 = vst [vmem:[%s2067_s4 + $0x30] sm:$0xff] %v960_v45  ;;  %1056 = vst [vmem:[%s2067_s4 + $0x130] sm:$0xff] %v992_v46  ;;  %v747_v38 = vpop.f32.mrb[24].mxu1  ;;  %v620_v40 = vadd.f32 %v1613_v17, %v619_v36  ;;  %v621_v42 = vpop.f32.mrb[25].mxu0 }
 0x152   :  { %v961_v49 = vmax.f32 %v897_v47, 0.0  ;;  %v748_v41 = vadd.f32 %v1613_v17, %v747_v38  ;;  %v749_v43 = vpop.f32.mrb[25].mxu1  ;;  %v622_v44 = vpop.f32.mrb[26].mxu0 }
 0x153   :  { %v993_v50 = vmax.f32 %v929_v48, 0.0  ;;  %v750_v46 = vpop.f32.mrb[26].mxu1 }
 0x154   :  { %v751_v51 = vadd.f32 %v1613_v17, %v750_v46  ;;  %v752_v53 = vpop.f32.mrb[27].mxu1 }
 0x158   :  { %v834_v52 = vld [vmem:[%s2066_s3 + $0x40] sm:$0xff] }
 0x159   :  { %v866_v54 = vld [vmem:[%s2066_s3 + $0x140] sm:$0xff]  ;;  %v898_v63 = vadd.f32 %v834_v52, %v604_v55  ;;  %v624_v52 = vpop.f32.mrb[27].mxu0 }
 0x15a   :  { %1025 = vst [vmem:[%s2067_s4 + $0x38] sm:$0xff] %v961_v49  ;;  %1057 = vst [vmem:[%s2067_s4 + $0x138] sm:$0xff] %v993_v50  ;;  %v930_v0 = vadd.f32 %v866_v54, %v732_v56  ;;  %v623_v50 = vadd.f32 %v1613_v17, %v622_v44 }
 0x15b   :  { %v962_v5 = vmax.f32 %v898_v63, 0.0 }
 0x15c   :  { %v994_v6 = vmax.f32 %v930_v0, 0.0 }
 0x161   :  { %v835_v60 = vld [vmem:[%s2066_s3 + $0x48] sm:$0xff] }
 0x162   :  { %v867_v62 = vld [vmem:[%s2066_s3 + $0x148] sm:$0xff]  ;;  %v899_v7 = vadd.f32 %v835_v60, %v607_v1  ;;  %v627_v60 = vpop.f32.mrb[28].mxu0 }
 0x163   :  { %v931_v8 = vadd.f32 %v867_v62, %v735_v2  ;;  %1026 = vst [vmem:[%s2067_s4 + $0x40] sm:$0xff] %v962_v5  ;;  %1058 = vst [vmem:[%s2067_s4 + $0x140] sm:$0xff] %v994_v6  ;;  %v755_v62 = vpop.f32.mrb[28].mxu1  ;;  %v628_v0 = vadd.f32 %v1613_v17, %v627_v60  ;;  %v629_v2 = vpop.f32.mrb[29].mxu0 }
 0x164   :  { %v963_v9 = vmax.f32 %v899_v7, 0.0  ;;  %v756_v1 = vadd.f32 %v1613_v17, %v755_v62  ;;  %v757_v3 = vpop.f32.mrb[29].mxu1  ;;  %v630_v4 = vpop.f32.mrb[30].mxu0 }
 0x165   :  { %v995_v10 = vmax.f32 %v931_v8, 0.0  ;;  %v758_v6 = vpop.f32.mrb[30].mxu1 }
 0x166   :  { %v759_v11 = vadd.f32 %v1613_v17, %v758_v6  ;;  %v760_v13 = vpop.f32.mrb[31].mxu1 }
 0x16a   :  { %v836_v12 = vld [vmem:[%s2066_s3 + $0x50] sm:$0xff] }
 0x16b   :  { %v868_v14 = vld [vmem:[%s2066_s3 + $0x150] sm:$0xff]  ;;  %v900_v24 = vadd.f32 %v836_v12, %v612_v15  ;;  %v632_v12 = vpop.f32.mrb[31].mxu0 }
 0x16c   :  { %1027 = vst [vmem:[%s2067_s4 + $0x48] sm:$0xff] %v963_v9  ;;  %1059 = vst [vmem:[%s2067_s4 + $0x148] sm:$0xff] %v995_v10  ;;  %v932_v25 = vadd.f32 %v868_v14, %v740_v16  ;;  %v631_v10 = vadd.f32 %v1613_v17, %v630_v4 }
 0x16d   :  { %v964_v30 = vmax.f32 %v900_v24, 0.0 }
 0x16e   :  { %v996_v31 = vmax.f32 %v932_v25, 0.0 }
 0x173   :  { %v837_v21 = vld [vmem:[%s2066_s3 + $0x58] sm:$0xff] }
 0x174   :  { %v869_v23 = vld [vmem:[%s2066_s3 + $0x158] sm:$0xff]  ;;  %v901_v32 = vadd.f32 %v837_v21, %v615_v26  ;;  %v635_v21 = vpop.f32.mrb[32].mxu0 }
 0x175   :  { %v933_v33 = vadd.f32 %v869_v23, %v743_v27  ;;  %1028 = vst [vmem:[%s2067_s4 + $0x50] sm:$0xff] %v964_v30  ;;  %1060 = vst [vmem:[%s2067_s4 + $0x150] sm:$0xff] %v996_v31  ;;  %v763_v23 = vpop.f32.mrb[32].mxu1  ;;  %v636_v25 = vadd.f32 %v1613_v17, %v635_v21  ;;  %v637_v27 = vpop.f32.mrb[33].mxu0 }
 0x176   :  { %v965_v34 = vmax.f32 %v901_v32, 0.0  ;;  %v764_v26 = vadd.f32 %v1613_v17, %v763_v23  ;;  %v765_v28 = vpop.f32.mrb[33].mxu1  ;;  %v638_v29 = vpop.f32.mrb[34].mxu0 }
 0x177   :  { %v997_v35 = vmax.f32 %v933_v33, 0.0  ;;  %v766_v31 = vpop.f32.mrb[34].mxu1 }
 0x178   :  { %v767_v36 = vadd.f32 %v1613_v17, %v766_v31  ;;  %v768_v38 = vpop.f32.mrb[35].mxu1 }
 0x17c   :  { %v838_v37 = vld [vmem:[%s2066_s3 + $0x60] sm:$0xff] }
 0x17d   :  { %v870_v39 = vld [vmem:[%s2066_s3 + $0x160] sm:$0xff]  ;;  %v902_v48 = vadd.f32 %v838_v37, %v620_v40  ;;  %v640_v37 = vpop.f32.mrb[35].mxu0 }
 0x17e   :  { %1029 = vst [vmem:[%s2067_s4 + $0x58] sm:$0xff] %v965_v34  ;;  %1061 = vst [vmem:[%s2067_s4 + $0x158] sm:$0xff] %v997_v35  ;;  %v934_v49 = vadd.f32 %v870_v39, %v748_v41  ;;  %v639_v35 = vadd.f32 %v1613_v17, %v638_v29 }
 0x17f   :  { %v966_v54 = vmax.f32 %v902_v48, 0.0 }
 0x180   :  { %v998_v55 = vmax.f32 %v934_v49, 0.0 }
 0x185   :  { %v839_v45 = vld [vmem:[%s2066_s3 + $0x68] sm:$0xff] }
 0x186   :  { %v871_v47 = vld [vmem:[%s2066_s3 + $0x168] sm:$0xff]  ;;  %v903_v56 = vadd.f32 %v839_v45, %v623_v50  ;;  %v643_v45 = vpop.f32.mrb[36].mxu0 }
 0x187   :  { %v935_v57 = vadd.f32 %v871_v47, %v751_v51  ;;  %1030 = vst [vmem:[%s2067_s4 + $0x60] sm:$0xff] %v966_v54  ;;  %1062 = vst [vmem:[%s2067_s4 + $0x160] sm:$0xff] %v998_v55  ;;  %v771_v47 = vpop.f32.mrb[36].mxu1  ;;  %v644_v49 = vadd.f32 %v1613_v17, %v643_v45  ;;  %v645_v51 = vpop.f32.mrb[37].mxu0 }
 0x188   :  { %v967_v58 = vmax.f32 %v903_v56, 0.0  ;;  %v772_v50 = vadd.f32 %v1613_v17, %v771_v47  ;;  %v773_v52 = vpop.f32.mrb[37].mxu1  ;;  %v646_v53 = vpop.f32.mrb[38].mxu0 }
 0x189   :  { %v999_v59 = vmax.f32 %v935_v57, 0.0  ;;  %v774_v55 = vpop.f32.mrb[38].mxu1 }
 0x18a   :  { %v775_v60 = vadd.f32 %v1613_v17, %v774_v55  ;;  %v776_v62 = vpop.f32.mrb[39].mxu1 }
 0x18e   :  { %v840_v61 = vld [vmem:[%s2066_s3 + $0x70] sm:$0xff] }
 0x18f   :  { %v872_v63 = vld [vmem:[%s2066_s3 + $0x170] sm:$0xff]  ;;  %v904_v8 = vadd.f32 %v840_v61, %v628_v0  ;;  %v648_v61 = vpop.f32.mrb[39].mxu0 }
 0x190   :  { %1031 = vst [vmem:[%s2067_s4 + $0x68] sm:$0xff] %v967_v58  ;;  %1063 = vst [vmem:[%s2067_s4 + $0x168] sm:$0xff] %v999_v59  ;;  %v936_v9 = vadd.f32 %v872_v63, %v756_v1  ;;  %v647_v59 = vadd.f32 %v1613_v17, %v646_v53 }
 0x191   :  { %v968_v14 = vmax.f32 %v904_v8, 0.0 }
 0x192   :  { %v1000_v15 = vmax.f32 %v936_v9, 0.0 }
 0x197   :  { %v841_v5 = vld [vmem:[%s2066_s3 + $0x78] sm:$0xff] }
 0x198   :  { %v873_v7 = vld [vmem:[%s2066_s3 + $0x178] sm:$0xff]  ;;  %v905_v16 = vadd.f32 %v841_v5, %v631_v10  ;;  %v651_v5 = vpop.f32.mrb[40].mxu0 }
 0x199   :  { %v937_v18 = vadd.f32 %v873_v7, %v759_v11  ;;  %1032 = vst [vmem:[%s2067_s4 + $0x70] sm:$0xff] %v968_v14  ;;  %1064 = vst [vmem:[%s2067_s4 + $0x170] sm:$0xff] %v1000_v15  ;;  %v779_v7 = vpop.f32.mrb[40].mxu1  ;;  %v652_v9 = vadd.f32 %v1613_v17, %v651_v5  ;;  %v653_v11 = vpop.f32.mrb[41].mxu0 }
 0x19a   :  { %v969_v19 = vmax.f32 %v905_v16, 0.0  ;;  %v780_v10 = vadd.f32 %v1613_v17, %v779_v7  ;;  %v781_v12 = vpop.f32.mrb[41].mxu1  ;;  %v654_v13 = vpop.f32.mrb[42].mxu0 }
 0x19b   :  { %v1001_v20 = vmax.f32 %v937_v18, 0.0  ;;  %v782_v15 = vpop.f32.mrb[42].mxu1 }
 0x19c   :  { %v783_v21 = vadd.f32 %v1613_v17, %v782_v15  ;;  %v784_v23 = vpop.f32.mrb[43].mxu1 }
 0x1a0   :  { %v842_v22 = vld [vmem:[%s2066_s3 + $0x80] sm:$0xff] }
 0x1a1   :  { %v874_v24 = vld [vmem:[%s2066_s3 + $0x180] sm:$0xff]  ;;  %v906_v33 = vadd.f32 %v842_v22, %v636_v25  ;;  %v656_v22 = vpop.f32.mrb[43].mxu0 }
 0x1a2   :  { %1033 = vst [vmem:[%s2067_s4 + $0x78] sm:$0xff] %v969_v19  ;;  %1065 = vst [vmem:[%s2067_s4 + $0x178] sm:$0xff] %v1001_v20  ;;  %v938_v34 = vadd.f32 %v874_v24, %v764_v26  ;;  %v655_v20 = vadd.f32 %v1613_v17, %v654_v13 }
 0x1a3   :  { %v970_v39 = vmax.f32 %v906_v33, 0.0 }
 0x1a4   :  { %v1002_v40 = vmax.f32 %v938_v34, 0.0 }
 0x1a9   :  { %v843_v30 = vld [vmem:[%s2066_s3 + $0x88] sm:$0xff] }
 0x1aa   :  { %v875_v32 = vld [vmem:[%s2066_s3 + $0x188] sm:$0xff]  ;;  %v907_v41 = vadd.f32 %v843_v30, %v639_v35  ;;  %v659_v30 = vpop.f32.mrb[44].mxu0 }
 0x1ab   :  { %v939_v42 = vadd.f32 %v875_v32, %v767_v36  ;;  %1034 = vst [vmem:[%s2067_s4 + $0x80] sm:$0xff] %v970_v39  ;;  %1066 = vst [vmem:[%s2067_s4 + $0x180] sm:$0xff] %v1002_v40  ;;  %v787_v32 = vpop.f32.mrb[44].mxu1  ;;  %v660_v34 = vadd.f32 %v1613_v17, %v659_v30  ;;  %v661_v36 = vpop.f32.mrb[45].mxu0 }
 0x1ac   :  { %v971_v43 = vmax.f32 %v907_v41, 0.0  ;;  %v788_v35 = vadd.f32 %v1613_v17, %v787_v32  ;;  %v789_v37 = vpop.f32.mrb[45].mxu1  ;;  %v662_v38 = vpop.f32.mrb[46].mxu0 }
 0x1ad   :  { %v1003_v44 = vmax.f32 %v939_v42, 0.0  ;;  %v790_v40 = vpop.f32.mrb[46].mxu1 }
 0x1ae   :  { %v791_v45 = vadd.f32 %v1613_v17, %v790_v40  ;;  %v792_v47 = vpop.f32.mrb[47].mxu1 }
 0x1b2   :  { %v844_v46 = vld [vmem:[%s2066_s3 + $0x90] sm:$0xff] }
 0x1b3   :  { %v876_v48 = vld [vmem:[%s2066_s3 + $0x190] sm:$0xff]  ;;  %v908_v57 = vadd.f32 %v844_v46, %v644_v49  ;;  %v664_v46 = vpop.f32.mrb[47].mxu0 }
 0x1b4   :  { %1035 = vst [vmem:[%s2067_s4 + $0x88] sm:$0xff] %v971_v43  ;;  %1067 = vst [vmem:[%s2067_s4 + $0x188] sm:$0xff] %v1003_v44  ;;  %v940_v58 = vadd.f32 %v876_v48, %v772_v50  ;;  %v663_v44 = vadd.f32 %v1613_v17, %v662_v38 }
 0x1b5   :  { %v972_v63 = vmax.f32 %v908_v57, 0.0 }
 0x1b6   :  { %v1004_v0 = vmax.f32 %v940_v58, 0.0 }
 0x1bb   :  { %v845_v54 = vld [vmem:[%s2066_s3 + $0x98] sm:$0xff] }
 0x1bc   :  { %v877_v56 = vld [vmem:[%s2066_s3 + $0x198] sm:$0xff]  ;;  %v909_v1 = vadd.f32 %v845_v54, %v647_v59  ;;  %v667_v54 = vpop.f32.mrb[48].mxu0 }
 0x1bd   :  { %v941_v2 = vadd.f32 %v877_v56, %v775_v60  ;;  %1036 = vst [vmem:[%s2067_s4 + $0x90] sm:$0xff] %v972_v63  ;;  %1068 = vst [vmem:[%s2067_s4 + $0x190] sm:$0xff] %v1004_v0  ;;  %v795_v56 = vpop.f32.mrb[48].mxu1  ;;  %v668_v58 = vadd.f32 %v1613_v17, %v667_v54  ;;  %v669_v60 = vpop.f32.mrb[49].mxu0 }
 0x1be   :  { %v973_v3 = vmax.f32 %v909_v1, 0.0  ;;  %v796_v59 = vadd.f32 %v1613_v17, %v795_v56  ;;  %v797_v61 = vpop.f32.mrb[49].mxu1  ;;  %v670_v62 = vpop.f32.mrb[50].mxu0 }
 0x1bf   :  { %v1005_v4 = vmax.f32 %v941_v2, 0.0  ;;  %v798_v0 = vpop.f32.mrb[50].mxu1 }
 0x1c0   :  { %v799_v5 = vadd.f32 %v1613_v17, %v798_v0  ;;  %v800_v7 = vpop.f32.mrb[51].mxu1 }
 0x1c4   :  { %v846_v6 = vld [vmem:[%s2066_s3 + $0xa0] sm:$0xff] }
 0x1c5   :  { %v878_v8 = vld [vmem:[%s2066_s3 + $0x1a0] sm:$0xff]  ;;  %v910_v18 = vadd.f32 %v846_v6, %v652_v9  ;;  %v672_v6 = vpop.f32.mrb[51].mxu0 }
 0x1c6   :  { %1037 = vst [vmem:[%s2067_s4 + $0x98] sm:$0xff] %v973_v3  ;;  %1069 = vst [vmem:[%s2067_s4 + $0x198] sm:$0xff] %v1005_v4  ;;  %v942_v19 = vadd.f32 %v878_v8, %v780_v10  ;;  %v671_v4 = vadd.f32 %v1613_v17, %v670_v62 }
 0x1c7   :  { %v974_v24 = vmax.f32 %v910_v18, 0.0 }
 0x1c8   :  { %v1006_v25 = vmax.f32 %v942_v19, 0.0 }
 0x1cd   :  { %v847_v14 = vld [vmem:[%s2066_s3 + $0xa8] sm:$0xff] }
 0x1ce   :  { %v879_v16 = vld [vmem:[%s2066_s3 + $0x1a8] sm:$0xff]  ;;  %v911_v26 = vadd.f32 %v847_v14, %v655_v20  ;;  %v675_v14 = vpop.f32.mrb[52].mxu0 }
 0x1cf   :  { %v943_v27 = vadd.f32 %v879_v16, %v783_v21  ;;  %1038 = vst [vmem:[%s2067_s4 + $0xa0] sm:$0xff] %v974_v24  ;;  %1070 = vst [vmem:[%s2067_s4 + $0x1a0] sm:$0xff] %v1006_v25  ;;  %v803_v16 = vpop.f32.mrb[52].mxu1  ;;  %v676_v19 = vadd.f32 %v1613_v17, %v675_v14  ;;  %v677_v21 = vpop.f32.mrb[53].mxu0 }
 0x1d0   :  { %v975_v28 = vmax.f32 %v911_v26, 0.0  ;;  %v804_v20 = vadd.f32 %v1613_v17, %v803_v16  ;;  %v805_v22 = vpop.f32.mrb[53].mxu1  ;;  %v678_v23 = vpop.f32.mrb[54].mxu0 }
 0x1d1   :  { %v1007_v29 = vmax.f32 %v943_v27, 0.0  ;;  %v806_v25 = vpop.f32.mrb[54].mxu1 }
 0x1d2   :  { %v807_v30 = vadd.f32 %v1613_v17, %v806_v25  ;;  %v808_v32 = vpop.f32.mrb[55].mxu1 }
 0x1d6   :  { %v848_v31 = vld [vmem:[%s2066_s3 + $0xb0] sm:$0xff] }
 0x1d7   :  { %v880_v33 = vld [vmem:[%s2066_s3 + $0x1b0] sm:$0xff]  ;;  %v912_v42 = vadd.f32 %v848_v31, %v660_v34  ;;  %v680_v31 = vpop.f32.mrb[55].mxu0 }
 0x1d8   :  { %1039 = vst [vmem:[%s2067_s4 + $0xa8] sm:$0xff] %v975_v28  ;;  %1071 = vst [vmem:[%s2067_s4 + $0x1a8] sm:$0xff] %v1007_v29  ;;  %v944_v43 = vadd.f32 %v880_v33, %v788_v35  ;;  %v679_v29 = vadd.f32 %v1613_v17, %v678_v23 }
 0x1d9   :  { %v976_v48 = vmax.f32 %v912_v42, 0.0 }
 0x1da   :  { %v1008_v49 = vmax.f32 %v944_v43, 0.0 }
 0x1df   :  { %v849_v39 = vld [vmem:[%s2066_s3 + $0xb8] sm:$0xff] }
 0x1e0   :  { %v881_v41 = vld [vmem:[%s2066_s3 + $0x1b8] sm:$0xff]  ;;  %v913_v50 = vadd.f32 %v849_v39, %v663_v44  ;;  %v683_v39 = vpop.f32.mrb[56].mxu0 }
 0x1e1   :  { %v945_v51 = vadd.f32 %v881_v41, %v791_v45  ;;  %1040 = vst [vmem:[%s2067_s4 + $0xb0] sm:$0xff] %v976_v48  ;;  %1072 = vst [vmem:[%s2067_s4 + $0x1b0] sm:$0xff] %v1008_v49  ;;  %v811_v41 = vpop.f32.mrb[56].mxu1  ;;  %v684_v43 = vadd.f32 %v1613_v17, %v683_v39  ;;  %v685_v45 = vpop.f32.mrb[57].mxu0 }
 0x1e2   :  { %v977_v52 = vmax.f32 %v913_v50, 0.0  ;;  %v812_v44 = vadd.f32 %v1613_v17, %v811_v41  ;;  %v813_v46 = vpop.f32.mrb[57].mxu1  ;;  %v686_v47 = vpop.f32.mrb[58].mxu0 }
 0x1e3   :  { %v1009_v53 = vmax.f32 %v945_v51, 0.0  ;;  %v814_v49 = vpop.f32.mrb[58].mxu1 }
 0x1e4   :  { %v815_v54 = vadd.f32 %v1613_v17, %v814_v49  ;;  %v816_v56 = vpop.f32.mrb[59].mxu1 }
 0x1e8   :  { %v850_v55 = vld [vmem:[%s2066_s3 + $0xc0] sm:$0xff] }
 0x1e9   :  { %v882_v57 = vld [vmem:[%s2066_s3 + $0x1c0] sm:$0xff]  ;;  %v914_v2 = vadd.f32 %v850_v55, %v668_v58  ;;  %v688_v55 = vpop.f32.mrb[59].mxu0 }
 0x1ea   :  { %1041 = vst [vmem:[%s2067_s4 + $0xb8] sm:$0xff] %v977_v52  ;;  %1073 = vst [vmem:[%s2067_s4 + $0x1b8] sm:$0xff] %v1009_v53  ;;  %v946_v3 = vadd.f32 %v882_v57, %v796_v59  ;;  %v687_v53 = vadd.f32 %v1613_v17, %v686_v47 }
 0x1eb   :  { %v978_v8 = vmax.f32 %v914_v2, 0.0 }
 0x1ec   :  { %v1010_v9 = vmax.f32 %v946_v3, 0.0 }
 0x1f1   :  { %v851_v63 = vld [vmem:[%s2066_s3 + $0xc8] sm:$0xff] }
 0x1f2   :  { %v883_v1 = vld [vmem:[%s2066_s3 + $0x1c8] sm:$0xff]  ;;  %v915_v10 = vadd.f32 %v851_v63, %v671_v4  ;;  %v691_v63 = vpop.f32.mrb[60].mxu0 }
 0x1f3   :  { %v947_v11 = vadd.f32 %v883_v1, %v799_v5  ;;  %1042 = vst [vmem:[%s2067_s4 + $0xc0] sm:$0xff] %v978_v8  ;;  %1074 = vst [vmem:[%s2067_s4 + $0x1c0] sm:$0xff] %v1010_v9  ;;  %v819_v1 = vpop.f32.mrb[60].mxu1  ;;  %v692_v3 = vadd.f32 %v1613_v17, %v691_v63  ;;  %v693_v5 = vpop.f32.mrb[61].mxu0 }
 0x1f4   :  { %v979_v12 = vmax.f32 %v915_v10, 0.0  ;;  %v820_v4 = vadd.f32 %v1613_v17, %v819_v1  ;;  %v821_v6 = vpop.f32.mrb[61].mxu1  ;;  %v694_v7 = vpop.f32.mrb[62].mxu0 }
 0x1f5   :  { %v1011_v13 = vmax.f32 %v947_v11, 0.0  ;;  %v822_v9 = vpop.f32.mrb[62].mxu1 }
 0x1f6   :  { %v823_v14 = vadd.f32 %v1613_v17, %v822_v9  ;;  %v824_v16 = vpop.f32.mrb[63].mxu1 }
 0x1fa   :  { %v852_v15 = vld [vmem:[%s2066_s3 + $0xd0] sm:$0xff] }
 0x1fb   :  { %v884_v18 = vld [vmem:[%s2066_s3 + $0x1d0] sm:$0xff]  ;;  %v916_v27 = vadd.f32 %v852_v15, %v676_v19  ;;  %v696_v15 = vpop.f32.mrb[63].mxu0 }
 0x1fc   :  { %1043 = vst [vmem:[%s2067_s4 + $0xc8] sm:$0xff] %v979_v12  ;;  %1075 = vst [vmem:[%s2067_s4 + $0x1c8] sm:$0xff] %v1011_v13  ;;  %v948_v28 = vadd.f32 %v884_v18, %v804_v20  ;;  %v695_v13 = vadd.f32 %v1613_v17, %v694_v7 }
 0x1fd   :  { %v980_v33 = vmax.f32 %v916_v27, 0.0 }
 0x1fe   :  { %v1012_v34 = vmax.f32 %v948_v28, 0.0 }
 0x203   :  { %v853_v24 = vld [vmem:[%s2066_s3 + $0xd8] sm:$0xff] }
 0x204   :  { %v885_v26 = vld [vmem:[%s2066_s3 + $0x1d8] sm:$0xff]  ;;  %v917_v35 = vadd.f32 %v853_v24, %v679_v29 }
 0x205   :  { %v949_v36 = vadd.f32 %v885_v26, %v807_v30  ;;  %1044 = vst [vmem:[%s2067_s4 + $0xd0] sm:$0xff] %v980_v33  ;;  %1076 = vst [vmem:[%s2067_s4 + $0x1d0] sm:$0xff] %v1012_v34 }
 0x206   :  { %v981_v37 = vmax.f32 %v917_v35, 0.0 }
 0x207   :  { %v1013_v38 = vmax.f32 %v949_v36, 0.0 }
 0x20c   :  { %v854_v40 = vld [vmem:[%s2066_s3 + $0xe0] sm:$0xff] }
 0x20d   :  { %v886_v42 = vld [vmem:[%s2066_s3 + $0x1e0] sm:$0xff]  ;;  %v918_v51 = vadd.f32 %v854_v40, %v684_v43 }
 0x20e   :  { %1045 = vst [vmem:[%s2067_s4 + $0xd8] sm:$0xff] %v981_v37  ;;  %1077 = vst [vmem:[%s2067_s4 + $0x1d8] sm:$0xff] %v1013_v38  ;;  %v950_v52 = vadd.f32 %v886_v42, %v812_v44 }
 0x20f   :  { %v982_v57 = vmax.f32 %v918_v51, 0.0 }
 0x210   :  { %v1014_v58 = vmax.f32 %v950_v52, 0.0 }
 0x215   :  { %v855_v48 = vld [vmem:[%s2066_s3 + $0xe8] sm:$0xff] }
 0x216   :  { %v887_v50 = vld [vmem:[%s2066_s3 + $0x1e8] sm:$0xff]  ;;  %v919_v59 = vadd.f32 %v855_v48, %v687_v53 }
 0x217   :  { %v951_v60 = vadd.f32 %v887_v50, %v815_v54  ;;  %1046 = vst [vmem:[%s2067_s4 + $0xe0] sm:$0xff] %v982_v57  ;;  %1078 = vst [vmem:[%s2067_s4 + $0x1e0] sm:$0xff] %v1014_v58 }
 0x218   :  { %v983_v61 = vmax.f32 %v919_v59, 0.0 }
 0x219   :  { %v1015_v62 = vmax.f32 %v951_v60, 0.0 }
 0x21e   :  { %v856_v0 = vld [vmem:[%s2066_s3 + $0xf0] sm:$0xff] }
 0x21f   :  { %v888_v2 = vld [vmem:[%s2066_s3 + $0x1f0] sm:$0xff]  ;;  %v920_v11 = vadd.f32 %v856_v0, %v692_v3 }
 0x220   :  { %1047 = vst [vmem:[%s2067_s4 + $0xe8] sm:$0xff] %v983_v61  ;;  %1079 = vst [vmem:[%s2067_s4 + $0x1e8] sm:$0xff] %v1015_v62  ;;  %v952_v12 = vadd.f32 %v888_v2, %v820_v4 }
 0x221   :  { %v984_v18 = vmax.f32 %v920_v11, 0.0 }
 0x222   :  { %v1016_v19 = vmax.f32 %v952_v12, 0.0 }
 0x227   :  { %v857_v8 = vld [vmem:[%s2066_s3 + $0xf8] sm:$0xff] }
 0x228   :  { %v889_v10 = vld [vmem:[%s2066_s3 + $0x1f8] sm:$0xff]  ;;  %v921_v20 = vadd.f32 %v857_v8, %v695_v13 }
 0x229   :  { %v953_v21 = vadd.f32 %v889_v10, %v823_v14  ;;  %1048 = vst [vmem:[%s2067_s4 + $0xf0] sm:$0xff] %v984_v18  ;;  %1080 = vst [vmem:[%s2067_s4 + $0x1f0] sm:$0xff] %v1016_v19 }
 0x22a   :  { %v985_v22 = vmax.f32 %v921_v20, 0.0 }
 0x22b   :  { %v1017_v23 = vmax.f32 %v953_v21, 0.0 }
 0x22c   :  { %1049 = vst [vmem:[%s2067_s4 + $0xf8] sm:$0xff] %v985_v22 }
 0x22d   :  { %1081 = vst [vmem:[%s2067_s4 + $0x1f8] sm:$0xff] %v1017_v23 }

// kernel: _lambda_.18
= control target key start
LH: loop header
LB: loop body
LE: loop exit
PB: predicated region body
PF: predicated region fallthrough
CT: control target
= control target key end

     0   :  { %v1181_v0 = vmov 0   ;;  %s1735_s1 = inlined_call_operand.vmem [shape: bf16[256,128], index: 1, kind: input, shape index: {}]   ;;  %s1736_s0 = inlined_call_operand.vmem [shape: bf16[512,256], index: 0, kind: input, shape index: {}]   ;;  %s1737_s2 = inlined_call_operand.vmem [shape: f32[1,128], index: 2, kind: input, shape index: {}]   ;;  %s1738_s3 = inlined_call_operand.vmem [shape: f32[512,128], index: 3, kind: output, shape index: {}]  }
   0x1   :  { %534 = vmatprep.subr.bf16.mxu0 %v1181_v0  ;;  %1036 = vmatprep.subr.bf16.mxu1 %v1181_v0  ;;  %v1069_v1 = vld [vmem:[%s1735_s1] sm:$0xff]   ;;  %v1070_v2 = vld [vmem:[%s1735_s1 + $0x8] sm:$0xff]   ;;  %v1071_v3 = vld [vmem:[%s1735_s1 + $0x10] sm:$0xff]  }
   0x2   :  { %535 = vmatpush1.bf16.msra.mxu0 %v1069_v1  ;;  %1052 = vmatpush1.bf16.msra.mxu1 %v1069_v1  ;;  %v1072_v4 = vld [vmem:[%s1735_s1 + $0x18] sm:$0xff]   ;;  %v1073_v5 = vld [vmem:[%s1735_s1 + $0x20] sm:$0xff]   ;;  %v1074_v7 = vld [vmem:[%s1735_s1 + $0x28] sm:$0xff]  }
   0x3   :  { %536 = vmatprep.subr.bf16.mxu0 %v1181_v0  ;;  %1037 = vmatprep.subr.bf16.mxu1 %v1181_v0  ;;  %v1087_v6 = vld [vmem:[%s1736_s0 + $0x4] ss:$8 sps:$4 sm:$0xff]   ;;  %v1075_v9 = vld [vmem:[%s1735_s1 + $0x30] sm:$0xff]   ;;  %v1076_v10 = vld [vmem:[%s1735_s1 + $0x38] sm:$0xff]  }
   0x4   :  { %v1090_v8 = vld [vmem:[%s1736_s0 + $0x104] ss:$8 sps:$4 sm:$0xff]   ;;  %566 = vmatprep.mubr.bf16.mxu0 %v1087_v6  ;;  %v1079_v13 = vld [vmem:[%s1735_s1 + $0x50] sm:$0xff]   ;;  %v1080_v14 = vld [vmem:[%s1735_s1 + $0x58] sm:$0xff]  }
   0x5   :  { %694 = vmatprep.mubr.bf16.mxu1 %v1090_v8  ;;  %v1077_v11 = vld [vmem:[%s1735_s1 + $0x40] sm:$0xff]   ;;  %v1078_v12 = vld [vmem:[%s1735_s1 + $0x48] sm:$0xff]   ;;  %v1083_v17 = vld [vmem:[%s1735_s1 + $0x70] sm:$0xff]  }
   0x6   :  { %537 = vmatpush1.bf16.msra.mxu0 %v1070_v2  ;;  %1053 = vmatpush1.bf16.msra.mxu1 %v1070_v2  ;;  %v1081_v15 = vld [vmem:[%s1735_s1 + $0x60] sm:$0xff]   ;;  %v1082_v16 = vld [vmem:[%s1735_s1 + $0x68] sm:$0xff]   ;;  %v1084_v18 = vld [vmem:[%s1735_s1 + $0x78] sm:$0xff]  }
   0x7   :  { %538 = vmatprep.subr.bf16.mxu0 %v1181_v0  ;;  %1038 = vmatprep.subr.bf16.mxu1 %v1181_v0  ;;  %v1085_v19 = vld [vmem:[%s1736_s0] ss:$8 sps:$4 sm:$0xff]   ;;  %v1091_v21 = vld [vmem:[%s1736_s0 + $0x14] ss:$8 sps:$4 sm:$0xff]   ;;  %v1095_v23 = vld [vmem:[%s1736_s0 + $0x10] ss:$8 sps:$4 sm:$0xff]  }
   0x8   :  { %v1088_v20 = vld [vmem:[%s1736_s0 + $0x100] ss:$8 sps:$4 sm:$0xff]   ;;  %v1093_v22 = vld [vmem:[%s1736_s0 + $0x114] ss:$8 sps:$4 sm:$0xff]   ;;  %v1096_v24 = vld [vmem:[%s1736_s0 + $0x110] ss:$8 sps:$4 sm:$0xff]  }
   0x9   :  { %v1097_v25 = vld [vmem:[%s1736_s0 + $0x24] ss:$8 sps:$4 sm:$0xff]   ;;  %v1101_v27 = vld [vmem:[%s1736_s0 + $0x20] ss:$8 sps:$4 sm:$0xff]   ;;  %v1103_v29 = vld [vmem:[%s1736_s0 + $0x34] ss:$8 sps:$4 sm:$0xff]  }
   0xa   :  { %539 = vmatpush1.bf16.msra.mxu0 %v1071_v3  ;;  %1054 = vmatpush1.bf16.msra.mxu1 %v1071_v3  ;;  %v1099_v26 = vld [vmem:[%s1736_s0 + $0x124] ss:$8 sps:$4 sm:$0xff]   ;;  %v1102_v28 = vld [vmem:[%s1736_s0 + $0x120] ss:$8 sps:$4 sm:$0xff]   ;;  %v1105_v30 = vld [vmem:[%s1736_s0 + $0x134] ss:$8 sps:$4 sm:$0xff]  }
   0xb   :  { %540 = vmatprep.subr.bf16.mxu0 %v1181_v0  ;;  %1039 = vmatprep.subr.bf16.mxu1 %v1181_v0  ;;  %v1107_v31 = vld [vmem:[%s1736_s0 + $0x30] ss:$8 sps:$4 sm:$0xff]   ;;  %v1109_v33 = vld [vmem:[%s1736_s0 + $0x44] ss:$8 sps:$4 sm:$0xff]   ;;  %v1113_v35 = vld [vmem:[%s1736_s0 + $0x40] ss:$8 sps:$4 sm:$0xff]  }
   0xc   :  { %v1108_v32 = vld [vmem:[%s1736_s0 + $0x130] ss:$8 sps:$4 sm:$0xff]   ;;  %v1111_v34 = vld [vmem:[%s1736_s0 + $0x144] ss:$8 sps:$4 sm:$0xff]   ;;  %v1114_v36 = vld [vmem:[%s1736_s0 + $0x140] ss:$8 sps:$4 sm:$0xff]  }
   0xd   :  { %v1115_v37 = vld [vmem:[%s1736_s0 + $0x54] ss:$8 sps:$4 sm:$0xff]   ;;  %v1119_v39 = vld [vmem:[%s1736_s0 + $0x50] ss:$8 sps:$4 sm:$0xff]   ;;  %v1121_v41 = vld [vmem:[%s1736_s0 + $0x64] ss:$8 sps:$4 sm:$0xff]  }
   0xe   :  { %541 = vmatpush1.bf16.msra.mxu0 %v1072_v4  ;;  %1055 = vmatpush1.bf16.msra.mxu1 %v1072_v4  ;;  %v1117_v38 = vld [vmem:[%s1736_s0 + $0x154] ss:$8 sps:$4 sm:$0xff]   ;;  %v1120_v40 = vld [vmem:[%s1736_s0 + $0x150] ss:$8 sps:$4 sm:$0xff]   ;;  %v1123_v42 = vld [vmem:[%s1736_s0 + $0x164] ss:$8 sps:$4 sm:$0xff]  }
   0xf   :  { %542 = vmatprep.subr.bf16.mxu0 %v1181_v0  ;;  %1040 = vmatprep.subr.bf16.mxu1 %v1181_v0  ;;  %v1125_v43 = vld [vmem:[%s1736_s0 + $0x60] ss:$8 sps:$4 sm:$0xff]   ;;  %v1127_v45 = vld [vmem:[%s1736_s0 + $0x74] ss:$8 sps:$4 sm:$0xff]   ;;  %v1131_v47 = vld [vmem:[%s1736_s0 + $0x70] ss:$8 sps:$4 sm:$0xff]  }
  0x10   :  { %v1126_v44 = vld [vmem:[%s1736_s0 + $0x160] ss:$8 sps:$4 sm:$0xff]   ;;  %v1129_v46 = vld [vmem:[%s1736_s0 + $0x174] ss:$8 sps:$4 sm:$0xff]   ;;  %v1132_v48 = vld [vmem:[%s1736_s0 + $0x170] ss:$8 sps:$4 sm:$0xff]  }
  0x11   :  { %v1133_v49 = vld [vmem:[%s1736_s0 + $0x84] ss:$8 sps:$4 sm:$0xff]   ;;  %v1137_v51 = vld [vmem:[%s1736_s0 + $0x80] ss:$8 sps:$4 sm:$0xff]   ;;  %v1139_v53 = vld [vmem:[%s1736_s0 + $0x94] ss:$8 sps:$4 sm:$0xff]  }
  0x12   :  { %543 = vmatpush1.bf16.msra.mxu0 %v1073_v5  ;;  %1056 = vmatpush1.bf16.msra.mxu1 %v1073_v5  ;;  %v1135_v50 = vld [vmem:[%s1736_s0 + $0x184] ss:$8 sps:$4 sm:$0xff]   ;;  %v1138_v52 = vld [vmem:[%s1736_s0 + $0x180] ss:$8 sps:$4 sm:$0xff]   ;;  %v1141_v54 = vld [vmem:[%s1736_s0 + $0x194] ss:$8 sps:$4 sm:$0xff]  }
  0x13   :  { %544 = vmatprep.subr.bf16.mxu0 %v1181_v0  ;;  %1041 = vmatprep.subr.bf16.mxu1 %v1181_v0  ;;  %v1143_v55 = vld [vmem:[%s1736_s0 + $0x90] ss:$8 sps:$4 sm:$0xff]   ;;  %v1145_v57 = vld [vmem:[%s1736_s0 + $0xa4] ss:$8 sps:$4 sm:$0xff]   ;;  %v1149_v59 = vld [vmem:[%s1736_s0 + $0xa0] ss:$8 sps:$4 sm:$0xff]  }
  0x14   :  { %v1144_v56 = vld [vmem:[%s1736_s0 + $0x190] ss:$8 sps:$4 sm:$0xff]   ;;  %v1147_v58 = vld [vmem:[%s1736_s0 + $0x1a4] ss:$8 sps:$4 sm:$0xff]   ;;  %v1150_v60 = vld [vmem:[%s1736_s0 + $0x1a0] ss:$8 sps:$4 sm:$0xff]  }
  0x15   :  { %v1151_v61 = vld [vmem:[%s1736_s0 + $0xb4] ss:$8 sps:$4 sm:$0xff]   ;;  %v1155_v63 = vld [vmem:[%s1736_s0 + $0xb0] ss:$8 sps:$4 sm:$0xff]   ;;  %v1157_v1 = vld [vmem:[%s1736_s0 + $0xc4] ss:$8 sps:$4 sm:$0xff]  }
  0x16   :  { %545 = vmatpush1.bf16.msra.mxu0 %v1074_v7  ;;  %1057 = vmatpush1.bf16.msra.mxu1 %v1074_v7  ;;  %v1153_v62 = vld [vmem:[%s1736_s0 + $0x1b4] ss:$8 sps:$4 sm:$0xff]   ;;  %v1159_v2 = vld [vmem:[%s1736_s0 + $0x1c4] ss:$8 sps:$4 sm:$0xff]   ;;  %v1161_v3 = vld [vmem:[%s1736_s0 + $0xc0] ss:$8 sps:$4 sm:$0xff]  }
  0x17   :  { %546 = vmatprep.subr.bf16.mxu0 %v1181_v0  ;;  %1042 = vmatprep.subr.bf16.mxu1 %v1181_v0  ;;  %v1162_v4 = vld [vmem:[%s1736_s0 + $0x1c0] ss:$8 sps:$4 sm:$0xff]   ;;  %v1163_v5 = vld [vmem:[%s1736_s0 + $0xd4] ss:$8 sps:$4 sm:$0xff]   ;;  %v1167_v7 = vld [vmem:[%s1736_s0 + $0xd0] ss:$8 sps:$4 sm:$0xff]  }
  0x18   :  { %v1165_v6 = vld [vmem:[%s1736_s0 + $0x1d4] ss:$8 sps:$4 sm:$0xff]   ;;  %v1168_v8 = vld [vmem:[%s1736_s0 + $0x1d0] ss:$8 sps:$4 sm:$0xff]  }
  0x1a   :  { %547 = vmatpush1.bf16.msra.mxu0 %v1075_v9  ;;  %1058 = vmatpush1.bf16.msra.mxu1 %v1075_v9  ;;  %v1169_v9 = vld [vmem:[%s1736_s0 + $0xe4] ss:$8 sps:$4 sm:$0xff]  }
  0x1b   :  { %548 = vmatprep.subr.bf16.mxu0 %v1181_v0  ;;  %1043 = vmatprep.subr.bf16.mxu1 %v1181_v0 }
  0x1e   :  { %549 = vmatpush1.bf16.msra.mxu0 %v1076_v10  ;;  %1059 = vmatpush1.bf16.msra.mxu1 %v1076_v10  ;;  %v1171_v10 = vld [vmem:[%s1736_s0 + $0x1e4] ss:$8 sps:$4 sm:$0xff]  }
  0x1f   :  { %550 = vmatprep.subr.bf16.mxu0 %v1181_v0  ;;  %1044 = vmatprep.subr.bf16.mxu1 %v1181_v0 }
  0x22   :  { %551 = vmatpush1.bf16.msra.mxu0 %v1077_v11  ;;  %1060 = vmatpush1.bf16.msra.mxu1 %v1077_v11  ;;  %v1173_v11 = vld [vmem:[%s1736_s0 + $0xe0] ss:$8 sps:$4 sm:$0xff]  }
  0x23   :  { %552 = vmatprep.subr.bf16.mxu0 %v1181_v0  ;;  %1045 = vmatprep.subr.bf16.mxu1 %v1181_v0 }
  0x26   :  { %553 = vmatpush1.bf16.msra.mxu0 %v1078_v12  ;;  %1061 = vmatpush1.bf16.msra.mxu1 %v1078_v12  ;;  %v1174_v12 = vld [vmem:[%s1736_s0 + $0x1e0] ss:$8 sps:$4 sm:$0xff]  }
  0x27   :  { %554 = vmatprep.subr.bf16.mxu0 %v1181_v0  ;;  %1046 = vmatprep.subr.bf16.mxu1 %v1181_v0 }
  0x2a   :  { %555 = vmatpush1.bf16.msra.mxu0 %v1079_v13  ;;  %1062 = vmatpush1.bf16.msra.mxu1 %v1079_v13  ;;  %v1175_v13 = vld [vmem:[%s1736_s0 + $0xf4] ss:$8 sps:$4 sm:$0xff]  }
  0x2b   :  { %556 = vmatprep.subr.bf16.mxu0 %v1181_v0  ;;  %1047 = vmatprep.subr.bf16.mxu1 %v1181_v0 }
  0x2e   :  { %557 = vmatpush1.bf16.msra.mxu0 %v1080_v14  ;;  %1063 = vmatpush1.bf16.msra.mxu1 %v1080_v14  ;;  %v1177_v14 = vld [vmem:[%s1736_s0 + $0x1f4] ss:$8 sps:$4 sm:$0xff]  }
  0x2f   :  { %558 = vmatprep.subr.bf16.mxu0 %v1181_v0  ;;  %1048 = vmatprep.subr.bf16.mxu1 %v1181_v0 }
  0x32   :  { %559 = vmatpush1.bf16.msra.mxu0 %v1081_v15  ;;  %1064 = vmatpush1.bf16.msra.mxu1 %v1081_v15  ;;  %v1179_v15 = vld [vmem:[%s1736_s0 + $0xf0] ss:$8 sps:$4 sm:$0xff]  }
  0x33   :  { %560 = vmatprep.subr.bf16.mxu0 %v1181_v0  ;;  %1049 = vmatprep.subr.bf16.mxu1 %v1181_v0 }
  0x36   :  { %561 = vmatpush1.bf16.msra.mxu0 %v1082_v16  ;;  %1065 = vmatpush1.bf16.msra.mxu1 %v1082_v16  ;;  %v1180_v16 = vld [vmem:[%s1736_s0 + $0x1f0] ss:$8 sps:$4 sm:$0xff]  }
  0x37   :  { %562 = vmatprep.subr.bf16.mxu0 %v1181_v0  ;;  %1050 = vmatprep.subr.bf16.mxu1 %v1181_v0 }
  0x3a   :  { %563 = vmatpush1.bf16.msra.mxu0 %v1083_v17  ;;  %1066 = vmatpush1.bf16.msra.mxu1 %v1083_v17  ;;  %v1477_v17 = vld [vmem:[%s1737_s2] ss:$0 sm:$0xff] }
  0x3b   :  { %564 = vmatprep.subr.bf16.mxu0 %v1181_v0  ;;  %1051 = vmatprep.subr.bf16.mxu1 %v1181_v0  ;;  %v1156_v0 = vld [vmem:[%s1736_s0 + $0x1b0] ss:$8 sps:$4 sm:$0xff]  }
  0x3e   :  { %565 = vmatpush1.bf16.msra.mxu0 %v1084_v18  ;;  %1067 = vmatpush1.bf16.msra.mxu1 %v1084_v18 }
  0x41   :  { %567 = vmatmul.mubr.bf16.vlgmr.msra.gmra.mrb[0].mxu0 %v1085_v19  ;;  %695 = vmatmul.mubr.bf16.vlgmr.msra.gmra.mrb[0].mxu1 %v1088_v20 }
  0x42   :  { %574 = vmatprep.mubr.bf16.mxu0 %v1091_v21  ;;  %702 = vmatprep.mubr.bf16.mxu1 %v1093_v22 }
  0x49   :  { %575 = vmatmul.mubr.bf16.gmra.mrb[4].mxu0 %v1095_v23  ;;  %703 = vmatmul.mubr.bf16.gmra.mrb[4].mxu1 %v1096_v24 }
  0x4a   :  { %582 = vmatprep.mubr.bf16.mxu0 %v1097_v25  ;;  %710 = vmatprep.mubr.bf16.mxu1 %v1099_v26 }
  0x51   :  { %583 = vmatmul.mubr.bf16.gmra.mrb[8].mxu0 %v1101_v27  ;;  %711 = vmatmul.mubr.bf16.gmra.mrb[8].mxu1 %v1102_v28 }
  0x52   :  { %590 = vmatprep.mubr.bf16.mxu0 %v1103_v29  ;;  %718 = vmatprep.mubr.bf16.mxu1 %v1105_v30 }
  0x59   :  { %591 = vmatmul.mubr.bf16.gmra.mrb[12].mxu0 %v1107_v31  ;;  %719 = vmatmul.mubr.bf16.gmra.mrb[12].mxu1 %v1108_v32 }
  0x5a   :  { %598 = vmatprep.mubr.bf16.mxu0 %v1109_v33  ;;  %726 = vmatprep.mubr.bf16.mxu1 %v1111_v34 }
  0x61   :  { %599 = vmatmul.mubr.bf16.gmra.mrb[16].mxu0 %v1113_v35  ;;  %727 = vmatmul.mubr.bf16.gmra.mrb[16].mxu1 %v1114_v36 }
  0x62   :  { %606 = vmatprep.mubr.bf16.mxu0 %v1115_v37  ;;  %734 = vmatprep.mubr.bf16.mxu1 %v1117_v38 }
  0x69   :  { %607 = vmatmul.mubr.bf16.gmra.mrb[20].mxu0 %v1119_v39  ;;  %735 = vmatmul.mubr.bf16.gmra.mrb[20].mxu1 %v1120_v40 }
  0x6a   :  { %614 = vmatprep.mubr.bf16.mxu0 %v1121_v41  ;;  %742 = vmatprep.mubr.bf16.mxu1 %v1123_v42 }
  0x71   :  { %615 = vmatmul.mubr.bf16.gmra.mrb[24].mxu0 %v1125_v43  ;;  %743 = vmatmul.mubr.bf16.gmra.mrb[24].mxu1 %v1126_v44 }
  0x72   :  { %622 = vmatprep.mubr.bf16.mxu0 %v1127_v45  ;;  %750 = vmatprep.mubr.bf16.mxu1 %v1129_v46 }
  0x79   :  { %623 = vmatmul.mubr.bf16.gmra.mrb[28].mxu0 %v1131_v47  ;;  %751 = vmatmul.mubr.bf16.gmra.mrb[28].mxu1 %v1132_v48 }
  0x7a   :  { %630 = vmatprep.mubr.bf16.mxu0 %v1133_v49  ;;  %758 = vmatprep.mubr.bf16.mxu1 %v1135_v50 }
  0x81   :  { %631 = vmatmul.mubr.bf16.gmra.mrb[32].mxu0 %v1137_v51  ;;  %759 = vmatmul.mubr.bf16.gmra.mrb[32].mxu1 %v1138_v52 }
  0x82   :  { %638 = vmatprep.mubr.bf16.mxu0 %v1139_v53  ;;  %766 = vmatprep.mubr.bf16.mxu1 %v1141_v54 }
  0x89   :  { %639 = vmatmul.mubr.bf16.gmra.mrb[36].mxu0 %v1143_v55  ;;  %767 = vmatmul.mubr.bf16.gmra.mrb[36].mxu1 %v1144_v56 }
  0x8a   :  { %646 = vmatprep.mubr.bf16.mxu0 %v1145_v57  ;;  %774 = vmatprep.mubr.bf16.mxu1 %v1147_v58 }
  0x91   :  { %647 = vmatmul.mubr.bf16.gmra.mrb[40].mxu0 %v1149_v59  ;;  %775 = vmatmul.mubr.bf16.gmra.mrb[40].mxu1 %v1150_v60 }
  0x92   :  { %654 = vmatprep.mubr.bf16.mxu0 %v1151_v61  ;;  %782 = vmatprep.mubr.bf16.mxu1 %v1153_v62 }
  0x99   :  { %655 = vmatmul.mubr.bf16.gmra.mrb[44].mxu0 %v1155_v63  ;;  %783 = vmatmul.mubr.bf16.gmra.mrb[44].mxu1 %v1156_v0 }
  0x9a   :  { %662 = vmatprep.mubr.bf16.mxu0 %v1157_v1  ;;  %790 = vmatprep.mubr.bf16.mxu1 %v1159_v2 }
  0xa1   :  { %663 = vmatmul.mubr.bf16.gmra.mrb[48].mxu0 %v1161_v3  ;;  %791 = vmatmul.mubr.bf16.gmra.mrb[48].mxu1 %v1162_v4 }
  0xa2   :  { %670 = vmatprep.mubr.bf16.mxu0 %v1163_v5  ;;  %798 = vmatprep.mubr.bf16.mxu1 %v1165_v6 }
  0xa9   :  { %671 = vmatmul.mubr.bf16.gmra.mrb[52].mxu0 %v1167_v7  ;;  %799 = vmatmul.mubr.bf16.gmra.mrb[52].mxu1 %v1168_v8 }
  0xaa   :  { %678 = vmatprep.mubr.bf16.mxu0 %v1169_v9  ;;  %806 = vmatprep.mubr.bf16.mxu1 %v1171_v10 }
  0xb1   :  { %679 = vmatmul.mubr.bf16.gmra.mrb[56].mxu0 %v1173_v11  ;;  %807 = vmatmul.mubr.bf16.gmra.mrb[56].mxu1 %v1174_v12 }
  0xb2   :  { %686 = vmatprep.mubr.bf16.mxu0 %v1175_v13  ;;  %814 = vmatprep.mubr.bf16.mxu1 %v1177_v14 }
  0xb9   :  { %687 = vmatmul.mubr.bf16.gmra.mrb[60].mxu0 %v1179_v15  ;;  %815 = vmatmul.mubr.bf16.gmra.mrb[60].mxu1 %v1180_v16 }
 0x114   :  { %v568_v18 = vpop.f32.mrb[0].mxu0  ;;  %v696_v19 = vpop.f32.mrb[0].mxu1 }
 0x115   :  { %v569_v20 = vadd.f32 %v1477_v17, %v568_v18  ;;  %v697_v21 = vadd.f32 %v1477_v17, %v696_v19  ;;  %v570_v22 = vpop.f32.mrb[1].mxu0  ;;  %v698_v23 = vpop.f32.mrb[1].mxu1 }
 0x116   :  { %v571_v24 = vpop.f32.mrb[2].mxu0  ;;  %v699_v25 = vpop.f32.mrb[2].mxu1 }
 0x117   :  { %v823_v26 = vmax.f32 %v569_v20, 0.0  ;;  %v855_v27 = vmax.f32 %v697_v21, 0.0  ;;  %v572_v28 = vadd.f32 %v1477_v17, %v571_v24  ;;  %v700_v29 = vadd.f32 %v1477_v17, %v699_v25  ;;  %v573_v30 = vpop.f32.mrb[3].mxu0  ;;  %v701_v31 = vpop.f32.mrb[3].mxu1 }
 0x119   :  { %887 = vst [vmem:[%s1738_s3] sm:$0xff] %v823_v26  ;;  %919 = vst [vmem:[%s1738_s3 + $0x100] sm:$0xff] %v855_v27  ;;  %v824_v32 = vmax.f32 %v572_v28, 0.0  ;;  %v856_v33 = vmax.f32 %v700_v29, 0.0 }
 0x11b   :  { %888 = vst [vmem:[%s1738_s3 + $0x8] sm:$0xff] %v824_v32  ;;  %920 = vst [vmem:[%s1738_s3 + $0x108] sm:$0xff] %v856_v33 }
 0x11c   :  { %v576_v34 = vpop.f32.mrb[4].mxu0  ;;  %v704_v35 = vpop.f32.mrb[4].mxu1 }
 0x11d   :  { %v577_v36 = vadd.f32 %v1477_v17, %v576_v34  ;;  %v705_v37 = vadd.f32 %v1477_v17, %v704_v35  ;;  %v578_v38 = vpop.f32.mrb[5].mxu0  ;;  %v706_v39 = vpop.f32.mrb[5].mxu1 }
 0x11e   :  { %v579_v40 = vpop.f32.mrb[6].mxu0  ;;  %v707_v41 = vpop.f32.mrb[6].mxu1 }
 0x11f   :  { %v825_v42 = vmax.f32 %v577_v36, 0.0  ;;  %v857_v43 = vmax.f32 %v705_v37, 0.0  ;;  %v580_v44 = vadd.f32 %v1477_v17, %v579_v40  ;;  %v708_v45 = vadd.f32 %v1477_v17, %v707_v41  ;;  %v581_v46 = vpop.f32.mrb[7].mxu0  ;;  %v709_v47 = vpop.f32.mrb[7].mxu1 }
 0x121   :  { %889 = vst [vmem:[%s1738_s3 + $0x10] sm:$0xff] %v825_v42  ;;  %921 = vst [vmem:[%s1738_s3 + $0x110] sm:$0xff] %v857_v43  ;;  %v826_v48 = vmax.f32 %v580_v44, 0.0  ;;  %v858_v49 = vmax.f32 %v708_v45, 0.0 }
 0x123   :  { %890 = vst [vmem:[%s1738_s3 + $0x18] sm:$0xff] %v826_v48  ;;  %922 = vst [vmem:[%s1738_s3 + $0x118] sm:$0xff] %v858_v49 }
 0x124   :  { %v584_v50 = vpop.f32.mrb[8].mxu0  ;;  %v712_v51 = vpop.f32.mrb[8].mxu1 }
 0x125   :  { %v585_v52 = vadd.f32 %v1477_v17, %v584_v50  ;;  %v713_v53 = vadd.f32 %v1477_v17, %v712_v51  ;;  %v586_v54 = vpop.f32.mrb[9].mxu0  ;;  %v714_v55 = vpop.f32.mrb[9].mxu1 }
 0x126   :  { %v587_v56 = vpop.f32.mrb[10].mxu0  ;;  %v715_v57 = vpop.f32.mrb[10].mxu1 }
 0x127   :  { %v827_v58 = vmax.f32 %v585_v52, 0.0  ;;  %v859_v59 = vmax.f32 %v713_v53, 0.0  ;;  %v588_v60 = vadd.f32 %v1477_v17, %v587_v56  ;;  %v716_v61 = vadd.f32 %v1477_v17, %v715_v57  ;;  %v589_v62 = vpop.f32.mrb[11].mxu0  ;;  %v717_v63 = vpop.f32.mrb[11].mxu1 }
 0x129   :  { %891 = vst [vmem:[%s1738_s3 + $0x20] sm:$0xff] %v827_v58  ;;  %923 = vst [vmem:[%s1738_s3 + $0x120] sm:$0xff] %v859_v59  ;;  %v828_v0 = vmax.f32 %v588_v60, 0.0  ;;  %v860_v1 = vmax.f32 %v716_v61, 0.0 }
 0x12b   :  { %892 = vst [vmem:[%s1738_s3 + $0x28] sm:$0xff] %v828_v0  ;;  %924 = vst [vmem:[%s1738_s3 + $0x128] sm:$0xff] %v860_v1 }
 0x12c   :  { %v592_v2 = vpop.f32.mrb[12].mxu0  ;;  %v720_v3 = vpop.f32.mrb[12].mxu1 }
 0x12d   :  { %v593_v4 = vadd.f32 %v1477_v17, %v592_v2  ;;  %v721_v5 = vadd.f32 %v1477_v17, %v720_v3  ;;  %v594_v6 = vpop.f32.mrb[13].mxu0  ;;  %v722_v7 = vpop.f32.mrb[13].mxu1 }
 0x12e   :  { %v595_v8 = vpop.f32.mrb[14].mxu0  ;;  %v723_v9 = vpop.f32.mrb[14].mxu1 }
 0x12f   :  { %v829_v10 = vmax.f32 %v593_v4, 0.0  ;;  %v861_v11 = vmax.f32 %v721_v5, 0.0  ;;  %v596_v12 = vadd.f32 %v1477_v17, %v595_v8  ;;  %v724_v13 = vadd.f32 %v1477_v17, %v723_v9  ;;  %v597_v14 = vpop.f32.mrb[15].mxu0  ;;  %v725_v15 = vpop.f32.mrb[15].mxu1 }
 0x131   :  { %893 = vst [vmem:[%s1738_s3 + $0x30] sm:$0xff] %v829_v10  ;;  %925 = vst [vmem:[%s1738_s3 + $0x130] sm:$0xff] %v861_v11  ;;  %v830_v16 = vmax.f32 %v596_v12, 0.0  ;;  %v862_v18 = vmax.f32 %v724_v13, 0.0 }
 0x133   :  { %894 = vst [vmem:[%s1738_s3 + $0x38] sm:$0xff] %v830_v16  ;;  %926 = vst [vmem:[%s1738_s3 + $0x138] sm:$0xff] %v862_v18 }
 0x134   :  { %v600_v19 = vpop.f32.mrb[16].mxu0  ;;  %v728_v20 = vpop.f32.mrb[16].mxu1 }
 0x135   :  { %v601_v21 = vadd.f32 %v1477_v17, %v600_v19  ;;  %v729_v22 = vadd.f32 %v1477_v17, %v728_v20  ;;  %v602_v23 = vpop.f32.mrb[17].mxu0  ;;  %v730_v24 = vpop.f32.mrb[17].mxu1 }
 0x136   :  { %v603_v25 = vpop.f32.mrb[18].mxu0  ;;  %v731_v26 = vpop.f32.mrb[18].mxu1 }
 0x137   :  { %v831_v27 = vmax.f32 %v601_v21, 0.0  ;;  %v863_v28 = vmax.f32 %v729_v22, 0.0  ;;  %v604_v29 = vadd.f32 %v1477_v17, %v603_v25  ;;  %v732_v30 = vadd.f32 %v1477_v17, %v731_v26  ;;  %v605_v31 = vpop.f32.mrb[19].mxu0  ;;  %v733_v32 = vpop.f32.mrb[19].mxu1 }
 0x139   :  { %895 = vst [vmem:[%s1738_s3 + $0x40] sm:$0xff] %v831_v27  ;;  %927 = vst [vmem:[%s1738_s3 + $0x140] sm:$0xff] %v863_v28  ;;  %v832_v33 = vmax.f32 %v604_v29, 0.0  ;;  %v864_v34 = vmax.f32 %v732_v30, 0.0 }
 0x13b   :  { %896 = vst [vmem:[%s1738_s3 + $0x48] sm:$0xff] %v832_v33  ;;  %928 = vst [vmem:[%s1738_s3 + $0x148] sm:$0xff] %v864_v34 }
 0x13c   :  { %v608_v35 = vpop.f32.mrb[20].mxu0  ;;  %v736_v36 = vpop.f32.mrb[20].mxu1 }
 0x13d   :  { %v609_v37 = vadd.f32 %v1477_v17, %v608_v35  ;;  %v737_v38 = vadd.f32 %v1477_v17, %v736_v36  ;;  %v610_v39 = vpop.f32.mrb[21].mxu0  ;;  %v738_v40 = vpop.f32.mrb[21].mxu1 }
 0x13e   :  { %v611_v41 = vpop.f32.mrb[22].mxu0  ;;  %v739_v42 = vpop.f32.mrb[22].mxu1 }
 0x13f   :  { %v833_v43 = vmax.f32 %v609_v37, 0.0  ;;  %v865_v44 = vmax.f32 %v737_v38, 0.0  ;;  %v612_v45 = vadd.f32 %v1477_v17, %v611_v41  ;;  %v740_v46 = vadd.f32 %v1477_v17, %v739_v42  ;;  %v613_v47 = vpop.f32.mrb[23].mxu0  ;;  %v741_v48 = vpop.f32.mrb[23].mxu1 }
 0x141   :  { %897 = vst [vmem:[%s1738_s3 + $0x50] sm:$0xff] %v833_v43  ;;  %929 = vst [vmem:[%s1738_s3 + $0x150] sm:$0xff] %v865_v44  ;;  %v834_v49 = vmax.f32 %v612_v45, 0.0  ;;  %v866_v50 = vmax.f32 %v740_v46, 0.0 }
 0x143   :  { %898 = vst [vmem:[%s1738_s3 + $0x58] sm:$0xff] %v834_v49  ;;  %930 = vst [vmem:[%s1738_s3 + $0x158] sm:$0xff] %v866_v50 }
 0x144   :  { %v616_v51 = vpop.f32.mrb[24].mxu0  ;;  %v744_v52 = vpop.f32.mrb[24].mxu1 }
 0x145   :  { %v617_v53 = vadd.f32 %v1477_v17, %v616_v51  ;;  %v745_v54 = vadd.f32 %v1477_v17, %v744_v52  ;;  %v618_v55 = vpop.f32.mrb[25].mxu0  ;;  %v746_v56 = vpop.f32.mrb[25].mxu1 }
 0x146   :  { %v619_v57 = vpop.f32.mrb[26].mxu0  ;;  %v747_v58 = vpop.f32.mrb[26].mxu1 }
 0x147   :  { %v835_v59 = vmax.f32 %v617_v53, 0.0  ;;  %v867_v60 = vmax.f32 %v745_v54, 0.0  ;;  %v620_v61 = vadd.f32 %v1477_v17, %v619_v57  ;;  %v748_v62 = vadd.f32 %v1477_v17, %v747_v58  ;;  %v621_v63 = vpop.f32.mrb[27].mxu0  ;;  %v749_v0 = vpop.f32.mrb[27].mxu1 }
 0x149   :  { %899 = vst [vmem:[%s1738_s3 + $0x60] sm:$0xff] %v835_v59  ;;  %931 = vst [vmem:[%s1738_s3 + $0x160] sm:$0xff] %v867_v60  ;;  %v836_v1 = vmax.f32 %v620_v61, 0.0  ;;  %v868_v2 = vmax.f32 %v748_v62, 0.0 }
 0x14b   :  { %900 = vst [vmem:[%s1738_s3 + $0x68] sm:$0xff] %v836_v1  ;;  %932 = vst [vmem:[%s1738_s3 + $0x168] sm:$0xff] %v868_v2 }
 0x14c   :  { %v624_v3 = vpop.f32.mrb[28].mxu0  ;;  %v752_v4 = vpop.f32.mrb[28].mxu1 }
 0x14d   :  { %v625_v5 = vadd.f32 %v1477_v17, %v624_v3  ;;  %v753_v6 = vadd.f32 %v1477_v17, %v752_v4  ;;  %v626_v7 = vpop.f32.mrb[29].mxu0  ;;  %v754_v8 = vpop.f32.mrb[29].mxu1 }
 0x14e   :  { %v627_v9 = vpop.f32.mrb[30].mxu0  ;;  %v755_v10 = vpop.f32.mrb[30].mxu1 }
 0x14f   :  { %v837_v11 = vmax.f32 %v625_v5, 0.0  ;;  %v869_v12 = vmax.f32 %v753_v6, 0.0  ;;  %v628_v13 = vadd.f32 %v1477_v17, %v627_v9  ;;  %v756_v14 = vadd.f32 %v1477_v17, %v755_v10  ;;  %v629_v15 = vpop.f32.mrb[31].mxu0  ;;  %v757_v16 = vpop.f32.mrb[31].mxu1 }
 0x151   :  { %901 = vst [vmem:[%s1738_s3 + $0x70] sm:$0xff] %v837_v11  ;;  %933 = vst [vmem:[%s1738_s3 + $0x170] sm:$0xff] %v869_v12  ;;  %v838_v18 = vmax.f32 %v628_v13, 0.0  ;;  %v870_v19 = vmax.f32 %v756_v14, 0.0 }
 0x153   :  { %902 = vst [vmem:[%s1738_s3 + $0x78] sm:$0xff] %v838_v18  ;;  %934 = vst [vmem:[%s1738_s3 + $0x178] sm:$0xff] %v870_v19 }
 0x154   :  { %v632_v20 = vpop.f32.mrb[32].mxu0  ;;  %v760_v21 = vpop.f32.mrb[32].mxu1 }
 0x155   :  { %v633_v22 = vadd.f32 %v1477_v17, %v632_v20  ;;  %v761_v23 = vadd.f32 %v1477_v17, %v760_v21  ;;  %v634_v24 = vpop.f32.mrb[33].mxu0  ;;  %v762_v25 = vpop.f32.mrb[33].mxu1 }
 0x156   :  { %v635_v26 = vpop.f32.mrb[34].mxu0  ;;  %v763_v27 = vpop.f32.mrb[34].mxu1 }
 0x157   :  { %v839_v28 = vmax.f32 %v633_v22, 0.0  ;;  %v871_v29 = vmax.f32 %v761_v23, 0.0  ;;  %v636_v30 = vadd.f32 %v1477_v17, %v635_v26  ;;  %v764_v31 = vadd.f32 %v1477_v17, %v763_v27  ;;  %v637_v32 = vpop.f32.mrb[35].mxu0  ;;  %v765_v33 = vpop.f32.mrb[35].mxu1 }
 0x159   :  { %903 = vst [vmem:[%s1738_s3 + $0x80] sm:$0xff] %v839_v28  ;;  %935 = vst [vmem:[%s1738_s3 + $0x180] sm:$0xff] %v871_v29  ;;  %v840_v34 = vmax.f32 %v636_v30, 0.0  ;;  %v872_v35 = vmax.f32 %v764_v31, 0.0 }
 0x15b   :  { %904 = vst [vmem:[%s1738_s3 + $0x88] sm:$0xff] %v840_v34  ;;  %936 = vst [vmem:[%s1738_s3 + $0x188] sm:$0xff] %v872_v35 }
 0x15c   :  { %v640_v36 = vpop.f32.mrb[36].mxu0  ;;  %v768_v37 = vpop.f32.mrb[36].mxu1 }
 0x15d   :  { %v641_v38 = vadd.f32 %v1477_v17, %v640_v36  ;;  %v769_v39 = vadd.f32 %v1477_v17, %v768_v37  ;;  %v642_v40 = vpop.f32.mrb[37].mxu0  ;;  %v770_v41 = vpop.f32.mrb[37].mxu1 }
 0x15e   :  { %v643_v42 = vpop.f32.mrb[38].mxu0  ;;  %v771_v43 = vpop.f32.mrb[38].mxu1 }
 0x15f   :  { %v841_v44 = vmax.f32 %v641_v38, 0.0  ;;  %v873_v45 = vmax.f32 %v769_v39, 0.0  ;;  %v644_v46 = vadd.f32 %v1477_v17, %v643_v42  ;;  %v772_v47 = vadd.f32 %v1477_v17, %v771_v43  ;;  %v645_v48 = vpop.f32.mrb[39].mxu0  ;;  %v773_v49 = vpop.f32.mrb[39].mxu1 }
 0x161   :  { %905 = vst [vmem:[%s1738_s3 + $0x90] sm:$0xff] %v841_v44  ;;  %937 = vst [vmem:[%s1738_s3 + $0x190] sm:$0xff] %v873_v45  ;;  %v842_v50 = vmax.f32 %v644_v46, 0.0  ;;  %v874_v51 = vmax.f32 %v772_v47, 0.0 }
 0x163   :  { %906 = vst [vmem:[%s1738_s3 + $0x98] sm:$0xff] %v842_v50  ;;  %938 = vst [vmem:[%s1738_s3 + $0x198] sm:$0xff] %v874_v51 }
 0x164   :  { %v648_v52 = vpop.f32.mrb[40].mxu0  ;;  %v776_v53 = vpop.f32.mrb[40].mxu1 }
 0x165   :  { %v649_v54 = vadd.f32 %v1477_v17, %v648_v52  ;;  %v777_v55 = vadd.f32 %v1477_v17, %v776_v53  ;;  %v650_v56 = vpop.f32.mrb[41].mxu0  ;;  %v778_v57 = vpop.f32.mrb[41].mxu1 }
 0x166   :  { %v651_v58 = vpop.f32.mrb[42].mxu0  ;;  %v779_v59 = vpop.f32.mrb[42].mxu1 }
 0x167   :  { %v843_v60 = vmax.f32 %v649_v54, 0.0  ;;  %v875_v61 = vmax.f32 %v777_v55, 0.0  ;;  %v652_v62 = vadd.f32 %v1477_v17, %v651_v58  ;;  %v780_v63 = vadd.f32 %v1477_v17, %v779_v59  ;;  %v653_v0 = vpop.f32.mrb[43].mxu0  ;;  %v781_v1 = vpop.f32.mrb[43].mxu1 }
 0x169   :  { %907 = vst [vmem:[%s1738_s3 + $0xa0] sm:$0xff] %v843_v60  ;;  %939 = vst [vmem:[%s1738_s3 + $0x1a0] sm:$0xff] %v875_v61  ;;  %v844_v2 = vmax.f32 %v652_v62, 0.0  ;;  %v876_v3 = vmax.f32 %v780_v63, 0.0 }
 0x16b   :  { %908 = vst [vmem:[%s1738_s3 + $0xa8] sm:$0xff] %v844_v2  ;;  %940 = vst [vmem:[%s1738_s3 + $0x1a8] sm:$0xff] %v876_v3 }
 0x16c   :  { %v656_v4 = vpop.f32.mrb[44].mxu0  ;;  %v784_v5 = vpop.f32.mrb[44].mxu1 }
 0x16d   :  { %v657_v6 = vadd.f32 %v1477_v17, %v656_v4  ;;  %v785_v7 = vadd.f32 %v1477_v17, %v784_v5  ;;  %v658_v8 = vpop.f32.mrb[45].mxu0  ;;  %v786_v9 = vpop.f32.mrb[45].mxu1 }
 0x16e   :  { %v659_v10 = vpop.f32.mrb[46].mxu0  ;;  %v787_v11 = vpop.f32.mrb[46].mxu1 }
 0x16f   :  { %v845_v12 = vmax.f32 %v657_v6, 0.0  ;;  %v877_v13 = vmax.f32 %v785_v7, 0.0  ;;  %v660_v14 = vadd.f32 %v1477_v17, %v659_v10  ;;  %v788_v15 = vadd.f32 %v1477_v17, %v787_v11  ;;  %v661_v16 = vpop.f32.mrb[47].mxu0  ;;  %v789_v18 = vpop.f32.mrb[47].mxu1 }
 0x171   :  { %909 = vst [vmem:[%s1738_s3 + $0xb0] sm:$0xff] %v845_v12  ;;  %941 = vst [vmem:[%s1738_s3 + $0x1b0] sm:$0xff] %v877_v13  ;;  %v846_v19 = vmax.f32 %v660_v14, 0.0  ;;  %v878_v20 = vmax.f32 %v788_v15, 0.0 }
 0x173   :  { %910 = vst [vmem:[%s1738_s3 + $0xb8] sm:$0xff] %v846_v19  ;;  %942 = vst [vmem:[%s1738_s3 + $0x1b8] sm:$0xff] %v878_v20 }
 0x174   :  { %v664_v21 = vpop.f32.mrb[48].mxu0  ;;  %v792_v22 = vpop.f32.mrb[48].mxu1 }
 0x175   :  { %v665_v23 = vadd.f32 %v1477_v17, %v664_v21  ;;  %v793_v24 = vadd.f32 %v1477_v17, %v792_v22  ;;  %v666_v25 = vpop.f32.mrb[49].mxu0  ;;  %v794_v26 = vpop.f32.mrb[49].mxu1 }
 0x176   :  { %v667_v27 = vpop.f32.mrb[50].mxu0  ;;  %v795_v28 = vpop.f32.mrb[50].mxu1 }
 0x177   :  { %v847_v29 = vmax.f32 %v665_v23, 0.0  ;;  %v879_v30 = vmax.f32 %v793_v24, 0.0  ;;  %v668_v31 = vadd.f32 %v1477_v17, %v667_v27  ;;  %v796_v32 = vadd.f32 %v1477_v17, %v795_v28  ;;  %v669_v33 = vpop.f32.mrb[51].mxu0  ;;  %v797_v34 = vpop.f32.mrb[51].mxu1 }
 0x179   :  { %911 = vst [vmem:[%s1738_s3 + $0xc0] sm:$0xff] %v847_v29  ;;  %943 = vst [vmem:[%s1738_s3 + $0x1c0] sm:$0xff] %v879_v30  ;;  %v848_v35 = vmax.f32 %v668_v31, 0.0  ;;  %v880_v36 = vmax.f32 %v796_v32, 0.0 }
 0x17b   :  { %912 = vst [vmem:[%s1738_s3 + $0xc8] sm:$0xff] %v848_v35  ;;  %944 = vst [vmem:[%s1738_s3 + $0x1c8] sm:$0xff] %v880_v36 }
 0x17c   :  { %v672_v37 = vpop.f32.mrb[52].mxu0  ;;  %v800_v38 = vpop.f32.mrb[52].mxu1 }
 0x17d   :  { %v673_v39 = vadd.f32 %v1477_v17, %v672_v37  ;;  %v801_v40 = vadd.f32 %v1477_v17, %v800_v38  ;;  %v674_v41 = vpop.f32.mrb[53].mxu0  ;;  %v802_v42 = vpop.f32.mrb[53].mxu1 }
 0x17e   :  { %v675_v43 = vpop.f32.mrb[54].mxu0  ;;  %v803_v44 = vpop.f32.mrb[54].mxu1 }
 0x17f   :  { %v849_v45 = vmax.f32 %v673_v39, 0.0  ;;  %v881_v46 = vmax.f32 %v801_v40, 0.0  ;;  %v676_v47 = vadd.f32 %v1477_v17, %v675_v43  ;;  %v804_v48 = vadd.f32 %v1477_v17, %v803_v44  ;;  %v677_v49 = vpop.f32.mrb[55].mxu0  ;;  %v805_v50 = vpop.f32.mrb[55].mxu1 }
 0x181   :  { %913 = vst [vmem:[%s1738_s3 + $0xd0] sm:$0xff] %v849_v45  ;;  %945 = vst [vmem:[%s1738_s3 + $0x1d0] sm:$0xff] %v881_v46  ;;  %v850_v51 = vmax.f32 %v676_v47, 0.0  ;;  %v882_v52 = vmax.f32 %v804_v48, 0.0 }
 0x183   :  { %914 = vst [vmem:[%s1738_s3 + $0xd8] sm:$0xff] %v850_v51  ;;  %946 = vst [vmem:[%s1738_s3 + $0x1d8] sm:$0xff] %v882_v52 }
 0x184   :  { %v680_v53 = vpop.f32.mrb[56].mxu0  ;;  %v808_v54 = vpop.f32.mrb[56].mxu1 }
 0x185   :  { %v681_v55 = vadd.f32 %v1477_v17, %v680_v53  ;;  %v809_v56 = vadd.f32 %v1477_v17, %v808_v54  ;;  %v682_v57 = vpop.f32.mrb[57].mxu0  ;;  %v810_v58 = vpop.f32.mrb[57].mxu1 }
 0x186   :  { %v683_v59 = vpop.f32.mrb[58].mxu0  ;;  %v811_v60 = vpop.f32.mrb[58].mxu1 }
 0x187   :  { %v851_v61 = vmax.f32 %v681_v55, 0.0  ;;  %v883_v62 = vmax.f32 %v809_v56, 0.0  ;;  %v684_v63 = vadd.f32 %v1477_v17, %v683_v59  ;;  %v812_v0 = vadd.f32 %v1477_v17, %v811_v60  ;;  %v685_v1 = vpop.f32.mrb[59].mxu0  ;;  %v813_v2 = vpop.f32.mrb[59].mxu1 }
 0x189   :  { %915 = vst [vmem:[%s1738_s3 + $0xe0] sm:$0xff] %v851_v61  ;;  %947 = vst [vmem:[%s1738_s3 + $0x1e0] sm:$0xff] %v883_v62  ;;  %v852_v3 = vmax.f32 %v684_v63, 0.0  ;;  %v884_v4 = vmax.f32 %v812_v0, 0.0 }
 0x18b   :  { %916 = vst [vmem:[%s1738_s3 + $0xe8] sm:$0xff] %v852_v3  ;;  %948 = vst [vmem:[%s1738_s3 + $0x1e8] sm:$0xff] %v884_v4 }
 0x18c   :  { %v688_v5 = vpop.f32.mrb[60].mxu0  ;;  %v816_v6 = vpop.f32.mrb[60].mxu1 }
 0x18d   :  { %v689_v7 = vadd.f32 %v1477_v17, %v688_v5  ;;  %v817_v8 = vadd.f32 %v1477_v17, %v816_v6  ;;  %v690_v9 = vpop.f32.mrb[61].mxu0  ;;  %v818_v10 = vpop.f32.mrb[61].mxu1 }
 0x18e   :  { %v691_v11 = vpop.f32.mrb[62].mxu0  ;;  %v819_v12 = vpop.f32.mrb[62].mxu1 }
 0x18f   :  { %v853_v13 = vmax.f32 %v689_v7, 0.0  ;;  %v885_v14 = vmax.f32 %v817_v8, 0.0  ;;  %v692_v15 = vadd.f32 %v1477_v17, %v691_v11  ;;  %v820_v16 = vadd.f32 %v1477_v17, %v819_v12  ;;  %v693_v18 = vpop.f32.mrb[63].mxu0  ;;  %v821_v19 = vpop.f32.mrb[63].mxu1 }
 0x191   :  { %917 = vst [vmem:[%s1738_s3 + $0xf0] sm:$0xff] %v853_v13  ;;  %949 = vst [vmem:[%s1738_s3 + $0x1f0] sm:$0xff] %v885_v14  ;;  %v854_v20 = vmax.f32 %v692_v15, 0.0  ;;  %v886_v21 = vmax.f32 %v820_v16, 0.0 }
 0x193   :  { %918 = vst [vmem:[%s1738_s3 + $0xf8] sm:$0xff] %v854_v20  ;;  %950 = vst [vmem:[%s1738_s3 + $0x1f8] sm:$0xff] %v886_v21 }

// kernel: _lambda_.21
= control target key start
LH: loop header
LB: loop body
LE: loop exit
PB: predicated region body
PF: predicated region fallthrough
CT: control target
= control target key end

     0   :  { %s511_s1 = inlined_call_operand.vmem [shape: bf16[256,128], index: 1, kind: input, shape index: {}]   ;;  %s512_s0 = inlined_call_operand.vmem [shape: bf16[64,256], index: 0, kind: input, shape index: {}]   ;;  %s513_s2 = inlined_call_operand.vmem [shape: f32[1,128], index: 2, kind: input, shape index: {}]   ;;  %s514_s3 = inlined_call_operand.vmem [shape: f32[64,128], index: 3, kind: output, shape index: {}]  }
   0x1   :  { %v364_v0 = vld [vmem:[%s511_s1 + $0x40] sm:$0xff]   ;;  %v366_v2 = vld [vmem:[%s511_s1 + $0x48] sm:$0xff]   ;;  %v368_v4 = vld [vmem:[%s511_s1 + $0x50] sm:$0xff]  }
   0x2   :  { %v365_v1 = vld [vmem:[%s511_s1] sm:$0xff]   ;;  %308 = vmatprep.subr.bf16.mxu0 %v364_v0  ;;  %348 = vmatprep.subr.bf16.mxu1 %v364_v0  ;;  %v367_v3 = vld [vmem:[%s511_s1 + $0x8] sm:$0xff]   ;;  %v369_v5 = vld [vmem:[%s511_s1 + $0x10] sm:$0xff]  }
   0x3   :  { %309 = vmatpush3.bf16.msra.mxu0 %v365_v1  ;;  %356 = vmatpush3.bf16.msra.mxu1 %v365_v1  ;;  %v370_v6 = vld [vmem:[%s511_s1 + $0x58] sm:$0xff]   ;;  %v372_v8 = vld [vmem:[%s511_s1 + $0x60] sm:$0xff]   ;;  %v374_v10 = vld [vmem:[%s511_s1 + $0x68] sm:$0xff]  }
   0x4   :  { %310 = vmatprep.subr.bf16.mxu0 %v366_v2  ;;  %349 = vmatprep.subr.bf16.mxu1 %v366_v2  ;;  %v371_v7 = vld [vmem:[%s511_s1 + $0x18] sm:$0xff]   ;;  %v373_v9 = vld [vmem:[%s511_s1 + $0x20] sm:$0xff]   ;;  %v375_v13 = vld [vmem:[%s511_s1 + $0x28] sm:$0xff]  }
   0x5   :  { %v382_v11 = vld [vmem:[%s512_s0 + $0x4] ss:$8 sps:$4 sm:$0xff]   ;;  %v376_v14 = vld [vmem:[%s511_s1 + $0x70] sm:$0xff]   ;;  %v378_v16 = vld [vmem:[%s511_s1 + $0x78] sm:$0xff]  }
   0x6   :  { %v385_v12 = vld [vmem:[%s512_s0 + $0x24] ss:$8 sps:$4 sm:$0xff]   ;;  %230 = vmatprep.mubr.bf16.mxu0 %v382_v11  ;;  %v377_v15 = vld [vmem:[%s511_s1 + $0x30] sm:$0xff]   ;;  %v379_v17 = vld [vmem:[%s511_s1 + $0x38] sm:$0xff]  }
   0x7   :  { %311 = vmatpush3.bf16.msra.mxu0 %v367_v3  ;;  %357 = vmatpush3.bf16.msra.mxu1 %v367_v3  ;;  %v380_v18 = vld [vmem:[%s512_s0] ss:$8 sps:$4 sm:$0xff]   ;;  %v386_v20 = vld [vmem:[%s512_s0 + $0x14] ss:$8 sps:$4 sm:$0xff]   ;;  %v390_v22 = vld [vmem:[%s512_s0 + $0x10] ss:$8 sps:$4 sm:$0xff]  }
   0x8   :  { %312 = vmatprep.subr.bf16.mxu0 %v368_v4  ;;  %350 = vmatprep.subr.bf16.mxu1 %v368_v4  ;;  %v383_v19 = vld [vmem:[%s512_s0 + $0x20] ss:$8 sps:$4 sm:$0xff]   ;;  %v388_v21 = vld [vmem:[%s512_s0 + $0x34] ss:$8 sps:$4 sm:$0xff]   ;;  %v391_v23 = vld [vmem:[%s512_s0 + $0x30] ss:$8 sps:$4 sm:$0xff]  }
   0x9   :  { %246 = vmatprep.mubr.bf16.mxu1 %v385_v12  ;;  %v283_v26 = vld [vmem:[%s513_s2] ss:$0 sm:$0xff] }
   0xb   :  { %313 = vmatpush3.bf16.msra.mxu0 %v369_v5  ;;  %358 = vmatpush3.bf16.msra.mxu1 %v369_v5 }
   0xc   :  { %314 = vmatprep.subr.bf16.mxu0 %v370_v6  ;;  %351 = vmatprep.subr.bf16.mxu1 %v370_v6 }
   0xf   :  { %315 = vmatpush3.bf16.msra.mxu0 %v371_v7  ;;  %359 = vmatpush3.bf16.msra.mxu1 %v371_v7 }
  0x10   :  { %316 = vmatprep.subr.bf16.mxu0 %v372_v8  ;;  %352 = vmatprep.subr.bf16.mxu1 %v372_v8 }
  0x13   :  { %317 = vmatpush3.bf16.msra.mxu0 %v373_v9  ;;  %360 = vmatpush3.bf16.msra.mxu1 %v373_v9 }
  0x14   :  { %318 = vmatprep.subr.bf16.mxu0 %v374_v10  ;;  %353 = vmatprep.subr.bf16.mxu1 %v374_v10 }
  0x17   :  { %319 = vmatpush3.bf16.msra.mxu0 %v375_v13  ;;  %361 = vmatpush3.bf16.msra.mxu1 %v375_v13 }
  0x18   :  { %320 = vmatprep.subr.bf16.mxu0 %v376_v14  ;;  %354 = vmatprep.subr.bf16.mxu1 %v376_v14 }
  0x1b   :  { %321 = vmatpush3.bf16.msra.mxu0 %v377_v15  ;;  %362 = vmatpush3.bf16.msra.mxu1 %v377_v15 }
  0x1c   :  { %322 = vmatprep.subr.bf16.mxu0 %v378_v16  ;;  %355 = vmatprep.subr.bf16.mxu1 %v378_v16 }
  0x1f   :  { %323 = vmatpush3.bf16.msra.mxu0 %v379_v17  ;;  %363 = vmatpush3.bf16.msra.mxu1 %v379_v17 }
  0x22   :  { %231 = vmatmul.mubr.bf16.vlgmr.msra.gmra.mrb[0].mxu0 %v380_v18  ;;  %247 = vmatmul.mubr.bf16.vlgmr.msra.gmra.mrb[0].mxu1 %v383_v19 }
  0x23   :  { %238 = vmatprep.mubr.bf16.mxu0 %v386_v20  ;;  %254 = vmatprep.mubr.bf16.mxu1 %v388_v21 }
  0x2a   :  { %239 = vmatmul.mubr.bf16.gmra.mrb[4].mxu0 %v390_v22  ;;  %255 = vmatmul.mubr.bf16.gmra.mrb[4].mxu1 %v391_v23 }
  0xf5   :  { %v324_v24 = vpop.f32.mrb[0].mxu0  ;;  %v336_v25 = vpop.f32.mrb[0].mxu1 }
  0xf6   :  { %v325_v27 = vpop.f32.mrb[1].mxu0  ;;  %v337_v28 = vpop.f32.mrb[1].mxu1 }
  0xf7   :  { %v326_v29 = vadd.f32 %v325_v27, %v324_v24  ;;  %v338_v30 = vadd.f32 %v337_v28, %v336_v25  ;;  %v327_v31 = vpop.f32.mrb[2].mxu0  ;;  %v339_v32 = vpop.f32.mrb[2].mxu1 }
  0xf8   :  { %v328_v33 = vpop.f32.mrb[3].mxu0  ;;  %v340_v34 = vpop.f32.mrb[3].mxu1 }
  0xf9   :  { %v233_v35 = vadd.f32 %v326_v29, %v283_v26  ;;  %v249_v36 = vadd.f32 %v338_v30, %v283_v26  ;;  %v329_v37 = vadd.f32 %v328_v33, %v327_v31  ;;  %v341_v38 = vadd.f32 %v340_v34, %v339_v32 }
  0xfb   :  { %v263_v39 = vmax.f32 %v233_v35, 0.0  ;;  %v267_v40 = vmax.f32 %v249_v36, 0.0  ;;  %v236_v41 = vadd.f32 %v329_v37, %v283_v26  ;;  %v252_v42 = vadd.f32 %v341_v38, %v283_v26 }
  0xfd   :  { %271 = vst [vmem:[%s514_s3] sm:$0xff] %v263_v39  ;;  %275 = vst [vmem:[%s514_s3 + $0x20] sm:$0xff] %v267_v40  ;;  %v264_v43 = vmax.f32 %v236_v41, 0.0  ;;  %v268_v44 = vmax.f32 %v252_v42, 0.0  ;;  %v330_v45 = vpop.f32.mrb[4].mxu0  ;;  %v342_v46 = vpop.f32.mrb[4].mxu1 }
  0xfe   :  { %v331_v47 = vpop.f32.mrb[5].mxu0  ;;  %v343_v48 = vpop.f32.mrb[5].mxu1 }
  0xff   :  { %272 = vst [vmem:[%s514_s3 + $0x8] sm:$0xff] %v264_v43  ;;  %276 = vst [vmem:[%s514_s3 + $0x28] sm:$0xff] %v268_v44  ;;  %v332_v49 = vadd.f32 %v331_v47, %v330_v45  ;;  %v344_v50 = vadd.f32 %v343_v48, %v342_v46  ;;  %v333_v51 = vpop.f32.mrb[6].mxu0  ;;  %v345_v52 = vpop.f32.mrb[6].mxu1 }
 0x100   :  { %v334_v53 = vpop.f32.mrb[7].mxu0  ;;  %v346_v54 = vpop.f32.mrb[7].mxu1 }
 0x101   :  { %v241_v55 = vadd.f32 %v332_v49, %v283_v26  ;;  %v257_v56 = vadd.f32 %v344_v50, %v283_v26  ;;  %v335_v57 = vadd.f32 %v334_v53, %v333_v51  ;;  %v347_v58 = vadd.f32 %v346_v54, %v345_v52 }
 0x103   :  { %v265_v59 = vmax.f32 %v241_v55, 0.0  ;;  %v269_v60 = vmax.f32 %v257_v56, 0.0  ;;  %v244_v61 = vadd.f32 %v335_v57, %v283_v26  ;;  %v260_v62 = vadd.f32 %v347_v58, %v283_v26 }
 0x105   :  { %273 = vst [vmem:[%s514_s3 + $0x10] sm:$0xff] %v265_v59  ;;  %277 = vst [vmem:[%s514_s3 + $0x30] sm:$0xff] %v269_v60  ;;  %v266_v63 = vmax.f32 %v244_v61, 0.0  ;;  %v270_v0 = vmax.f32 %v260_v62, 0.0 }
 0x107   :  { %274 = vst [vmem:[%s514_s3 + $0x18] sm:$0xff] %v266_v63  ;;  %278 = vst [vmem:[%s514_s3 + $0x38] sm:$0xff] %v270_v0 }

// kernel: _lambda_.20
= control target key start
LH: loop header
LB: loop body
LE: loop exit
PB: predicated region body
PF: predicated region fallthrough
CT: control target
= control target key end

     0   :  { %s503_s1 = inlined_call_operand.vmem [shape: bf16[256,128], index: 1, kind: input, shape index: {}]   ;;  %s504_s0 = inlined_call_operand.vmem [shape: bf16[64,256], index: 0, kind: input, shape index: {}]   ;;  %s505_s2 = inlined_call_operand.vmem [shape: f32[1,128], index: 2, kind: input, shape index: {}]   ;;  %s506_s3 = inlined_call_operand.vmem [shape: f32[64,128], index: 3, kind: output, shape index: {}]  }
   0x1   :  { %v356_v0 = vld [vmem:[%s503_s1 + $0x40] sm:$0xff]   ;;  %v358_v2 = vld [vmem:[%s503_s1 + $0x48] sm:$0xff]   ;;  %v360_v4 = vld [vmem:[%s503_s1 + $0x50] sm:$0xff]  }
   0x2   :  { %v357_v1 = vld [vmem:[%s503_s1] sm:$0xff]   ;;  %300 = vmatprep.subr.bf16.mxu0 %v356_v0  ;;  %340 = vmatprep.subr.bf16.mxu1 %v356_v0  ;;  %v359_v3 = vld [vmem:[%s503_s1 + $0x8] sm:$0xff]   ;;  %v361_v5 = vld [vmem:[%s503_s1 + $0x10] sm:$0xff]  }
   0x3   :  { %301 = vmatpush3.bf16.msra.mxu0 %v357_v1  ;;  %348 = vmatpush3.bf16.msra.mxu1 %v357_v1  ;;  %v362_v6 = vld [vmem:[%s503_s1 + $0x58] sm:$0xff]   ;;  %v364_v8 = vld [vmem:[%s503_s1 + $0x60] sm:$0xff]   ;;  %v366_v10 = vld [vmem:[%s503_s1 + $0x68] sm:$0xff]  }
   0x4   :  { %302 = vmatprep.subr.bf16.mxu0 %v358_v2  ;;  %341 = vmatprep.subr.bf16.mxu1 %v358_v2  ;;  %v363_v7 = vld [vmem:[%s503_s1 + $0x18] sm:$0xff]   ;;  %v365_v9 = vld [vmem:[%s503_s1 + $0x20] sm:$0xff]   ;;  %v367_v13 = vld [vmem:[%s503_s1 + $0x28] sm:$0xff]  }
   0x5   :  { %v374_v11 = vld [vmem:[%s504_s0 + $0x4] ss:$8 sps:$4 sm:$0xff]   ;;  %v368_v14 = vld [vmem:[%s503_s1 + $0x70] sm:$0xff]   ;;  %v370_v16 = vld [vmem:[%s503_s1 + $0x78] sm:$0xff]  }
   0x6   :  { %v377_v12 = vld [vmem:[%s504_s0 + $0x24] ss:$8 sps:$4 sm:$0xff]   ;;  %230 = vmatprep.mubr.bf16.mxu0 %v374_v11  ;;  %v369_v15 = vld [vmem:[%s503_s1 + $0x30] sm:$0xff]   ;;  %v371_v17 = vld [vmem:[%s503_s1 + $0x38] sm:$0xff]  }
   0x7   :  { %303 = vmatpush3.bf16.msra.mxu0 %v359_v3  ;;  %349 = vmatpush3.bf16.msra.mxu1 %v359_v3  ;;  %v372_v18 = vld [vmem:[%s504_s0] ss:$8 sps:$4 sm:$0xff]   ;;  %v378_v20 = vld [vmem:[%s504_s0 + $0x14] ss:$8 sps:$4 sm:$0xff]   ;;  %v382_v22 = vld [vmem:[%s504_s0 + $0x10] ss:$8 sps:$4 sm:$0xff]  }
   0x8   :  { %304 = vmatprep.subr.bf16.mxu0 %v360_v4  ;;  %342 = vmatprep.subr.bf16.mxu1 %v360_v4  ;;  %v375_v19 = vld [vmem:[%s504_s0 + $0x20] ss:$8 sps:$4 sm:$0xff]   ;;  %v380_v21 = vld [vmem:[%s504_s0 + $0x34] ss:$8 sps:$4 sm:$0xff]   ;;  %v383_v23 = vld [vmem:[%s504_s0 + $0x30] ss:$8 sps:$4 sm:$0xff]  }
   0x9   :  { %246 = vmatprep.mubr.bf16.mxu1 %v377_v12  ;;  %v275_v26 = vld [vmem:[%s505_s2] ss:$0 sm:$0xff] }
   0xb   :  { %305 = vmatpush3.bf16.msra.mxu0 %v361_v5  ;;  %350 = vmatpush3.bf16.msra.mxu1 %v361_v5 }
   0xc   :  { %306 = vmatprep.subr.bf16.mxu0 %v362_v6  ;;  %343 = vmatprep.subr.bf16.mxu1 %v362_v6 }
   0xf   :  { %307 = vmatpush3.bf16.msra.mxu0 %v363_v7  ;;  %351 = vmatpush3.bf16.msra.mxu1 %v363_v7 }
  0x10   :  { %308 = vmatprep.subr.bf16.mxu0 %v364_v8  ;;  %344 = vmatprep.subr.bf16.mxu1 %v364_v8 }
  0x13   :  { %309 = vmatpush3.bf16.msra.mxu0 %v365_v9  ;;  %352 = vmatpush3.bf16.msra.mxu1 %v365_v9 }
  0x14   :  { %310 = vmatprep.subr.bf16.mxu0 %v366_v10  ;;  %345 = vmatprep.subr.bf16.mxu1 %v366_v10 }
  0x17   :  { %311 = vmatpush3.bf16.msra.mxu0 %v367_v13  ;;  %353 = vmatpush3.bf16.msra.mxu1 %v367_v13 }
  0x18   :  { %312 = vmatprep.subr.bf16.mxu0 %v368_v14  ;;  %346 = vmatprep.subr.bf16.mxu1 %v368_v14 }
  0x1b   :  { %313 = vmatpush3.bf16.msra.mxu0 %v369_v15  ;;  %354 = vmatpush3.bf16.msra.mxu1 %v369_v15 }
  0x1c   :  { %314 = vmatprep.subr.bf16.mxu0 %v370_v16  ;;  %347 = vmatprep.subr.bf16.mxu1 %v370_v16 }
  0x1f   :  { %315 = vmatpush3.bf16.msra.mxu0 %v371_v17  ;;  %355 = vmatpush3.bf16.msra.mxu1 %v371_v17 }
  0x22   :  { %231 = vmatmul.mubr.bf16.vlgmr.msra.gmra.mrb[0].mxu0 %v372_v18  ;;  %247 = vmatmul.mubr.bf16.vlgmr.msra.gmra.mrb[0].mxu1 %v375_v19 }
  0x23   :  { %238 = vmatprep.mubr.bf16.mxu0 %v378_v20  ;;  %254 = vmatprep.mubr.bf16.mxu1 %v380_v21 }
  0x2a   :  { %239 = vmatmul.mubr.bf16.gmra.mrb[4].mxu0 %v382_v22  ;;  %255 = vmatmul.mubr.bf16.gmra.mrb[4].mxu1 %v383_v23 }
  0xf5   :  { %v316_v24 = vpop.f32.mrb[0].mxu0  ;;  %v328_v25 = vpop.f32.mrb[0].mxu1 }
  0xf6   :  { %v317_v27 = vpop.f32.mrb[1].mxu0  ;;  %v329_v28 = vpop.f32.mrb[1].mxu1 }
  0xf7   :  { %v318_v29 = vadd.f32 %v317_v27, %v316_v24  ;;  %v330_v30 = vadd.f32 %v329_v28, %v328_v25  ;;  %v319_v31 = vpop.f32.mrb[2].mxu0  ;;  %v331_v32 = vpop.f32.mrb[2].mxu1 }
  0xf8   :  { %v320_v33 = vpop.f32.mrb[3].mxu0  ;;  %v332_v34 = vpop.f32.mrb[3].mxu1 }
  0xf9   :  { %v233_v35 = vadd.f32 %v318_v29, %v275_v26  ;;  %v249_v36 = vadd.f32 %v330_v30, %v275_v26  ;;  %v321_v37 = vadd.f32 %v320_v33, %v319_v31  ;;  %v333_v38 = vadd.f32 %v332_v34, %v331_v32 }
  0xfb   :  { %263 = vst [vmem:[%s506_s3] sm:$0xff] %v233_v35  ;;  %267 = vst [vmem:[%s506_s3 + $0x20] sm:$0xff] %v249_v36  ;;  %v236_v39 = vadd.f32 %v321_v37, %v275_v26  ;;  %v252_v40 = vadd.f32 %v333_v38, %v275_v26 }
  0xfd   :  { %264 = vst [vmem:[%s506_s3 + $0x8] sm:$0xff] %v236_v39  ;;  %268 = vst [vmem:[%s506_s3 + $0x28] sm:$0xff] %v252_v40  ;;  %v322_v41 = vpop.f32.mrb[4].mxu0  ;;  %v334_v42 = vpop.f32.mrb[4].mxu1 }
  0xfe   :  { %v323_v43 = vpop.f32.mrb[5].mxu0  ;;  %v335_v44 = vpop.f32.mrb[5].mxu1 }
  0xff   :  { %v324_v45 = vadd.f32 %v323_v43, %v322_v41  ;;  %v336_v46 = vadd.f32 %v335_v44, %v334_v42  ;;  %v325_v47 = vpop.f32.mrb[6].mxu0  ;;  %v337_v48 = vpop.f32.mrb[6].mxu1 }
 0x100   :  { %v326_v49 = vpop.f32.mrb[7].mxu0  ;;  %v338_v50 = vpop.f32.mrb[7].mxu1 }
 0x101   :  { %v241_v51 = vadd.f32 %v324_v45, %v275_v26  ;;  %v257_v52 = vadd.f32 %v336_v46, %v275_v26  ;;  %v327_v53 = vadd.f32 %v326_v49, %v325_v47  ;;  %v339_v54 = vadd.f32 %v338_v50, %v337_v48 }
 0x103   :  { %265 = vst [vmem:[%s506_s3 + $0x10] sm:$0xff] %v241_v51  ;;  %269 = vst [vmem:[%s506_s3 + $0x30] sm:$0xff] %v257_v52  ;;  %v244_v55 = vadd.f32 %v327_v53, %v275_v26  ;;  %v260_v56 = vadd.f32 %v339_v54, %v275_v26 }
 0x105   :  { %266 = vst [vmem:[%s506_s3 + $0x18] sm:$0xff] %v244_v55  ;;  %270 = vst [vmem:[%s506_s3 + $0x38] sm:$0xff] %v260_v56 }

// kernel: _lambda_.22
= control target key start
LH: loop header
LB: loop body
LE: loop exit
PB: predicated region body
PF: predicated region fallthrough
CT: control target
= control target key end

     0   :  { %s958_s1 = inlined_call_operand.vmem [shape: bf16[512,128], index: 1, kind: input, shape index: {}]   ;;  %s959_s0 = inlined_call_operand.vmem [shape: bf16[64,512], index: 0, kind: input, shape index: {}]   ;;  %s960_s2 = inlined_call_operand.vmem [shape: f32[1,128], index: 2, kind: input, shape index: {}]   ;;  %s961_s3 = inlined_call_operand.vmem [shape: f32[64,128], index: 3, kind: input, shape index: {}, may-alias: {3,4}]   ;;  %s962_s4 = inlined_call_operand.vmem [shape: f32[64,128], index: 4, kind: output, shape index: {}, may-alias: {3,4}]  }
   0x1   :  { %v672_v0 = vld [vmem:[%s958_s1 + $0x40] sm:$0xff]   ;;  %v676_v4 = vld [vmem:[%s958_s1 + $0x48] sm:$0xff]   ;;  %v680_v8 = vld [vmem:[%s958_s1 + $0x50] sm:$0xff]  }
   0x2   :  { %v673_v1 = vld [vmem:[%s958_s1 + $0xc0] sm:$0xff]   ;;  %592 = vmatprep.subr.bf16.mxu0 %v672_v0  ;;  %v677_v5 = vld [vmem:[%s958_s1 + $0xc8] sm:$0xff]   ;;  %v681_v9 = vld [vmem:[%s958_s1 + $0xd0] sm:$0xff]  }
   0x3   :  { %v674_v2 = vld [vmem:[%s958_s1] sm:$0xff]   ;;  %632 = vmatprep.subr.bf16.mxu1 %v673_v1  ;;  %v678_v6 = vld [vmem:[%s958_s1 + $0x8] sm:$0xff]   ;;  %v682_v10 = vld [vmem:[%s958_s1 + $0x10] sm:$0xff]  }
   0x4   :  { %v675_v3 = vld [vmem:[%s958_s1 + $0x80] sm:$0xff]   ;;  %593 = vmatpush3.bf16.msra.mxu0 %v674_v2  ;;  %v679_v7 = vld [vmem:[%s958_s1 + $0x88] sm:$0xff]   ;;  %v683_v11 = vld [vmem:[%s958_s1 + $0x90] sm:$0xff]  }
   0x5   :  { %633 = vmatpush3.bf16.msra.mxu1 %v675_v3  ;;  %594 = vmatprep.subr.bf16.mxu0 %v676_v4  ;;  %v684_v12 = vld [vmem:[%s958_s1 + $0x58] sm:$0xff]   ;;  %v688_v16 = vld [vmem:[%s958_s1 + $0x60] sm:$0xff]   ;;  %v692_v20 = vld [vmem:[%s958_s1 + $0x68] sm:$0xff]  }
   0x6   :  { %634 = vmatprep.subr.bf16.mxu1 %v677_v5  ;;  %v685_v13 = vld [vmem:[%s958_s1 + $0xd8] sm:$0xff]   ;;  %v689_v17 = vld [vmem:[%s958_s1 + $0xe0] sm:$0xff]   ;;  %v693_v21 = vld [vmem:[%s958_s1 + $0xe8] sm:$0xff]  }
   0x7   :  { %v686_v14 = vld [vmem:[%s958_s1 + $0x18] sm:$0xff]   ;;  %v690_v18 = vld [vmem:[%s958_s1 + $0x20] sm:$0xff]   ;;  %v694_v22 = vld [vmem:[%s958_s1 + $0x28] sm:$0xff]  }
   0x8   :  { %595 = vmatpush3.bf16.msra.mxu0 %v678_v6  ;;  %v687_v15 = vld [vmem:[%s958_s1 + $0x98] sm:$0xff]   ;;  %v691_v19 = vld [vmem:[%s958_s1 + $0xa0] sm:$0xff]   ;;  %v695_v23 = vld [vmem:[%s958_s1 + $0xa8] sm:$0xff]  }
   0x9   :  { %635 = vmatpush3.bf16.msra.mxu1 %v679_v7  ;;  %596 = vmatprep.subr.bf16.mxu0 %v680_v8  ;;  %v696_v24 = vld [vmem:[%s958_s1 + $0x70] sm:$0xff]   ;;  %v700_v28 = vld [vmem:[%s958_s1 + $0x78] sm:$0xff]   ;;  %v900_v50 = vld [vmem:[%s960_s2] ss:$0 sm:$0xff] }
   0xa   :  { %636 = vmatprep.subr.bf16.mxu1 %v681_v9  ;;  %v697_v25 = vld [vmem:[%s958_s1 + $0xf0] sm:$0xff]   ;;  %v701_v29 = vld [vmem:[%s958_s1 + $0xf8] sm:$0xff]   ;;  %v507_v61 = vld [vmem:[%s961_s3] sm:$0xff] }
   0xb   :  { %v698_v26 = vld [vmem:[%s958_s1 + $0x30] sm:$0xff]   ;;  %v702_v30 = vld [vmem:[%s958_s1 + $0x38] sm:$0xff]   ;;  %v508_v1 = vld [vmem:[%s961_s3 + $0x8] sm:$0xff] }
   0xc   :  { %597 = vmatpush3.bf16.msra.mxu0 %v682_v10  ;;  %v699_v27 = vld [vmem:[%s958_s1 + $0xb0] sm:$0xff]   ;;  %v703_v31 = vld [vmem:[%s958_s1 + $0xb8] sm:$0xff]  }
   0xd   :  { %637 = vmatpush3.bf16.msra.mxu1 %v683_v11  ;;  %598 = vmatprep.subr.bf16.mxu0 %v684_v12  ;;  %v704_v32 = vld [vmem:[%s959_s0] ss:$16 sps:$4 sm:$0xff]   ;;  %v706_v33 = vld [vmem:[%s959_s0 + $0x4] ss:$16 sps:$4 sm:$0xff]   ;;  %v707_v34 = vld [vmem:[%s959_s0 + $0x8] ss:$16 sps:$4 sm:$0xff]  }
   0xe   :  { %638 = vmatprep.subr.bf16.mxu1 %v685_v13  ;;  %v709_v35 = vld [vmem:[%s959_s0 + $0xc] ss:$16 sps:$4 sm:$0xff]   ;;  %409 = vmatprep.mubr.bf16.mxu0 %v706_v33  ;;  %v710_v36 = vld [vmem:[%s959_s0 + $0x24] ss:$16 sps:$4 sm:$0xff]   ;;  %v714_v38 = vld [vmem:[%s959_s0 + $0x20] ss:$16 sps:$4 sm:$0xff]  }
   0xf   :  { %474 = vmatprep.mubr.bf16.mxu1 %v709_v35  ;;  %v712_v37 = vld [vmem:[%s959_s0 + $0x2c] ss:$16 sps:$4 sm:$0xff]   ;;  %v715_v39 = vld [vmem:[%s959_s0 + $0x28] ss:$16 sps:$4 sm:$0xff]   ;;  %v716_v40 = vld [vmem:[%s959_s0 + $0x44] ss:$16 sps:$4 sm:$0xff]  }
  0x10   :  { %599 = vmatpush3.bf16.msra.mxu0 %v686_v14  ;;  %v718_v41 = vld [vmem:[%s959_s0 + $0x4c] ss:$16 sps:$4 sm:$0xff]   ;;  %v720_v42 = vld [vmem:[%s959_s0 + $0x40] ss:$16 sps:$4 sm:$0xff]   ;;  %v721_v43 = vld [vmem:[%s959_s0 + $0x48] ss:$16 sps:$4 sm:$0xff]  }
  0x11   :  { %639 = vmatpush3.bf16.msra.mxu1 %v687_v15  ;;  %600 = vmatprep.subr.bf16.mxu0 %v688_v16  ;;  %v722_v44 = vld [vmem:[%s959_s0 + $0x64] ss:$16 sps:$4 sm:$0xff]   ;;  %v724_v45 = vld [vmem:[%s959_s0 + $0x6c] ss:$16 sps:$4 sm:$0xff]   ;;  %v726_v46 = vld [vmem:[%s959_s0 + $0x60] ss:$16 sps:$4 sm:$0xff]  }
  0x12   :  { %640 = vmatprep.subr.bf16.mxu1 %v689_v17  ;;  %v727_v47 = vld [vmem:[%s959_s0 + $0x68] ss:$16 sps:$4 sm:$0xff]  }
  0x14   :  { %601 = vmatpush3.bf16.msra.mxu0 %v690_v18 }
  0x15   :  { %641 = vmatpush3.bf16.msra.mxu1 %v691_v19  ;;  %602 = vmatprep.subr.bf16.mxu0 %v692_v20 }
  0x16   :  { %642 = vmatprep.subr.bf16.mxu1 %v693_v21 }
  0x18   :  { %603 = vmatpush3.bf16.msra.mxu0 %v694_v22 }
  0x19   :  { %643 = vmatpush3.bf16.msra.mxu1 %v695_v23  ;;  %604 = vmatprep.subr.bf16.mxu0 %v696_v24 }
  0x1a   :  { %644 = vmatprep.subr.bf16.mxu1 %v697_v25 }
  0x1c   :  { %605 = vmatpush3.bf16.msra.mxu0 %v698_v26 }
  0x1d   :  { %645 = vmatpush3.bf16.msra.mxu1 %v699_v27  ;;  %606 = vmatprep.subr.bf16.mxu0 %v700_v28 }
  0x1e   :  { %646 = vmatprep.subr.bf16.mxu1 %v701_v29 }
  0x20   :  { %607 = vmatpush3.bf16.msra.mxu0 %v702_v30 }
  0x21   :  { %647 = vmatpush3.bf16.msra.mxu1 %v703_v31 }
  0x23   :  { %410 = vmatmul.mubr.bf16.vlgmr.msra.gmra.mrb[0].mxu0 %v704_v32 }
  0x24   :  { %475 = vmatmul.mubr.bf16.vlgmr.msra.gmra.mrb[0].mxu1 %v707_v34  ;;  %417 = vmatprep.mubr.bf16.mxu0 %v710_v36 }
  0x25   :  { %482 = vmatprep.mubr.bf16.mxu1 %v712_v37 }
  0x2b   :  { %418 = vmatmul.mubr.bf16.gmra.mrb[4].mxu0 %v714_v38 }
  0x2c   :  { %483 = vmatmul.mubr.bf16.gmra.mrb[4].mxu1 %v715_v39  ;;  %425 = vmatprep.mubr.bf16.mxu0 %v716_v40 }
  0x2d   :  { %490 = vmatprep.mubr.bf16.mxu1 %v718_v41 }
  0x33   :  { %426 = vmatmul.mubr.bf16.gmra.mrb[8].mxu0 %v720_v42 }
  0x34   :  { %491 = vmatmul.mubr.bf16.gmra.mrb[8].mxu1 %v721_v43  ;;  %433 = vmatprep.mubr.bf16.mxu0 %v722_v44 }
  0x35   :  { %498 = vmatprep.mubr.bf16.mxu1 %v724_v45 }
  0x3b   :  { %434 = vmatmul.mubr.bf16.gmra.mrb[12].mxu0 %v726_v46 }
  0x3c   :  { %499 = vmatmul.mubr.bf16.gmra.mrb[12].mxu1 %v727_v47 }
  0xf6   :  { %v608_v48 = vpop.f32.mrb[0].mxu0 }
  0xf7   :  { %v648_v49 = vpop.f32.mrb[0].mxu1  ;;  %v609_v51 = vpop.f32.mrb[1].mxu0 }
  0xf8   :  { %v610_v52 = vadd.f32 %v609_v51, %v608_v48  ;;  %v649_v53 = vpop.f32.mrb[1].mxu1  ;;  %v611_v54 = vpop.f32.mrb[2].mxu0 }
  0xf9   :  { %v650_v55 = vadd.f32 %v649_v53, %v648_v49  ;;  %v651_v56 = vpop.f32.mrb[2].mxu1  ;;  %v612_v57 = vpop.f32.mrb[3].mxu0 }
  0xfa   :  { %v412_v58 = vadd.f32 %v610_v52, %v900_v50  ;;  %v613_v59 = vadd.f32 %v612_v57, %v611_v54  ;;  %v652_v60 = vpop.f32.mrb[3].mxu1 }
  0xfb   :  { %v653_v62 = vadd.f32 %v652_v60, %v651_v56 }
  0xfc   :  { %v477_v63 = vadd.f32 %v650_v55, %v412_v58  ;;  %v415_v0 = vadd.f32 %v613_v59, %v900_v50 }
  0xfe   :  { %v515_v2 = vadd.f32 %v507_v61, %v477_v63  ;;  %v480_v3 = vadd.f32 %v653_v62, %v415_v0  ;;  %v614_v4 = vpop.f32.mrb[4].mxu0 }
  0xff   :  { %v654_v5 = vpop.f32.mrb[4].mxu1  ;;  %v615_v6 = vpop.f32.mrb[5].mxu0 }
 0x100   :  { %v523_v7 = vmax.f32 %v515_v2, 0.0  ;;  %v516_v8 = vadd.f32 %v508_v1, %v480_v3  ;;  %v616_v9 = vadd.f32 %v615_v6, %v614_v4  ;;  %v655_v10 = vpop.f32.mrb[5].mxu1  ;;  %v617_v11 = vpop.f32.mrb[6].mxu0 }
 0x101   :  { %v656_v12 = vadd.f32 %v655_v10, %v654_v5  ;;  %v657_v13 = vpop.f32.mrb[6].mxu1  ;;  %v618_v14 = vpop.f32.mrb[7].mxu0 }
 0x102   :  { %531 = vst [vmem:[%s962_s4] sm:$0xff] %v523_v7  ;;  %v524_v15 = vmax.f32 %v516_v8, 0.0  ;;  %v420_v16 = vadd.f32 %v616_v9, %v900_v50  ;;  %v619_v17 = vadd.f32 %v618_v14, %v617_v11  ;;  %v658_v18 = vpop.f32.mrb[7].mxu1 }
 0x103   :  { %v659_v20 = vadd.f32 %v658_v18, %v657_v13 }
 0x104   :  { %v485_v21 = vadd.f32 %v656_v12, %v420_v16  ;;  %v423_v22 = vadd.f32 %v619_v17, %v900_v50 }
 0x106   :  { %v488_v25 = vadd.f32 %v659_v20, %v423_v22  ;;  %v620_v26 = vpop.f32.mrb[8].mxu0 }
 0x107   :  { %v660_v27 = vpop.f32.mrb[8].mxu1  ;;  %v621_v28 = vpop.f32.mrb[9].mxu0 }
 0x108   :  { %v622_v31 = vadd.f32 %v621_v28, %v620_v26  ;;  %v661_v32 = vpop.f32.mrb[9].mxu1  ;;  %v623_v33 = vpop.f32.mrb[10].mxu0 }
 0x109   :  { %v509_v19 = vld [vmem:[%s961_s3 + $0x10] sm:$0xff]  ;;  %v662_v34 = vadd.f32 %v661_v32, %v660_v27  ;;  %v663_v35 = vpop.f32.mrb[10].mxu1  ;;  %v624_v36 = vpop.f32.mrb[11].mxu0 }
 0x10a   :  { %532 = vst [vmem:[%s962_s4 + $0x8] sm:$0xff] %v524_v15  ;;  %v517_v24 = vadd.f32 %v509_v19, %v485_v21  ;;  %v428_v38 = vadd.f32 %v622_v31, %v900_v50  ;;  %v625_v39 = vadd.f32 %v624_v36, %v623_v33  ;;  %v664_v40 = vpop.f32.mrb[11].mxu1 }
 0x10b   :  { %v665_v42 = vadd.f32 %v664_v40, %v663_v35 }
 0x10c   :  { %v525_v29 = vmax.f32 %v517_v24, 0.0  ;;  %v493_v43 = vadd.f32 %v662_v34, %v428_v38  ;;  %v431_v44 = vadd.f32 %v625_v39, %v900_v50 }
 0x10e   :  { %v496_v47 = vadd.f32 %v665_v42, %v431_v44  ;;  %v626_v48 = vpop.f32.mrb[12].mxu0 }
 0x10f   :  { %v666_v49 = vpop.f32.mrb[12].mxu1  ;;  %v627_v51 = vpop.f32.mrb[13].mxu0 }
 0x110   :  { %v628_v54 = vadd.f32 %v627_v51, %v626_v48  ;;  %v667_v55 = vpop.f32.mrb[13].mxu1  ;;  %v629_v56 = vpop.f32.mrb[14].mxu0 }
 0x111   :  { %v510_v23 = vld [vmem:[%s961_s3 + $0x18] sm:$0xff]  ;;  %v668_v57 = vadd.f32 %v667_v55, %v666_v49  ;;  %v669_v58 = vpop.f32.mrb[14].mxu1  ;;  %v630_v59 = vpop.f32.mrb[15].mxu0 }
 0x112   :  { %v518_v30 = vadd.f32 %v510_v23, %v488_v25  ;;  %533 = vst [vmem:[%s962_s4 + $0x10] sm:$0xff] %v525_v29  ;;  %v436_v61 = vadd.f32 %v628_v54, %v900_v50  ;;  %v631_v62 = vadd.f32 %v630_v59, %v629_v56  ;;  %v670_v63 = vpop.f32.mrb[15].mxu1 }
 0x113   :  { %v671_v1 = vadd.f32 %v670_v63, %v669_v58 }
 0x114   :  { %v526_v37 = vmax.f32 %v518_v30, 0.0  ;;  %v501_v2 = vadd.f32 %v668_v57, %v436_v61  ;;  %v439_v3 = vadd.f32 %v631_v62, %v900_v50 }
 0x116   :  { %v504_v6 = vadd.f32 %v671_v1, %v439_v3 }
 0x119   :  { %v511_v41 = vld [vmem:[%s961_s3 + $0x20] sm:$0xff] }
 0x11a   :  { %534 = vst [vmem:[%s962_s4 + $0x18] sm:$0xff] %v526_v37  ;;  %v519_v46 = vadd.f32 %v511_v41, %v493_v43 }
 0x11c   :  { %v527_v52 = vmax.f32 %v519_v46, 0.0 }
 0x121   :  { %v512_v45 = vld [vmem:[%s961_s3 + $0x28] sm:$0xff] }
 0x122   :  { %v520_v53 = vadd.f32 %v512_v45, %v496_v47  ;;  %535 = vst [vmem:[%s962_s4 + $0x20] sm:$0xff] %v527_v52 }
 0x124   :  { %v528_v60 = vmax.f32 %v520_v53, 0.0 }
 0x129   :  { %v513_v0 = vld [vmem:[%s961_s3 + $0x30] sm:$0xff] }
 0x12a   :  { %536 = vst [vmem:[%s962_s4 + $0x28] sm:$0xff] %v528_v60  ;;  %v521_v5 = vadd.f32 %v513_v0, %v501_v2 }
 0x12c   :  { %v529_v7 = vmax.f32 %v521_v5, 0.0 }
 0x131   :  { %v514_v4 = vld [vmem:[%s961_s3 + $0x38] sm:$0xff] }
 0x132   :  { %v522_v8 = vadd.f32 %v514_v4, %v504_v6  ;;  %537 = vst [vmem:[%s962_s4 + $0x30] sm:$0xff] %v529_v7 }
 0x134   :  { %v530_v9 = vmax.f32 %v522_v8, 0.0 }
 0x136   :  { %538 = vst [vmem:[%s962_s4 + $0x38] sm:$0xff] %v530_v9 }

// kernel: _lambda_.23
= control target key start
LH: loop header
LB: loop body
LE: loop exit
PB: predicated region body
PF: predicated region fallthrough
CT: control target
= control target key end

     0   :  { %s910_s1 = inlined_call_operand.vmem [shape: bf16[512,128], index: 1, kind: input, shape index: {}]   ;;  %s911_s0 = inlined_call_operand.vmem [shape: bf16[64,512], index: 0, kind: input, shape index: {}]   ;;  %s912_s2 = inlined_call_operand.vmem [shape: f32[1,128], index: 2, kind: input, shape index: {}]   ;;  %s913_s3 = inlined_call_operand.vmem [shape: f32[64,128], index: 3, kind: output, shape index: {}]  }
   0x1   :  { %v653_v0 = vld [vmem:[%s910_s1 + $0x40] sm:$0xff]   ;;  %v657_v4 = vld [vmem:[%s910_s1 + $0x48] sm:$0xff]   ;;  %v661_v8 = vld [vmem:[%s910_s1 + $0x50] sm:$0xff]  }
   0x2   :  { %v654_v1 = vld [vmem:[%s910_s1 + $0xc0] sm:$0xff]   ;;  %573 = vmatprep.subr.bf16.mxu0 %v653_v0  ;;  %v658_v5 = vld [vmem:[%s910_s1 + $0xc8] sm:$0xff]   ;;  %v662_v9 = vld [vmem:[%s910_s1 + $0xd0] sm:$0xff]  }
   0x3   :  { %v655_v2 = vld [vmem:[%s910_s1] sm:$0xff]   ;;  %613 = vmatprep.subr.bf16.mxu1 %v654_v1  ;;  %v659_v6 = vld [vmem:[%s910_s1 + $0x8] sm:$0xff]   ;;  %v663_v10 = vld [vmem:[%s910_s1 + $0x10] sm:$0xff]  }
   0x4   :  { %v656_v3 = vld [vmem:[%s910_s1 + $0x80] sm:$0xff]   ;;  %574 = vmatpush3.bf16.msra.mxu0 %v655_v2  ;;  %v660_v7 = vld [vmem:[%s910_s1 + $0x88] sm:$0xff]   ;;  %v664_v11 = vld [vmem:[%s910_s1 + $0x90] sm:$0xff]  }
   0x5   :  { %614 = vmatpush3.bf16.msra.mxu1 %v656_v3  ;;  %575 = vmatprep.subr.bf16.mxu0 %v657_v4  ;;  %v665_v12 = vld [vmem:[%s910_s1 + $0x58] sm:$0xff]   ;;  %v669_v16 = vld [vmem:[%s910_s1 + $0x60] sm:$0xff]   ;;  %v673_v20 = vld [vmem:[%s910_s1 + $0x68] sm:$0xff]  }
   0x6   :  { %615 = vmatprep.subr.bf16.mxu1 %v658_v5  ;;  %v666_v13 = vld [vmem:[%s910_s1 + $0xd8] sm:$0xff]   ;;  %v670_v17 = vld [vmem:[%s910_s1 + $0xe0] sm:$0xff]   ;;  %v674_v21 = vld [vmem:[%s910_s1 + $0xe8] sm:$0xff]  }
   0x7   :  { %v667_v14 = vld [vmem:[%s910_s1 + $0x18] sm:$0xff]   ;;  %v671_v18 = vld [vmem:[%s910_s1 + $0x20] sm:$0xff]   ;;  %v675_v22 = vld [vmem:[%s910_s1 + $0x28] sm:$0xff]  }
   0x8   :  { %576 = vmatpush3.bf16.msra.mxu0 %v659_v6  ;;  %v668_v15 = vld [vmem:[%s910_s1 + $0x98] sm:$0xff]   ;;  %v672_v19 = vld [vmem:[%s910_s1 + $0xa0] sm:$0xff]   ;;  %v676_v23 = vld [vmem:[%s910_s1 + $0xa8] sm:$0xff]  }
   0x9   :  { %616 = vmatpush3.bf16.msra.mxu1 %v660_v7  ;;  %577 = vmatprep.subr.bf16.mxu0 %v661_v8  ;;  %v677_v24 = vld [vmem:[%s910_s1 + $0x70] sm:$0xff]   ;;  %v681_v28 = vld [vmem:[%s910_s1 + $0x78] sm:$0xff]   ;;  %v876_v50 = vld [vmem:[%s912_s2] ss:$0 sm:$0xff] }
   0xa   :  { %617 = vmatprep.subr.bf16.mxu1 %v662_v9  ;;  %v678_v25 = vld [vmem:[%s910_s1 + $0xf0] sm:$0xff]   ;;  %v682_v29 = vld [vmem:[%s910_s1 + $0xf8] sm:$0xff]  }
   0xb   :  { %v679_v26 = vld [vmem:[%s910_s1 + $0x30] sm:$0xff]   ;;  %v683_v30 = vld [vmem:[%s910_s1 + $0x38] sm:$0xff]  }
   0xc   :  { %578 = vmatpush3.bf16.msra.mxu0 %v663_v10  ;;  %v680_v27 = vld [vmem:[%s910_s1 + $0xb0] sm:$0xff]   ;;  %v684_v31 = vld [vmem:[%s910_s1 + $0xb8] sm:$0xff]  }
   0xd   :  { %618 = vmatpush3.bf16.msra.mxu1 %v664_v11  ;;  %579 = vmatprep.subr.bf16.mxu0 %v665_v12  ;;  %v685_v32 = vld [vmem:[%s911_s0] ss:$16 sps:$4 sm:$0xff]   ;;  %v687_v33 = vld [vmem:[%s911_s0 + $0x4] ss:$16 sps:$4 sm:$0xff]   ;;  %v688_v34 = vld [vmem:[%s911_s0 + $0x8] ss:$16 sps:$4 sm:$0xff]  }
   0xe   :  { %619 = vmatprep.subr.bf16.mxu1 %v666_v13  ;;  %v690_v35 = vld [vmem:[%s911_s0 + $0xc] ss:$16 sps:$4 sm:$0xff]   ;;  %406 = vmatprep.mubr.bf16.mxu0 %v687_v33  ;;  %v691_v36 = vld [vmem:[%s911_s0 + $0x24] ss:$16 sps:$4 sm:$0xff]   ;;  %v695_v38 = vld [vmem:[%s911_s0 + $0x20] ss:$16 sps:$4 sm:$0xff]  }
   0xf   :  { %471 = vmatprep.mubr.bf16.mxu1 %v690_v35  ;;  %v693_v37 = vld [vmem:[%s911_s0 + $0x2c] ss:$16 sps:$4 sm:$0xff]   ;;  %v696_v39 = vld [vmem:[%s911_s0 + $0x28] ss:$16 sps:$4 sm:$0xff]   ;;  %v697_v40 = vld [vmem:[%s911_s0 + $0x44] ss:$16 sps:$4 sm:$0xff]  }
  0x10   :  { %580 = vmatpush3.bf16.msra.mxu0 %v667_v14  ;;  %v699_v41 = vld [vmem:[%s911_s0 + $0x4c] ss:$16 sps:$4 sm:$0xff]   ;;  %v701_v42 = vld [vmem:[%s911_s0 + $0x40] ss:$16 sps:$4 sm:$0xff]   ;;  %v702_v43 = vld [vmem:[%s911_s0 + $0x48] ss:$16 sps:$4 sm:$0xff]  }
  0x11   :  { %620 = vmatpush3.bf16.msra.mxu1 %v668_v15  ;;  %581 = vmatprep.subr.bf16.mxu0 %v669_v16  ;;  %v703_v44 = vld [vmem:[%s911_s0 + $0x64] ss:$16 sps:$4 sm:$0xff]   ;;  %v705_v45 = vld [vmem:[%s911_s0 + $0x6c] ss:$16 sps:$4 sm:$0xff]   ;;  %v707_v46 = vld [vmem:[%s911_s0 + $0x60] ss:$16 sps:$4 sm:$0xff]  }
  0x12   :  { %621 = vmatprep.subr.bf16.mxu1 %v670_v17  ;;  %v708_v47 = vld [vmem:[%s911_s0 + $0x68] ss:$16 sps:$4 sm:$0xff]  }
  0x14   :  { %582 = vmatpush3.bf16.msra.mxu0 %v671_v18 }
  0x15   :  { %622 = vmatpush3.bf16.msra.mxu1 %v672_v19  ;;  %583 = vmatprep.subr.bf16.mxu0 %v673_v20 }
  0x16   :  { %623 = vmatprep.subr.bf16.mxu1 %v674_v21 }
  0x18   :  { %584 = vmatpush3.bf16.msra.mxu0 %v675_v22 }
  0x19   :  { %624 = vmatpush3.bf16.msra.mxu1 %v676_v23  ;;  %585 = vmatprep.subr.bf16.mxu0 %v677_v24 }
  0x1a   :  { %625 = vmatprep.subr.bf16.mxu1 %v678_v25 }
  0x1c   :  { %586 = vmatpush3.bf16.msra.mxu0 %v679_v26 }
  0x1d   :  { %626 = vmatpush3.bf16.msra.mxu1 %v680_v27  ;;  %587 = vmatprep.subr.bf16.mxu0 %v681_v28 }
  0x1e   :  { %627 = vmatprep.subr.bf16.mxu1 %v682_v29 }
  0x20   :  { %588 = vmatpush3.bf16.msra.mxu0 %v683_v30 }
  0x21   :  { %628 = vmatpush3.bf16.msra.mxu1 %v684_v31 }
  0x23   :  { %407 = vmatmul.mubr.bf16.vlgmr.msra.gmra.mrb[0].mxu0 %v685_v32 }
  0x24   :  { %472 = vmatmul.mubr.bf16.vlgmr.msra.gmra.mrb[0].mxu1 %v688_v34  ;;  %414 = vmatprep.mubr.bf16.mxu0 %v691_v36 }
  0x25   :  { %479 = vmatprep.mubr.bf16.mxu1 %v693_v37 }
  0x2b   :  { %415 = vmatmul.mubr.bf16.gmra.mrb[4].mxu0 %v695_v38 }
  0x2c   :  { %480 = vmatmul.mubr.bf16.gmra.mrb[4].mxu1 %v696_v39  ;;  %422 = vmatprep.mubr.bf16.mxu0 %v697_v40 }
  0x2d   :  { %487 = vmatprep.mubr.bf16.mxu1 %v699_v41 }
  0x33   :  { %423 = vmatmul.mubr.bf16.gmra.mrb[8].mxu0 %v701_v42 }
  0x34   :  { %488 = vmatmul.mubr.bf16.gmra.mrb[8].mxu1 %v702_v43  ;;  %430 = vmatprep.mubr.bf16.mxu0 %v703_v44 }
  0x35   :  { %495 = vmatprep.mubr.bf16.mxu1 %v705_v45 }
  0x3b   :  { %431 = vmatmul.mubr.bf16.gmra.mrb[12].mxu0 %v707_v46 }
  0x3c   :  { %496 = vmatmul.mubr.bf16.gmra.mrb[12].mxu1 %v708_v47 }
  0xf6   :  { %v589_v48 = vpop.f32.mrb[0].mxu0 }
  0xf7   :  { %v629_v49 = vpop.f32.mrb[0].mxu1  ;;  %v590_v51 = vpop.f32.mrb[1].mxu0 }
  0xf8   :  { %v591_v52 = vadd.f32 %v590_v51, %v589_v48  ;;  %v630_v53 = vpop.f32.mrb[1].mxu1  ;;  %v592_v54 = vpop.f32.mrb[2].mxu0 }
  0xf9   :  { %v631_v55 = vadd.f32 %v630_v53, %v629_v49  ;;  %v632_v56 = vpop.f32.mrb[2].mxu1  ;;  %v593_v57 = vpop.f32.mrb[3].mxu0 }
  0xfa   :  { %v409_v58 = vadd.f32 %v591_v52, %v876_v50  ;;  %v594_v59 = vadd.f32 %v593_v57, %v592_v54  ;;  %v633_v60 = vpop.f32.mrb[3].mxu1 }
  0xfb   :  { %v634_v61 = vadd.f32 %v633_v60, %v632_v56 }
  0xfc   :  { %v474_v62 = vadd.f32 %v631_v55, %v409_v58  ;;  %v412_v63 = vadd.f32 %v594_v59, %v876_v50 }
  0xfe   :  { %v504_v0 = vmax.f32 %v474_v62, 0.0  ;;  %v477_v1 = vadd.f32 %v634_v61, %v412_v63  ;;  %v595_v2 = vpop.f32.mrb[4].mxu0 }
  0xff   :  { %v635_v3 = vpop.f32.mrb[4].mxu1  ;;  %v596_v4 = vpop.f32.mrb[5].mxu0 }
 0x100   :  { %512 = vst [vmem:[%s913_s3] sm:$0xff] %v504_v0  ;;  %v505_v5 = vmax.f32 %v477_v1, 0.0  ;;  %v597_v6 = vadd.f32 %v596_v4, %v595_v2  ;;  %v636_v7 = vpop.f32.mrb[5].mxu1  ;;  %v598_v8 = vpop.f32.mrb[6].mxu0 }
 0x101   :  { %v637_v9 = vadd.f32 %v636_v7, %v635_v3  ;;  %v638_v10 = vpop.f32.mrb[6].mxu1  ;;  %v599_v11 = vpop.f32.mrb[7].mxu0 }
 0x102   :  { %513 = vst [vmem:[%s913_s3 + $0x8] sm:$0xff] %v505_v5  ;;  %v417_v12 = vadd.f32 %v597_v6, %v876_v50  ;;  %v600_v13 = vadd.f32 %v599_v11, %v598_v8  ;;  %v639_v14 = vpop.f32.mrb[7].mxu1 }
 0x103   :  { %v640_v15 = vadd.f32 %v639_v14, %v638_v10 }
 0x104   :  { %v482_v16 = vadd.f32 %v637_v9, %v417_v12  ;;  %v420_v17 = vadd.f32 %v600_v13, %v876_v50 }
 0x106   :  { %v506_v18 = vmax.f32 %v482_v16, 0.0  ;;  %v485_v19 = vadd.f32 %v640_v15, %v420_v17  ;;  %v601_v20 = vpop.f32.mrb[8].mxu0 }
 0x107   :  { %v641_v21 = vpop.f32.mrb[8].mxu1  ;;  %v602_v22 = vpop.f32.mrb[9].mxu0 }
 0x108   :  { %514 = vst [vmem:[%s913_s3 + $0x10] sm:$0xff] %v506_v18  ;;  %v507_v23 = vmax.f32 %v485_v19, 0.0  ;;  %v603_v24 = vadd.f32 %v602_v22, %v601_v20  ;;  %v642_v25 = vpop.f32.mrb[9].mxu1  ;;  %v604_v26 = vpop.f32.mrb[10].mxu0 }
 0x109   :  { %v643_v27 = vadd.f32 %v642_v25, %v641_v21  ;;  %v644_v28 = vpop.f32.mrb[10].mxu1  ;;  %v605_v29 = vpop.f32.mrb[11].mxu0 }
 0x10a   :  { %515 = vst [vmem:[%s913_s3 + $0x18] sm:$0xff] %v507_v23  ;;  %v425_v30 = vadd.f32 %v603_v24, %v876_v50  ;;  %v606_v31 = vadd.f32 %v605_v29, %v604_v26  ;;  %v645_v32 = vpop.f32.mrb[11].mxu1 }
 0x10b   :  { %v646_v33 = vadd.f32 %v645_v32, %v644_v28 }
 0x10c   :  { %v490_v34 = vadd.f32 %v643_v27, %v425_v30  ;;  %v428_v35 = vadd.f32 %v606_v31, %v876_v50 }
 0x10e   :  { %v508_v36 = vmax.f32 %v490_v34, 0.0  ;;  %v493_v37 = vadd.f32 %v646_v33, %v428_v35  ;;  %v607_v38 = vpop.f32.mrb[12].mxu0 }
 0x10f   :  { %v647_v39 = vpop.f32.mrb[12].mxu1  ;;  %v608_v40 = vpop.f32.mrb[13].mxu0 }
 0x110   :  { %516 = vst [vmem:[%s913_s3 + $0x20] sm:$0xff] %v508_v36  ;;  %v509_v41 = vmax.f32 %v493_v37, 0.0  ;;  %v609_v42 = vadd.f32 %v608_v40, %v607_v38  ;;  %v648_v43 = vpop.f32.mrb[13].mxu1  ;;  %v610_v44 = vpop.f32.mrb[14].mxu0 }
 0x111   :  { %v649_v45 = vadd.f32 %v648_v43, %v647_v39  ;;  %v650_v46 = vpop.f32.mrb[14].mxu1  ;;  %v611_v47 = vpop.f32.mrb[15].mxu0 }
 0x112   :  { %517 = vst [vmem:[%s913_s3 + $0x28] sm:$0xff] %v509_v41  ;;  %v433_v48 = vadd.f32 %v609_v42, %v876_v50  ;;  %v612_v49 = vadd.f32 %v611_v47, %v610_v44  ;;  %v651_v51 = vpop.f32.mrb[15].mxu1 }
 0x113   :  { %v652_v52 = vadd.f32 %v651_v51, %v650_v46 }
 0x114   :  { %v498_v53 = vadd.f32 %v649_v45, %v433_v48  ;;  %v436_v54 = vadd.f32 %v612_v49, %v876_v50 }
 0x116   :  { %v510_v55 = vmax.f32 %v498_v53, 0.0  ;;  %v501_v56 = vadd.f32 %v652_v52, %v436_v54 }
 0x118   :  { %518 = vst [vmem:[%s913_s3 + $0x30] sm:$0xff] %v510_v55  ;;  %v511_v57 = vmax.f32 %v501_v56, 0.0 }
 0x11a   :  { %519 = vst [vmem:[%s913_s3 + $0x38] sm:$0xff] %v511_v57 }

// kernel: _lambda_.26
= control target key start
LH: loop header
LB: loop body
LE: loop exit
PB: predicated region body
PF: predicated region fallthrough
CT: control target
= control target key end

     0   :  { %s625_s1 = inlined_call_operand.vmem [shape: bf16[512,128], index: 1, kind: input, shape index: {}]   ;;  %s626_s0 = inlined_call_operand.vmem [shape: bf16[8,512], index: 0, kind: input, shape index: {}]   ;;  %s627_s2 = inlined_call_operand.vmem [shape: f32[1,128], index: 2, kind: input, shape index: {}]   ;;  %s628_s3 = inlined_call_operand.vmem [shape: f32[8,128], index: 3, kind: output, shape index: {}]  }
   0x1   :  { %v461_v0 = vld [vmem:[%s625_s1 + $0x40] sm:$0xff]   ;;  %v465_v4 = vld [vmem:[%s625_s1 + $0x48] sm:$0xff]   ;;  %v469_v8 = vld [vmem:[%s625_s1 + $0x50] sm:$0xff]  }
   0x2   :  { %v462_v1 = vld [vmem:[%s625_s1 + $0xc0] sm:$0xff]   ;;  %417 = vmatprep.subr.bf16.mxu0 %v461_v0  ;;  %v466_v5 = vld [vmem:[%s625_s1 + $0xc8] sm:$0xff]   ;;  %v470_v9 = vld [vmem:[%s625_s1 + $0xd0] sm:$0xff]  }
   0x3   :  { %v463_v2 = vld [vmem:[%s625_s1] sm:$0xff]   ;;  %439 = vmatprep.subr.bf16.mxu1 %v462_v1  ;;  %v467_v6 = vld [vmem:[%s625_s1 + $0x8] sm:$0xff]   ;;  %v471_v10 = vld [vmem:[%s625_s1 + $0x10] sm:$0xff]  }
   0x4   :  { %v464_v3 = vld [vmem:[%s625_s1 + $0x80] sm:$0xff]   ;;  %418 = vmatpush3.bf16.msra.mxu0 %v463_v2  ;;  %v468_v7 = vld [vmem:[%s625_s1 + $0x88] sm:$0xff]   ;;  %v472_v11 = vld [vmem:[%s625_s1 + $0x90] sm:$0xff]  }
   0x5   :  { %440 = vmatpush3.bf16.msra.mxu1 %v464_v3  ;;  %419 = vmatprep.subr.bf16.mxu0 %v465_v4  ;;  %v473_v12 = vld [vmem:[%s625_s1 + $0x58] sm:$0xff]   ;;  %v477_v16 = vld [vmem:[%s625_s1 + $0x60] sm:$0xff]   ;;  %v481_v20 = vld [vmem:[%s625_s1 + $0x68] sm:$0xff]  }
   0x6   :  { %441 = vmatprep.subr.bf16.mxu1 %v466_v5  ;;  %v474_v13 = vld [vmem:[%s625_s1 + $0xd8] sm:$0xff]   ;;  %v478_v17 = vld [vmem:[%s625_s1 + $0xe0] sm:$0xff]   ;;  %v482_v21 = vld [vmem:[%s625_s1 + $0xe8] sm:$0xff]  }
   0x7   :  { %v475_v14 = vld [vmem:[%s625_s1 + $0x18] sm:$0xff]   ;;  %v479_v18 = vld [vmem:[%s625_s1 + $0x20] sm:$0xff]   ;;  %v483_v22 = vld [vmem:[%s625_s1 + $0x28] sm:$0xff]  }
   0x8   :  { %420 = vmatpush3.bf16.msra.mxu0 %v467_v6  ;;  %v476_v15 = vld [vmem:[%s625_s1 + $0x98] sm:$0xff]   ;;  %v480_v19 = vld [vmem:[%s625_s1 + $0xa0] sm:$0xff]   ;;  %v484_v23 = vld [vmem:[%s625_s1 + $0xa8] sm:$0xff]  }
   0x9   :  { %442 = vmatpush3.bf16.msra.mxu1 %v468_v7  ;;  %421 = vmatprep.subr.bf16.mxu0 %v469_v8  ;;  %v485_v24 = vld [vmem:[%s625_s1 + $0x70] sm:$0xff]   ;;  %v489_v28 = vld [vmem:[%s625_s1 + $0x78] sm:$0xff]   ;;  %v15_v32 = vld [vmem:[%s626_s0] sm:$0xff] }
   0xa   :  { %443 = vmatprep.subr.bf16.mxu1 %v470_v9  ;;  %v486_v25 = vld [vmem:[%s625_s1 + $0xf0] sm:$0xff]   ;;  %v490_v29 = vld [vmem:[%s625_s1 + $0xf8] sm:$0xff]   ;;  %v16_v33 = vld [vmem:[%s626_s0 + $0x8] sm:$0xff]  ;;  %v381_v34 = vcombine.low %v15_v32, %v15_v32  ;;  %v382_v35 = vcombine.high %v15_v32, %v15_v32 }
   0xb   :  { %v487_v26 = vld [vmem:[%s625_s1 + $0x30] sm:$0xff]   ;;  %v491_v30 = vld [vmem:[%s625_s1 + $0x38] sm:$0xff]   ;;  %v383_v36 = vcombine.low %v16_v33, %v16_v33  ;;  %v384_v37 = vcombine.high %v16_v33, %v16_v33  ;;  %v380_v40 = vld [vmem:[%s627_s2] ss:$0 sm:$0xff] }
   0xc   :  { %422 = vmatpush3.bf16.msra.mxu0 %v471_v10  ;;  %v488_v27 = vld [vmem:[%s625_s1 + $0xb0] sm:$0xff]   ;;  %v492_v31 = vld [vmem:[%s625_s1 + $0xb8] sm:$0xff]   ;;  %326 = vmatprep.mubr.bf16.mxu0 %v382_v35 }
   0xd   :  { %444 = vmatpush3.bf16.msra.mxu1 %v472_v11  ;;  %423 = vmatprep.subr.bf16.mxu0 %v473_v12 }
   0xe   :  { %445 = vmatprep.subr.bf16.mxu1 %v474_v13  ;;  %366 = vmatprep.mubr.bf16.mxu1 %v384_v37 }
  0x10   :  { %424 = vmatpush3.bf16.msra.mxu0 %v475_v14 }
  0x11   :  { %446 = vmatpush3.bf16.msra.mxu1 %v476_v15  ;;  %425 = vmatprep.subr.bf16.mxu0 %v477_v16 }
  0x12   :  { %447 = vmatprep.subr.bf16.mxu1 %v478_v17 }
  0x14   :  { %426 = vmatpush3.bf16.msra.mxu0 %v479_v18 }
  0x15   :  { %448 = vmatpush3.bf16.msra.mxu1 %v480_v19  ;;  %427 = vmatprep.subr.bf16.mxu0 %v481_v20 }
  0x16   :  { %449 = vmatprep.subr.bf16.mxu1 %v482_v21 }
  0x18   :  { %428 = vmatpush3.bf16.msra.mxu0 %v483_v22 }
  0x19   :  { %450 = vmatpush3.bf16.msra.mxu1 %v484_v23  ;;  %429 = vmatprep.subr.bf16.mxu0 %v485_v24 }
  0x1a   :  { %451 = vmatprep.subr.bf16.mxu1 %v486_v25 }
  0x1c   :  { %430 = vmatpush3.bf16.msra.mxu0 %v487_v26 }
  0x1d   :  { %452 = vmatpush3.bf16.msra.mxu1 %v488_v27  ;;  %431 = vmatprep.subr.bf16.mxu0 %v489_v28 }
  0x1e   :  { %453 = vmatprep.subr.bf16.mxu1 %v490_v29 }
  0x20   :  { %432 = vmatpush3.bf16.msra.mxu0 %v491_v30 }
  0x21   :  { %454 = vmatpush3.bf16.msra.mxu1 %v492_v31 }
  0x23   :  { %327 = vmatmul.mubr.bf16.vlgmr.msra.gmra.mrb[0].mxu0 %v381_v34 }
  0x24   :  { %367 = vmatmul.mubr.bf16.vlgmr.msra.gmra.mrb[0].mxu1 %v383_v36 }
  0xf6   :  { %v433_v38 = vpop.f32.mrb[0].mxu0 }
  0xf7   :  { %v455_v39 = vpop.f32.mrb[0].mxu1  ;;  %v434_v41 = vpop.f32.mrb[1].mxu0 }
  0xf8   :  { %v456_v42 = vpop.f32.mrb[1].mxu1  ;;  %v435_v43 = vadd.f32 %v434_v41, %v433_v38  ;;  %v436_v45 = vpop.f32.mrb[2].mxu0 }
  0xf9   :  { %v457_v44 = vadd.f32 %v456_v42, %v455_v39  ;;  %v458_v46 = vpop.f32.mrb[2].mxu1  ;;  %v437_v47 = vpop.f32.mrb[3].mxu0 }
  0xfa   :  { %v459_v48 = vpop.f32.mrb[3].mxu1  ;;  %v329_v49 = vadd.f32 %v435_v43, %v380_v40 }
  0xfc   :  { %v369_v50 = vadd.f32 %v457_v44, %v329_v49 }
  0xfe   :  { %v374_v51 = vmax.f32 %v369_v50, 0.0 }
 0x100   :  { %375 = vst [vmem:[%s628_s3] sm:$0xff] %v374_v51 }

// kernel: _lambda_.25
= control target key start
LH: loop header
LB: loop body
LE: loop exit
PB: predicated region body
PF: predicated region fallthrough
CT: control target
= control target key end

     0   :  { %s624_s1 = inlined_call_operand.vmem [shape: bf16[512,128], index: 1, kind: input, shape index: {}]   ;;  %s625_s0 = inlined_call_operand.vmem [shape: bf16[8,512], index: 0, kind: input, shape index: {}]   ;;  %s626_s2 = inlined_call_operand.vmem [shape: f32[1,128], index: 2, kind: input, shape index: {}]   ;;  %s627_s3 = inlined_call_operand.vmem [shape: f32[8,128], index: 3, kind: output, shape index: {}]  }
   0x1   :  { %v460_v0 = vld [vmem:[%s624_s1 + $0x40] sm:$0xff]   ;;  %v464_v4 = vld [vmem:[%s624_s1 + $0x48] sm:$0xff]   ;;  %v468_v8 = vld [vmem:[%s624_s1 + $0x50] sm:$0xff]  }
   0x2   :  { %v461_v1 = vld [vmem:[%s624_s1 + $0xc0] sm:$0xff]   ;;  %416 = vmatprep.subr.bf16.mxu0 %v460_v0  ;;  %v465_v5 = vld [vmem:[%s624_s1 + $0xc8] sm:$0xff]   ;;  %v469_v9 = vld [vmem:[%s624_s1 + $0xd0] sm:$0xff]  }
   0x3   :  { %v462_v2 = vld [vmem:[%s624_s1] sm:$0xff]   ;;  %438 = vmatprep.subr.bf16.mxu1 %v461_v1  ;;  %v466_v6 = vld [vmem:[%s624_s1 + $0x8] sm:$0xff]   ;;  %v470_v10 = vld [vmem:[%s624_s1 + $0x10] sm:$0xff]  }
   0x4   :  { %v463_v3 = vld [vmem:[%s624_s1 + $0x80] sm:$0xff]   ;;  %417 = vmatpush3.bf16.msra.mxu0 %v462_v2  ;;  %v467_v7 = vld [vmem:[%s624_s1 + $0x88] sm:$0xff]   ;;  %v471_v11 = vld [vmem:[%s624_s1 + $0x90] sm:$0xff]  }
   0x5   :  { %439 = vmatpush3.bf16.msra.mxu1 %v463_v3  ;;  %418 = vmatprep.subr.bf16.mxu0 %v464_v4  ;;  %v472_v12 = vld [vmem:[%s624_s1 + $0x58] sm:$0xff]   ;;  %v476_v16 = vld [vmem:[%s624_s1 + $0x60] sm:$0xff]   ;;  %v480_v20 = vld [vmem:[%s624_s1 + $0x68] sm:$0xff]  }
   0x6   :  { %440 = vmatprep.subr.bf16.mxu1 %v465_v5  ;;  %v473_v13 = vld [vmem:[%s624_s1 + $0xd8] sm:$0xff]   ;;  %v477_v17 = vld [vmem:[%s624_s1 + $0xe0] sm:$0xff]   ;;  %v481_v21 = vld [vmem:[%s624_s1 + $0xe8] sm:$0xff]  }
   0x7   :  { %v474_v14 = vld [vmem:[%s624_s1 + $0x18] sm:$0xff]   ;;  %v478_v18 = vld [vmem:[%s624_s1 + $0x20] sm:$0xff]   ;;  %v482_v22 = vld [vmem:[%s624_s1 + $0x28] sm:$0xff]  }
   0x8   :  { %419 = vmatpush3.bf16.msra.mxu0 %v466_v6  ;;  %v475_v15 = vld [vmem:[%s624_s1 + $0x98] sm:$0xff]   ;;  %v479_v19 = vld [vmem:[%s624_s1 + $0xa0] sm:$0xff]   ;;  %v483_v23 = vld [vmem:[%s624_s1 + $0xa8] sm:$0xff]  }
   0x9   :  { %441 = vmatpush3.bf16.msra.mxu1 %v467_v7  ;;  %420 = vmatprep.subr.bf16.mxu0 %v468_v8  ;;  %v484_v24 = vld [vmem:[%s624_s1 + $0x70] sm:$0xff]   ;;  %v488_v28 = vld [vmem:[%s624_s1 + $0x78] sm:$0xff]   ;;  %v15_v32 = vld [vmem:[%s625_s0] sm:$0xff] }
   0xa   :  { %442 = vmatprep.subr.bf16.mxu1 %v469_v9  ;;  %v485_v25 = vld [vmem:[%s624_s1 + $0xf0] sm:$0xff]   ;;  %v489_v29 = vld [vmem:[%s624_s1 + $0xf8] sm:$0xff]   ;;  %v16_v33 = vld [vmem:[%s625_s0 + $0x8] sm:$0xff]  ;;  %v380_v34 = vcombine.low %v15_v32, %v15_v32  ;;  %v381_v35 = vcombine.high %v15_v32, %v15_v32 }
   0xb   :  { %v486_v26 = vld [vmem:[%s624_s1 + $0x30] sm:$0xff]   ;;  %v490_v30 = vld [vmem:[%s624_s1 + $0x38] sm:$0xff]   ;;  %v382_v36 = vcombine.low %v16_v33, %v16_v33  ;;  %v383_v37 = vcombine.high %v16_v33, %v16_v33  ;;  %v379_v40 = vld [vmem:[%s626_s2] ss:$0 sm:$0xff] }
   0xc   :  { %421 = vmatpush3.bf16.msra.mxu0 %v470_v10  ;;  %v487_v27 = vld [vmem:[%s624_s1 + $0xb0] sm:$0xff]   ;;  %v491_v31 = vld [vmem:[%s624_s1 + $0xb8] sm:$0xff]   ;;  %326 = vmatprep.mubr.bf16.mxu0 %v381_v35 }
   0xd   :  { %443 = vmatpush3.bf16.msra.mxu1 %v471_v11  ;;  %422 = vmatprep.subr.bf16.mxu0 %v472_v12 }
   0xe   :  { %444 = vmatprep.subr.bf16.mxu1 %v473_v13  ;;  %366 = vmatprep.mubr.bf16.mxu1 %v383_v37 }
  0x10   :  { %423 = vmatpush3.bf16.msra.mxu0 %v474_v14 }
  0x11   :  { %445 = vmatpush3.bf16.msra.mxu1 %v475_v15  ;;  %424 = vmatprep.subr.bf16.mxu0 %v476_v16 }
  0x12   :  { %446 = vmatprep.subr.bf16.mxu1 %v477_v17 }
  0x14   :  { %425 = vmatpush3.bf16.msra.mxu0 %v478_v18 }
  0x15   :  { %447 = vmatpush3.bf16.msra.mxu1 %v479_v19  ;;  %426 = vmatprep.subr.bf16.mxu0 %v480_v20 }
  0x16   :  { %448 = vmatprep.subr.bf16.mxu1 %v481_v21 }
  0x18   :  { %427 = vmatpush3.bf16.msra.mxu0 %v482_v22 }
  0x19   :  { %449 = vmatpush3.bf16.msra.mxu1 %v483_v23  ;;  %428 = vmatprep.subr.bf16.mxu0 %v484_v24 }
  0x1a   :  { %450 = vmatprep.subr.bf16.mxu1 %v485_v25 }
  0x1c   :  { %429 = vmatpush3.bf16.msra.mxu0 %v486_v26 }
  0x1d   :  { %451 = vmatpush3.bf16.msra.mxu1 %v487_v27  ;;  %430 = vmatprep.subr.bf16.mxu0 %v488_v28 }
  0x1e   :  { %452 = vmatprep.subr.bf16.mxu1 %v489_v29 }
  0x20   :  { %431 = vmatpush3.bf16.msra.mxu0 %v490_v30 }
  0x21   :  { %453 = vmatpush3.bf16.msra.mxu1 %v491_v31 }
  0x23   :  { %327 = vmatmul.mubr.bf16.vlgmr.msra.gmra.mrb[0].mxu0 %v380_v34 }
  0x24   :  { %367 = vmatmul.mubr.bf16.vlgmr.msra.gmra.mrb[0].mxu1 %v382_v36 }
  0xf6   :  { %v432_v38 = vpop.f32.mrb[0].mxu0 }
  0xf7   :  { %v454_v39 = vpop.f32.mrb[0].mxu1  ;;  %v433_v41 = vpop.f32.mrb[1].mxu0 }
  0xf8   :  { %v455_v42 = vpop.f32.mrb[1].mxu1  ;;  %v434_v43 = vadd.f32 %v433_v41, %v432_v38  ;;  %v435_v45 = vpop.f32.mrb[2].mxu0 }
  0xf9   :  { %v456_v44 = vadd.f32 %v455_v42, %v454_v39  ;;  %v457_v46 = vpop.f32.mrb[2].mxu1  ;;  %v436_v47 = vpop.f32.mrb[3].mxu0 }
  0xfa   :  { %v458_v48 = vpop.f32.mrb[3].mxu1  ;;  %v329_v49 = vadd.f32 %v434_v43, %v379_v40 }
  0xfc   :  { %v369_v50 = vadd.f32 %v456_v44, %v329_v49 }
  0xfe   :  { %374 = vst [vmem:[%s627_s3] sm:$0xff] %v369_v50 }

// kernel: _lambda_.28
= control target key start
LH: loop header
LB: loop body
LE: loop exit
PB: predicated region body
PF: predicated region fallthrough
CT: control target
= control target key end

     0   :  { %v889_v42 = vmov 0.0   ;;  %vm890_vm0 = vmmov 0   ;;  %s1097_s1 = inlined_call_operand.vmem [shape: bf16[896,128], index: 1, kind: input, shape index: {}]   ;;  %s1098_s0 = inlined_call_operand.vmem [shape: bf16[8,896], index: 0, kind: input, shape index: {}]   ;;  %s1099_s2 = inlined_call_operand.vmem [shape: f32[1,128], index: 2, kind: input, shape index: {}]   ;;  %s1100_s3 = inlined_call_operand.vmem [shape: f32[8,128], index: 3, kind: output, shape index: {}]  }
   0x1   :  { %v826_v0 = vld [vmem:[%s1097_s1 + $0x40] sm:$0xff]   ;;  %v830_v4 = vld [vmem:[%s1097_s1 + $0x48] sm:$0xff]   ;;  %v834_v8 = vld [vmem:[%s1097_s1 + $0x50] sm:$0xff]  }
   0x2   :  { %v827_v1 = vld [vmem:[%s1097_s1] sm:$0xff]   ;;  %729 = vmatprep.subr.bf16.mxu0 %v826_v0  ;;  %v831_v5 = vld [vmem:[%s1097_s1 + $0x8] sm:$0xff]   ;;  %v835_v9 = vld [vmem:[%s1097_s1 + $0x10] sm:$0xff]  }
   0x3   :  { %v828_v2 = vld [vmem:[%s1097_s1 + $0xc0] sm:$0xff]   ;;  %730 = vmatpush3.bf16.msra.mxu0 %v827_v1  ;;  %v832_v6 = vld [vmem:[%s1097_s1 + $0xc8] sm:$0xff]   ;;  %v836_v10 = vld [vmem:[%s1097_s1 + $0xd0] sm:$0xff]  }
   0x4   :  { %v829_v3 = vld [vmem:[%s1097_s1 + $0x80] sm:$0xff]   ;;  %751 = vmatprep.subr.bf16.mxu1 %v828_v2  ;;  %731 = vmatprep.subr.bf16.mxu0 %v830_v4  ;;  %v833_v7 = vld [vmem:[%s1097_s1 + $0x88] sm:$0xff]   ;;  %v837_v11 = vld [vmem:[%s1097_s1 + $0x90] sm:$0xff]  }
   0x5   :  { %752 = vmatpush3.bf16.msra.mxu1 %v829_v3  ;;  %v838_v12 = vld [vmem:[%s1097_s1 + $0x58] sm:$0xff]   ;;  %v842_v16 = vld [vmem:[%s1097_s1 + $0x60] sm:$0xff]   ;;  %v846_v20 = vld [vmem:[%s1097_s1 + $0x68] sm:$0xff]  }
   0x6   :  { %753 = vmatprep.subr.bf16.mxu1 %v832_v6  ;;  %v839_v13 = vld [vmem:[%s1097_s1 + $0x18] sm:$0xff]   ;;  %v843_v17 = vld [vmem:[%s1097_s1 + $0x20] sm:$0xff]   ;;  %v847_v21 = vld [vmem:[%s1097_s1 + $0x28] sm:$0xff]  }
   0x7   :  { %732 = vmatpush3.bf16.msra.mxu0 %v831_v5  ;;  %v840_v14 = vld [vmem:[%s1097_s1 + $0xd8] sm:$0xff]   ;;  %v844_v18 = vld [vmem:[%s1097_s1 + $0xe0] sm:$0xff]   ;;  %v848_v22 = vld [vmem:[%s1097_s1 + $0xe8] sm:$0xff]  }
   0x8   :  { %733 = vmatprep.subr.bf16.mxu0 %v834_v8  ;;  %v841_v15 = vld [vmem:[%s1097_s1 + $0x98] sm:$0xff]   ;;  %v845_v19 = vld [vmem:[%s1097_s1 + $0xa0] sm:$0xff]   ;;  %v849_v23 = vld [vmem:[%s1097_s1 + $0xa8] sm:$0xff]  }
   0x9   :  { %754 = vmatpush3.bf16.msra.mxu1 %v833_v7  ;;  %v850_v24 = vld [vmem:[%s1097_s1 + $0x70] sm:$0xff]   ;;  %v854_v28 = vld [vmem:[%s1097_s1 + $0x78] sm:$0xff]   ;;  %v15_v31 = vld [vmem:[%s1098_s0] sm:$0xff] }
   0xa   :  { %755 = vmatprep.subr.bf16.mxu1 %v836_v10  ;;  %v851_v25 = vld [vmem:[%s1097_s1 + $0x30] sm:$0xff]   ;;  %v855_v29 = vld [vmem:[%s1097_s1 + $0x38] sm:$0xff]   ;;  %v666_v32 = vcombine.low %v15_v31, %v15_v31  ;;  %v667_v33 = vcombine.high %v15_v31, %v15_v31  ;;  %v860_v35 = vld [vmem:[%s1097_s1 + $0x140] sm:$0xff]  }
   0xb   :  { %734 = vmatpush3.bf16.msra.mxu0 %v835_v9  ;;  %v852_v26 = vld [vmem:[%s1097_s1 + $0xf0] sm:$0xff]   ;;  %v856_v30 = vld [vmem:[%s1097_s1 + $0xf8] sm:$0xff]   ;;  %v16_v36 = vld [vmem:[%s1098_s0 + $0x8] sm:$0xff] }
   0xc   :  { %735 = vmatprep.subr.bf16.mxu0 %v838_v12  ;;  %v853_v27 = vld [vmem:[%s1097_s1 + $0xb0] sm:$0xff]   ;;  %v859_v34 = vld [vmem:[%s1097_s1 + $0xb8] sm:$0xff]   ;;  %531 = vmatprep.mubr.bf16.mxu0 %v667_v33  ;;  %v668_v37 = vcombine.low %v16_v36, %v16_v36  ;;  %v669_v38 = vcombine.high %v16_v36, %v16_v36  ;;  %v863_v39 = vld [vmem:[%s1097_s1 + $0x100] sm:$0xff]  }
   0xd   :  { %756 = vmatpush3.bf16.msra.mxu1 %v837_v11  ;;  %v864_v40 = vld [vmem:[%s1097_s1 + $0x180] sm:$0xff]   ;;  %v865_v41 = vld [vmem:[%s1097_s1 + $0x148] sm:$0xff]   ;;  %v868_v45 = vld [vmem:[%s1097_s1 + $0x150] sm:$0xff]  }
   0xe   :  { %757 = vmatprep.subr.bf16.mxu1 %v840_v14  ;;  %571 = vmatprep.mubr.bf16.mxu1 %v669_v38  ;;  %v866_v43 = vld [vmem:[%s1097_s1 + $0x108] sm:$0xff]   ;;  %v869_v46 = vld [vmem:[%s1097_s1 + $0x110] sm:$0xff]   ;;  %v871_v48 = vld [vmem:[%s1097_s1 + $0x158] sm:$0xff]  }
   0xf   :  { %736 = vmatpush3.bf16.msra.mxu0 %v839_v13  ;;  %v867_v44 = vld [vmem:[%s1097_s1 + $0x188] sm:$0xff]   ;;  %v870_v47 = vld [vmem:[%s1097_s1 + $0x190] sm:$0xff]   ;;  %v872_v49 = vld [vmem:[%s1097_s1 + $0x118] sm:$0xff]  }
  0x10   :  { %737 = vmatprep.subr.bf16.mxu0 %v842_v16  ;;  %v874_v50 = vld [vmem:[%s1097_s1 + $0x160] sm:$0xff]   ;;  %v873_v51 = vld [vmem:[%s1097_s1 + $0x198] sm:$0xff]   ;;  %v877_v53 = vld [vmem:[%s1097_s1 + $0x168] sm:$0xff]  }
  0x11   :  { %758 = vmatpush3.bf16.msra.mxu1 %v841_v15  ;;  %v875_v52 = vld [vmem:[%s1097_s1 + $0x120] sm:$0xff]   ;;  %v878_v55 = vld [vmem:[%s1097_s1 + $0x128] sm:$0xff]   ;;  %v880_v56 = vld [vmem:[%s1097_s1 + $0x170] sm:$0xff]  }
  0x12   :  { %759 = vmatprep.subr.bf16.mxu1 %v844_v18  ;;  %v876_v54 = vld [vmem:[%s1097_s1 + $0x1a0] sm:$0xff]   ;;  %v879_v57 = vld [vmem:[%s1097_s1 + $0x1a8] sm:$0xff]   ;;  %v17_v58 = vld [vmem:[%s1098_s0 + $0x10] sm:$0xff] }
  0x13   :  { %738 = vmatpush3.bf16.msra.mxu0 %v843_v17  ;;  %v881_v59 = vld [vmem:[%s1097_s1 + $0x130] sm:$0xff]   ;;  %v671_v60 = vcombine.high %v17_v58, %v17_v58  ;;  %v883_v61 = vld [vmem:[%s1097_s1 + $0x178] sm:$0xff]   ;;  %v670_v1 = vcombine.low %v17_v58, %v17_v58  ;;  %v665_v4 = vld [vmem:[%s1099_s2] ss:$0 sm:$0xff] }
  0x14   :  { %739 = vmatprep.subr.bf16.mxu0 %v846_v20  ;;  %v882_v62 = vld [vmem:[%s1097_s1 + $0x1b0] sm:$0xff]   ;;  %v884_v63 = vld [vmem:[%s1097_s1 + $0x138] sm:$0xff]  }
  0x15   :  { %760 = vmatpush3.bf16.msra.mxu1 %v845_v19  ;;  %v887_v0 = vld [vmem:[%s1097_s1 + $0x1b8] sm:$0xff]  }
  0x16   :  { %761 = vmatprep.subr.bf16.mxu1 %v848_v22  ;;  %v888_v2 = vld [vmem:[%s1098_s0 + $0x18] ss:$0 sps:$4 sm:$0xff]  }
  0x17   :  { %740 = vmatpush3.bf16.msra.mxu0 %v847_v21 }
  0x18   :  { %741 = vmatprep.subr.bf16.mxu0 %v850_v24 }
  0x19   :  { %762 = vmatpush3.bf16.msra.mxu1 %v849_v23 }
  0x1a   :  { %763 = vmatprep.subr.bf16.mxu1 %v852_v26 }
  0x1b   :  { %742 = vmatpush3.bf16.msra.mxu0 %v851_v25 }
  0x1c   :  { %743 = vmatprep.subr.bf16.mxu0 %v854_v28 }
  0x1d   :  { %764 = vmatpush3.bf16.msra.mxu1 %v853_v27 }
  0x1e   :  { %765 = vmatprep.subr.bf16.mxu1 %v856_v30 }
  0x1f   :  { %744 = vmatpush3.bf16.msra.mxu0 %v855_v29 }
  0x20   :  { %773 = vmatprep.subr.bf16.mxu0 %v860_v35 }
  0x21   :  { %766 = vmatpush3.bf16.msra.mxu1 %v859_v34 }
  0x22   :  { %532 = vmatmul.mubr.bf16.vlgmr.msra.gmra.mrb[0].mxu0 %v666_v32  ;;  %804 = vmatprep.subr.bf16.mxu1 %v889_v42 }
  0x23   :  { %774 = vmatpush3.bf16.msra.mxu0 %v863_v39  ;;  %611 = vmatprep.mubr.bf16.mxu0 %v671_v60 }
  0x24   :  { %572 = vmatmul.mubr.bf16.vlgmr.msra.gmra.mrb[0].mxu1 %v668_v37  ;;  %775 = vmatprep.subr.bf16.mxu0 %v865_v41 }
  0x25   :  { %805 = vmatpush3.bf16.msra.mxu1 %v864_v40  ;;  %820 = vmatprep.mubr.msk.bf16.mxu1 %vm890_vm0, %v889_v42 }
  0x26   :  { %806 = vmatprep.subr.bf16.mxu1 %v889_v42 }
  0x27   :  { %776 = vmatpush3.bf16.msra.mxu0 %v866_v43 }
  0x28   :  { %777 = vmatprep.subr.bf16.mxu0 %v868_v45 }
  0x29   :  { %807 = vmatpush3.bf16.msra.mxu1 %v867_v44 }
  0x2a   :  { %808 = vmatprep.subr.bf16.mxu1 %v889_v42 }
  0x2b   :  { %778 = vmatpush3.bf16.msra.mxu0 %v869_v46 }
  0x2c   :  { %779 = vmatprep.subr.bf16.mxu0 %v871_v48 }
  0x2d   :  { %809 = vmatpush3.bf16.msra.mxu1 %v870_v47 }
  0x2e   :  { %810 = vmatprep.subr.bf16.mxu1 %v889_v42 }
  0x2f   :  { %780 = vmatpush3.bf16.msra.mxu0 %v872_v49 }
  0x30   :  { %781 = vmatprep.subr.bf16.mxu0 %v874_v50 }
  0x31   :  { %811 = vmatpush3.bf16.msra.mxu1 %v873_v51 }
  0x32   :  { %812 = vmatprep.subr.bf16.mxu1 %v889_v42 }
  0x33   :  { %782 = vmatpush3.bf16.msra.mxu0 %v875_v52 }
  0x34   :  { %783 = vmatprep.subr.bf16.mxu0 %v877_v53 }
  0x35   :  { %813 = vmatpush3.bf16.msra.mxu1 %v876_v54 }
  0x36   :  { %814 = vmatprep.subr.bf16.mxu1 %v889_v42 }
  0x37   :  { %784 = vmatpush3.bf16.msra.mxu0 %v878_v55 }
  0x38   :  { %785 = vmatprep.subr.bf16.mxu0 %v880_v56 }
  0x39   :  { %815 = vmatpush3.bf16.msra.mxu1 %v879_v57 }
  0x3a   :  { %816 = vmatprep.subr.bf16.mxu1 %v889_v42 }
  0x3b   :  { %786 = vmatpush3.bf16.msra.mxu0 %v881_v59 }
  0x3c   :  { %787 = vmatprep.subr.bf16.mxu0 %v883_v61 }
  0x3d   :  { %817 = vmatpush3.bf16.msra.mxu1 %v882_v62 }
  0x3e   :  { %818 = vmatprep.subr.bf16.mxu1 %v889_v42 }
  0x3f   :  { %788 = vmatpush3.bf16.msra.mxu0 %v884_v63 }
  0x41   :  { %819 = vmatpush3.bf16.msra.mxu1 %v887_v0 }
  0x42   :  { %612 = vmatmul.mubr.bf16.vlgmr.msra.gmra.mrb[4].mxu0 %v670_v1 }
  0x44   :  { %821 = vmatmul.mubr.bf16.vlgmr.msra.gmra.mrb[4].mxu1 %v888_v2 }
  0xf5   :  { %v745_v3 = vpop.f32.mrb[0].mxu0 }
  0xf6   :  { %v746_v5 = vpop.f32.mrb[1].mxu0 }
  0xf7   :  { %v747_v6 = vadd.f32 %v746_v5, %v745_v3  ;;  %v748_v7 = vpop.f32.mrb[2].mxu0  ;;  %v767_v8 = vpop.f32.mrb[0].mxu1 }
  0xf8   :  { %v749_v9 = vpop.f32.mrb[3].mxu0  ;;  %v768_v10 = vpop.f32.mrb[1].mxu1 }
  0xf9   :  { %v534_v11 = vadd.f32 %v747_v6, %v665_v4  ;;  %v769_v12 = vadd.f32 %v768_v10, %v767_v8  ;;  %v770_v13 = vpop.f32.mrb[2].mxu1 }
  0xfa   :  { %v771_v14 = vpop.f32.mrb[3].mxu1 }
  0xfb   :  { %v574_v15 = vadd.f32 %v769_v12, %v534_v11 }
 0x115   :  { %v789_v16 = vpop.f32.mrb[4].mxu0 }
 0x116   :  { %v790_v17 = vpop.f32.mrb[5].mxu0 }
 0x117   :  { %v791_v18 = vadd.f32 %v790_v17, %v789_v16  ;;  %v792_v19 = vpop.f32.mrb[6].mxu0  ;;  %v653_v20 = vpop.f32.mrb[4].mxu1 }
 0x118   :  { %v793_v21 = vpop.f32.mrb[7].mxu0  ;;  %v822_v22 = vpop.f32.mrb[5].mxu1 }
 0x119   :  { %v614_v23 = vadd.f32 %v791_v18, %v574_v15  ;;  %v656_v24 = vpop.f32.mrb[6].mxu1 }
 0x11a   :  { %v823_v25 = vpop.f32.mrb[7].mxu1 }
 0x11b   :  { %v654_v26 = vadd.f32 %v653_v20, %v614_v23 }
 0x11d   :  { %v659_v27 = vmax.f32 %v654_v26, 0.0 }
 0x11f   :  { %660 = vst [vmem:[%s1100_s3] sm:$0xff] %v659_v27 }

// kernel: _lambda_.27
= control target key start
LH: loop header
LB: loop body
LE: loop exit
PB: predicated region body
PF: predicated region fallthrough
CT: control target
= control target key end

     0   :  { %v894_v42 = vmov 0.0   ;;  %vm895_vm0 = vmmov 0   ;;  %s1110_s1 = inlined_call_operand.vmem [shape: bf16[896,128], index: 1, kind: input, shape index: {}]   ;;  %s1111_s0 = inlined_call_operand.vmem [shape: bf16[8,896], index: 0, kind: input, shape index: {}]   ;;  %s1112_s2 = inlined_call_operand.vmem [shape: f32[1,128], index: 2, kind: input, shape index: {}]   ;;  %s1113_s3 = inlined_call_operand.vmem [shape: f32[8,128], index: 3, kind: input, shape index: {}, may-alias: {3,4}]   ;;  %s1114_s4 = inlined_call_operand.vmem [shape: f32[8,128], index: 4, kind: output, shape index: {}, may-alias: {3,4}]  }
   0x1   :  { %v831_v0 = vld [vmem:[%s1110_s1 + $0x40] sm:$0xff]   ;;  %v835_v4 = vld [vmem:[%s1110_s1 + $0x48] sm:$0xff]   ;;  %v839_v8 = vld [vmem:[%s1110_s1 + $0x50] sm:$0xff]  }
   0x2   :  { %v832_v1 = vld [vmem:[%s1110_s1] sm:$0xff]   ;;  %734 = vmatprep.subr.bf16.mxu0 %v831_v0  ;;  %v836_v5 = vld [vmem:[%s1110_s1 + $0x8] sm:$0xff]   ;;  %v840_v9 = vld [vmem:[%s1110_s1 + $0x10] sm:$0xff]  }
   0x3   :  { %v833_v2 = vld [vmem:[%s1110_s1 + $0xc0] sm:$0xff]   ;;  %735 = vmatpush3.bf16.msra.mxu0 %v832_v1  ;;  %v837_v6 = vld [vmem:[%s1110_s1 + $0xc8] sm:$0xff]   ;;  %v841_v10 = vld [vmem:[%s1110_s1 + $0xd0] sm:$0xff]  }
   0x4   :  { %v834_v3 = vld [vmem:[%s1110_s1 + $0x80] sm:$0xff]   ;;  %756 = vmatprep.subr.bf16.mxu1 %v833_v2  ;;  %736 = vmatprep.subr.bf16.mxu0 %v835_v4  ;;  %v838_v7 = vld [vmem:[%s1110_s1 + $0x88] sm:$0xff]   ;;  %v842_v11 = vld [vmem:[%s1110_s1 + $0x90] sm:$0xff]  }
   0x5   :  { %757 = vmatpush3.bf16.msra.mxu1 %v834_v3  ;;  %v843_v12 = vld [vmem:[%s1110_s1 + $0x58] sm:$0xff]   ;;  %v847_v16 = vld [vmem:[%s1110_s1 + $0x60] sm:$0xff]   ;;  %v851_v20 = vld [vmem:[%s1110_s1 + $0x68] sm:$0xff]  }
   0x6   :  { %758 = vmatprep.subr.bf16.mxu1 %v837_v6  ;;  %v844_v13 = vld [vmem:[%s1110_s1 + $0x18] sm:$0xff]   ;;  %v848_v17 = vld [vmem:[%s1110_s1 + $0x20] sm:$0xff]   ;;  %v852_v21 = vld [vmem:[%s1110_s1 + $0x28] sm:$0xff]  }
   0x7   :  { %737 = vmatpush3.bf16.msra.mxu0 %v836_v5  ;;  %v845_v14 = vld [vmem:[%s1110_s1 + $0xd8] sm:$0xff]   ;;  %v849_v18 = vld [vmem:[%s1110_s1 + $0xe0] sm:$0xff]   ;;  %v853_v22 = vld [vmem:[%s1110_s1 + $0xe8] sm:$0xff]  }
   0x8   :  { %738 = vmatprep.subr.bf16.mxu0 %v839_v8  ;;  %v846_v15 = vld [vmem:[%s1110_s1 + $0x98] sm:$0xff]   ;;  %v850_v19 = vld [vmem:[%s1110_s1 + $0xa0] sm:$0xff]   ;;  %v854_v23 = vld [vmem:[%s1110_s1 + $0xa8] sm:$0xff]  }
   0x9   :  { %759 = vmatpush3.bf16.msra.mxu1 %v838_v7  ;;  %v855_v24 = vld [vmem:[%s1110_s1 + $0x70] sm:$0xff]   ;;  %v859_v28 = vld [vmem:[%s1110_s1 + $0x78] sm:$0xff]   ;;  %v18_v31 = vld [vmem:[%s1111_s0] sm:$0xff] }
   0xa   :  { %760 = vmatprep.subr.bf16.mxu1 %v841_v10  ;;  %v856_v25 = vld [vmem:[%s1110_s1 + $0x30] sm:$0xff]   ;;  %v860_v29 = vld [vmem:[%s1110_s1 + $0x38] sm:$0xff]   ;;  %v671_v32 = vcombine.low %v18_v31, %v18_v31  ;;  %v672_v33 = vcombine.high %v18_v31, %v18_v31  ;;  %v865_v35 = vld [vmem:[%s1110_s1 + $0x140] sm:$0xff]  }
   0xb   :  { %739 = vmatpush3.bf16.msra.mxu0 %v840_v9  ;;  %v857_v26 = vld [vmem:[%s1110_s1 + $0xf0] sm:$0xff]   ;;  %v861_v30 = vld [vmem:[%s1110_s1 + $0xf8] sm:$0xff]   ;;  %v19_v36 = vld [vmem:[%s1111_s0 + $0x8] sm:$0xff] }
   0xc   :  { %740 = vmatprep.subr.bf16.mxu0 %v843_v12  ;;  %v858_v27 = vld [vmem:[%s1110_s1 + $0xb0] sm:$0xff]   ;;  %v864_v34 = vld [vmem:[%s1110_s1 + $0xb8] sm:$0xff]   ;;  %534 = vmatprep.mubr.bf16.mxu0 %v672_v33  ;;  %v673_v37 = vcombine.low %v19_v36, %v19_v36  ;;  %v674_v38 = vcombine.high %v19_v36, %v19_v36  ;;  %v868_v39 = vld [vmem:[%s1110_s1 + $0x100] sm:$0xff]  }
   0xd   :  { %761 = vmatpush3.bf16.msra.mxu1 %v842_v11  ;;  %v869_v40 = vld [vmem:[%s1110_s1 + $0x180] sm:$0xff]   ;;  %v870_v41 = vld [vmem:[%s1110_s1 + $0x148] sm:$0xff]   ;;  %v873_v45 = vld [vmem:[%s1110_s1 + $0x150] sm:$0xff]  }
   0xe   :  { %762 = vmatprep.subr.bf16.mxu1 %v845_v14  ;;  %574 = vmatprep.mubr.bf16.mxu1 %v674_v38  ;;  %v871_v43 = vld [vmem:[%s1110_s1 + $0x108] sm:$0xff]   ;;  %v874_v46 = vld [vmem:[%s1110_s1 + $0x110] sm:$0xff]   ;;  %v876_v48 = vld [vmem:[%s1110_s1 + $0x158] sm:$0xff]  }
   0xf   :  { %741 = vmatpush3.bf16.msra.mxu0 %v844_v13  ;;  %v872_v44 = vld [vmem:[%s1110_s1 + $0x188] sm:$0xff]   ;;  %v875_v47 = vld [vmem:[%s1110_s1 + $0x190] sm:$0xff]   ;;  %v877_v49 = vld [vmem:[%s1110_s1 + $0x118] sm:$0xff]  }
  0x10   :  { %742 = vmatprep.subr.bf16.mxu0 %v847_v16  ;;  %v879_v50 = vld [vmem:[%s1110_s1 + $0x160] sm:$0xff]   ;;  %v878_v51 = vld [vmem:[%s1110_s1 + $0x198] sm:$0xff]   ;;  %v882_v53 = vld [vmem:[%s1110_s1 + $0x168] sm:$0xff]  }
  0x11   :  { %763 = vmatpush3.bf16.msra.mxu1 %v846_v15  ;;  %v880_v52 = vld [vmem:[%s1110_s1 + $0x120] sm:$0xff]   ;;  %v883_v55 = vld [vmem:[%s1110_s1 + $0x128] sm:$0xff]   ;;  %v885_v56 = vld [vmem:[%s1110_s1 + $0x170] sm:$0xff]  }
  0x12   :  { %764 = vmatprep.subr.bf16.mxu1 %v849_v18  ;;  %v881_v54 = vld [vmem:[%s1110_s1 + $0x1a0] sm:$0xff]   ;;  %v884_v57 = vld [vmem:[%s1110_s1 + $0x1a8] sm:$0xff]   ;;  %v20_v58 = vld [vmem:[%s1111_s0 + $0x10] sm:$0xff] }
  0x13   :  { %743 = vmatpush3.bf16.msra.mxu0 %v848_v17  ;;  %v886_v59 = vld [vmem:[%s1110_s1 + $0x130] sm:$0xff]   ;;  %v676_v60 = vcombine.high %v20_v58, %v20_v58  ;;  %v888_v61 = vld [vmem:[%s1110_s1 + $0x178] sm:$0xff]   ;;  %v675_v1 = vcombine.low %v20_v58, %v20_v58  ;;  %v670_v4 = vld [vmem:[%s1112_s2] ss:$0 sm:$0xff] }
  0x14   :  { %744 = vmatprep.subr.bf16.mxu0 %v851_v20  ;;  %v887_v62 = vld [vmem:[%s1110_s1 + $0x1b0] sm:$0xff]   ;;  %v889_v63 = vld [vmem:[%s1110_s1 + $0x138] sm:$0xff]  }
  0x15   :  { %765 = vmatpush3.bf16.msra.mxu1 %v850_v19  ;;  %v892_v0 = vld [vmem:[%s1110_s1 + $0x1b8] sm:$0xff]  }
  0x16   :  { %766 = vmatprep.subr.bf16.mxu1 %v853_v22  ;;  %v893_v2 = vld [vmem:[%s1111_s0 + $0x18] ss:$0 sps:$4 sm:$0xff]  }
  0x17   :  { %745 = vmatpush3.bf16.msra.mxu0 %v852_v21 }
  0x18   :  { %746 = vmatprep.subr.bf16.mxu0 %v855_v24 }
  0x19   :  { %767 = vmatpush3.bf16.msra.mxu1 %v854_v23 }
  0x1a   :  { %768 = vmatprep.subr.bf16.mxu1 %v857_v26 }
  0x1b   :  { %747 = vmatpush3.bf16.msra.mxu0 %v856_v25  ;;  %v662_v25 = vld [vmem:[%s1113_s3] sm:$0xff] }
  0x1c   :  { %748 = vmatprep.subr.bf16.mxu0 %v859_v28 }
  0x1d   :  { %769 = vmatpush3.bf16.msra.mxu1 %v858_v27 }
  0x1e   :  { %770 = vmatprep.subr.bf16.mxu1 %v861_v30 }
  0x1f   :  { %749 = vmatpush3.bf16.msra.mxu0 %v860_v29 }
  0x20   :  { %778 = vmatprep.subr.bf16.mxu0 %v865_v35 }
  0x21   :  { %771 = vmatpush3.bf16.msra.mxu1 %v864_v34 }
  0x22   :  { %535 = vmatmul.mubr.bf16.vlgmr.msra.gmra.mrb[0].mxu0 %v671_v32  ;;  %809 = vmatprep.subr.bf16.mxu1 %v894_v42 }
  0x23   :  { %779 = vmatpush3.bf16.msra.mxu0 %v868_v39  ;;  %614 = vmatprep.mubr.bf16.mxu0 %v676_v60 }
  0x24   :  { %575 = vmatmul.mubr.bf16.vlgmr.msra.gmra.mrb[0].mxu1 %v673_v37  ;;  %780 = vmatprep.subr.bf16.mxu0 %v870_v41 }
  0x25   :  { %810 = vmatpush3.bf16.msra.mxu1 %v869_v40  ;;  %825 = vmatprep.mubr.msk.bf16.mxu1 %vm895_vm0, %v894_v42 }
  0x26   :  { %811 = vmatprep.subr.bf16.mxu1 %v894_v42 }
  0x27   :  { %781 = vmatpush3.bf16.msra.mxu0 %v871_v43 }
  0x28   :  { %782 = vmatprep.subr.bf16.mxu0 %v873_v45 }
  0x29   :  { %812 = vmatpush3.bf16.msra.mxu1 %v872_v44 }
  0x2a   :  { %813 = vmatprep.subr.bf16.mxu1 %v894_v42 }
  0x2b   :  { %783 = vmatpush3.bf16.msra.mxu0 %v874_v46 }
  0x2c   :  { %784 = vmatprep.subr.bf16.mxu0 %v876_v48 }
  0x2d   :  { %814 = vmatpush3.bf16.msra.mxu1 %v875_v47 }
  0x2e   :  { %815 = vmatprep.subr.bf16.mxu1 %v894_v42 }
  0x2f   :  { %785 = vmatpush3.bf16.msra.mxu0 %v877_v49 }
  0x30   :  { %786 = vmatprep.subr.bf16.mxu0 %v879_v50 }
  0x31   :  { %816 = vmatpush3.bf16.msra.mxu1 %v878_v51 }
  0x32   :  { %817 = vmatprep.subr.bf16.mxu1 %v894_v42 }
  0x33   :  { %787 = vmatpush3.bf16.msra.mxu0 %v880_v52 }
  0x34   :  { %788 = vmatprep.subr.bf16.mxu0 %v882_v53 }
  0x35   :  { %818 = vmatpush3.bf16.msra.mxu1 %v881_v54 }
  0x36   :  { %819 = vmatprep.subr.bf16.mxu1 %v894_v42 }
  0x37   :  { %789 = vmatpush3.bf16.msra.mxu0 %v883_v55 }
  0x38   :  { %790 = vmatprep.subr.bf16.mxu0 %v885_v56 }
  0x39   :  { %820 = vmatpush3.bf16.msra.mxu1 %v884_v57 }
  0x3a   :  { %821 = vmatprep.subr.bf16.mxu1 %v894_v42 }
  0x3b   :  { %791 = vmatpush3.bf16.msra.mxu0 %v886_v59 }
  0x3c   :  { %792 = vmatprep.subr.bf16.mxu0 %v888_v61 }
  0x3d   :  { %822 = vmatpush3.bf16.msra.mxu1 %v887_v62 }
  0x3e   :  { %823 = vmatprep.subr.bf16.mxu1 %v894_v42 }
  0x3f   :  { %793 = vmatpush3.bf16.msra.mxu0 %v889_v63 }
  0x41   :  { %824 = vmatpush3.bf16.msra.mxu1 %v892_v0 }
  0x42   :  { %615 = vmatmul.mubr.bf16.vlgmr.msra.gmra.mrb[4].mxu0 %v675_v1 }
  0x44   :  { %826 = vmatmul.mubr.bf16.vlgmr.msra.gmra.mrb[4].mxu1 %v893_v2 }
  0xf5   :  { %v750_v3 = vpop.f32.mrb[0].mxu0 }
  0xf6   :  { %v751_v5 = vpop.f32.mrb[1].mxu0 }
  0xf7   :  { %v752_v6 = vadd.f32 %v751_v5, %v750_v3  ;;  %v753_v7 = vpop.f32.mrb[2].mxu0  ;;  %v772_v8 = vpop.f32.mrb[0].mxu1 }
  0xf8   :  { %v754_v9 = vpop.f32.mrb[3].mxu0  ;;  %v773_v10 = vpop.f32.mrb[1].mxu1 }
  0xf9   :  { %v537_v11 = vadd.f32 %v752_v6, %v670_v4  ;;  %v774_v12 = vadd.f32 %v773_v10, %v772_v8  ;;  %v775_v13 = vpop.f32.mrb[2].mxu1 }
  0xfa   :  { %v776_v14 = vpop.f32.mrb[3].mxu1 }
  0xfb   :  { %v577_v15 = vadd.f32 %v774_v12, %v537_v11 }
 0x115   :  { %v794_v16 = vpop.f32.mrb[4].mxu0 }
 0x116   :  { %v795_v17 = vpop.f32.mrb[5].mxu0 }
 0x117   :  { %v796_v18 = vadd.f32 %v795_v17, %v794_v16  ;;  %v797_v19 = vpop.f32.mrb[6].mxu0  ;;  %v656_v20 = vpop.f32.mrb[4].mxu1 }
 0x118   :  { %v798_v21 = vpop.f32.mrb[7].mxu0  ;;  %v827_v22 = vpop.f32.mrb[5].mxu1 }
 0x119   :  { %v617_v23 = vadd.f32 %v796_v18, %v577_v15  ;;  %v659_v24 = vpop.f32.mrb[6].mxu1 }
 0x11a   :  { %v828_v26 = vpop.f32.mrb[7].mxu1 }
 0x11b   :  { %v657_v27 = vadd.f32 %v656_v20, %v617_v23 }
 0x11d   :  { %v663_v28 = vadd.f32 %v662_v25, %v657_v27 }
 0x11f   :  { %v664_v29 = vmax.f32 %v663_v28, 0.0 }
 0x121   :  { %665 = vst [vmem:[%s1114_s4] sm:$0xff] %v664_v29 }

</bundles_post_ra>
